<compile_context>
chip_gen: v5e
topology: v5e:2x2
jax: 0.10.0
libtpu: 0.0.40
codegen_flags: <defaults>
</compile_context>

<pallas_src>
import functools

import jax
import jax.numpy as jnp
from jax import lax
from jax.experimental import pallas as pl
from jax.experimental.pallas import tpu as pltpu

# ----------------------- model hyper-parameters (small) ---------------------
VOCAB = 64         # synthetic vocab
MAX_LEN = 16       # max_length
HIDDEN = 32        # hidden size D
NUM_HEADS = 4
HEAD_DIM = HIDDEN // NUM_HEADS
FFN = 64           # SwiGLU inner dim
NUM_LAYERS = 2
EPS = 1e-6
NEG_INF = -1e9


def _rmsnorm(x, w):
    ms = jnp.mean(x * x, axis=-1, keepdims=True)
    return x * lax.rsqrt(ms + EPS) * w


# ---------------------------------------------------------------------------
# Single fused kernel: embedding gather + n decoder layers + final RMSNorm.
# ---------------------------------------------------------------------------
@functools.lru_cache(maxsize=None)
def _build_fused_forward(batch, seqlen, n_layers, apply_norm, collect_hidden):
    B, L = int(batch), int(seqlen)
    BL = B * L
    D = HIDDEN
    scale = 1.0 / (HEAD_DIM ** 0.5)

    def kernel(ids_ref, mask_ref, table_ref, ln1_ref, wq_ref, wk_ref, wv_ref,
               wo_ref, ln2_ref, w1_ref, w3_ref, w2_ref, fnorm_ref, *refs):
        if collect_hidden:
            out_ref, hs_ref, emb_ref, ctx_ref = refs
        else:
            out_ref, emb_ref, ctx_ref = refs

        # ---- token embedding: SMEM ids -> gather rows of the VMEM table ----
        for i in range(BL):
            tok = ids_ref[i]
            emb_ref[pl.ds(i, 1), :] = table_ref[pl.ds(tok, 1), :]
        x = emb_ref[...]                                    # (BL, D) f32

        if collect_hidden:
            hs_ref[0] = x

        # ---- causal + key-padding bias, built once per batch, reused by all
        # layers (mask does not change between layers) ----
        row = lax.broadcasted_iota(jnp.int32, (L, L), 0)
        col = lax.broadcasted_iota(jnp.int32, (L, L), 1)
        causal = row >= col
        biases = []
        for b in range(B):
            keymask = jnp.broadcast_to(mask_ref[b] > 0.5, (L, L))
            biases.append(jnp.where(causal & keymask, 0.0, NEG_INF))

        for layer in range(n_layers):
            ln1 = ln1_ref[layer]                            # (1, D)
            wq = wq_ref[layer]
            wk = wk_ref[layer]
            wv = wv_ref[layer]
            wo = wo_ref[layer]
            ln2 = ln2_ref[layer]
            w1 = w1_ref[layer]
            w3 = w3_ref[layer]
            w2 = w2_ref[layer]

            # ---- attention (pre RMSNorm, causal + padding mask) ----
            h = _rmsnorm(x, ln1)                            # (BL, D)
            q = jnp.dot(h, wq, preferred_element_type=jnp.float32)
            k = jnp.dot(h, wk, preferred_element_type=jnp.float32)
            v = jnp.dot(h, wv, preferred_element_type=jnp.float32)

            for b in range(B):
                r0 = b * L
                qb = q[r0:r0 + L, :]
                kb = k[r0:r0 + L, :]
                vb = v[r0:r0 + L, :]
                for hd in range(NUM_HEADS):
                    c0 = hd * HEAD_DIM
                    qh = qb[:, c0:c0 + HEAD_DIM]
                    kh = kb[:, c0:c0 + HEAD_DIM]
                    vh = vb[:, c0:c0 + HEAD_DIM]
                    s = lax.dot_general(qh, kh, (((1,), (1,)), ((), ())),
                                        preferred_element_type=jnp.float32)
                    s = s * scale + biases[b]
                    s = s - jnp.max(s, axis=-1, keepdims=True)
                    p = jnp.exp(s)
                    p = p * pl.reciprocal(jnp.sum(p, axis=-1, keepdims=True),
                                          approx=True)
                    oh = jnp.dot(p, vh, preferred_element_type=jnp.float32)
                    # pack per-head outputs along the lane axis; the output
                    # projection below is a single (BL, D) @ (D, D) matmul.
                    ctx_ref[r0:r0 + L, c0:c0 + HEAD_DIM] = oh

            x = x + jnp.dot(ctx_ref[...], wo,
                            preferred_element_type=jnp.float32)

            # ---- SwiGLU MLP (pre RMSNorm) ----
            h2 = _rmsnorm(x, ln2)
            g = jnp.dot(h2, w1, preferred_element_type=jnp.float32)
            u = jnp.dot(h2, w3, preferred_element_type=jnp.float32)
            x = x + jnp.dot(jax.nn.silu(g) * u, w2,
                            preferred_element_type=jnp.float32)

            if collect_hidden:
                hs_ref[layer + 1] = x

        out_ref[...] = _rmsnorm(x, fnorm_ref[...]) if apply_norm else x

    vmem = pl.BlockSpec(memory_space=pltpu.MemorySpace.VMEM)
    smem = pl.BlockSpec(memory_space=pltpu.MemorySpace.SMEM)
    in_specs = [smem] + [vmem] * 12

    if collect_hidden:
        out_shape = (jax.ShapeDtypeStruct((BL, D), jnp.float32),
                     jax.ShapeDtypeStruct((n_layers + 1, BL, D), jnp.float32))
        out_specs = (vmem, vmem)
    else:
        out_shape = jax.ShapeDtypeStruct((BL, D), jnp.float32)
        out_specs = vmem

    return pl.pallas_call(
        kernel,
        out_shape=out_shape,
        in_specs=in_specs,
        out_specs=out_specs,
        scratch_shapes=[pltpu.VMEM((BL, D), jnp.float32),   # gathered embeddings
                        pltpu.VMEM((BL, D), jnp.float32)],  # packed attn context
    )


# Small standalone RMSNorm kernel (only used on the rare
# hidden_state_skip_layer > 0 and apply_final_norm path).
def _final_norm_kernel(x_ref, w_ref, y_ref):
    y_ref[...] = _rmsnorm(x_ref[...], w_ref[...])


def pallas_final_norm_2d(x2d, w):
    vmem = pl.BlockSpec(memory_space=pltpu.MemorySpace.VMEM)
    return pl.pallas_call(
        _final_norm_kernel,
        out_shape=jax.ShapeDtypeStruct(x2d.shape, jnp.float32),
        in_specs=[vmem, vmem],
        out_specs=vmem,
    )(x2d, w)


# ----------------------------- TextEncoder port -----------------------------
def use_default(value, default):
    return value if value is not None else default


class PallasTextEncoder:
    """JAX/Pallas port of hyvideo TextEncoder (text_encoder_type='llm')."""

    def __init__(self, max_length=MAX_LEN, prompt_template=None,
                 hidden_state_skip_layer=None, apply_final_norm=False,
                 use_attention_mask=True, seed=0):
        self.max_length = max_length
        self.prompt_template = prompt_template
        self.use_template = prompt_template is not None
        self.hidden_state_skip_layer = hidden_state_skip_layer
        self.apply_final_norm = apply_final_norm
        self.use_attention_mask = use_attention_mask
        self.output_key = "last_hidden_state"

        key = jax.random.PRNGKey(seed)
        ks = jax.random.split(key, 1 + NUM_LAYERS * 7)
        scale = 0.02

        def nrm(k, shape):
            return (scale * jax.random.normal(k, shape)).astype(jnp.float32)

        embed_table = nrm(ks[0], (VOCAB, HIDDEN))
        wq, wk, wv, wo, w1, w3, w2 = [], [], [], [], [], [], []
        for l in range(NUM_LAYERS):
            base = 1 + 7 * l
            wq.append(nrm(ks[base + 0], (HIDDEN, HIDDEN)))
            wk.append(nrm(ks[base + 1], (HIDDEN, HIDDEN)))
            wv.append(nrm(ks[base + 2], (HIDDEN, HIDDEN)))
            wo.append(nrm(ks[base + 3], (HIDDEN, HIDDEN)))
            w1.append(nrm(ks[base + 4], (HIDDEN, FFN)))
            w3.append(nrm(ks[base + 5], (HIDDEN, FFN)))
            w2.append(nrm(ks[base + 6], (FFN, HIDDEN)))

        ln_stack = jnp.ones((NUM_LAYERS, 1, HIDDEN), jnp.float32)
        self.final_norm_w = jnp.ones((1, HIDDEN), jnp.float32)
        # weights are stacked per-layer so a single pallas_call can unroll all
        # layers with static slicing of the stacked refs.
        self.params = (embed_table,
                       ln_stack,                           # ln1
                       jnp.stack(wq), jnp.stack(wk),
                       jnp.stack(wv), jnp.stack(wo),
                       ln_stack,                           # ln2
                       jnp.stack(w1), jnp.stack(w3), jnp.stack(w2),
                       self.final_norm_w)

    # -- synthetic deterministic "tokenizer" (truncation + max_length padding)
    def text2tokens(self, text):
        texts = [text] if isinstance(text, str) else list(text)
        if self.use_template:
            tmpl = self.prompt_template["template"]
            texts = [tmpl.format(t) for t in texts]
        ids, mask = [], []
        for t in texts:
            toks = [1] + [(ord(c) % (VOCAB - 2)) + 2 for c in t]  # BOS + chars
            toks = toks[: self.max_length]
            m = [1] * len(toks) + [0] * (self.max_length - len(toks))
            toks = toks + [0] * (self.max_length - len(toks))
            ids.append(toks)
            mask.append(m)
        return {
            "input_ids": jnp.asarray(ids, jnp.int32),
            "attention_mask": jnp.asarray(mask, jnp.int32),
        }

    def encode(self, batch_encoding, use_attention_mask=None,
               output_hidden_states=False, hidden_state_skip_layer=None):
        use_attention_mask = use_default(use_attention_mask,
                                         self.use_attention_mask)
        skip = use_default(hidden_state_skip_layer,
                           self.hidden_state_skip_layer)

        ids = batch_encoding["input_ids"]                       # (B, L)
        attn_mask = batch_encoding["attention_mask"]            # (B, L)
        B, L = ids.shape
        ids_flat = ids.reshape(B * L).astype(jnp.int32)
        mask_b1l = attn_mask.astype(jnp.float32).reshape(B, 1, L)

        collect = bool(output_hidden_states)
        if collect or skip is None:
            n_layers, apply_norm = NUM_LAYERS, True
        else:
            # only run the layers we actually need for the selected state
            n_layers = NUM_LAYERS - int(skip)
            apply_norm = (skip > 0) and self.apply_final_norm

        fwd = _build_fused_forward(B, L, n_layers, apply_norm, collect)
        outs = fwd(ids_flat, mask_b1l, *self.params)

        hidden_states = None
        if collect:
            last2d, stack = outs
            hidden_states = tuple(stack[i].reshape(B, L, HIDDEN)
                                  for i in range(NUM_LAYERS + 1))
            if skip is not None:
                last2d = stack[NUM_LAYERS - int(skip)]
                if skip > 0 and self.apply_final_norm:
                    last2d = pallas_final_norm_2d(last2d, self.final_norm_w)
        else:
            last2d = outs
        last_hidden_state = last2d.reshape(B, L, HIDDEN)

        out_mask = attn_mask if use_attention_mask else None
        if self.use_template:
            crop_start = self.prompt_template.get("crop_start", -1)
            if crop_start > 0:
                last_hidden_state = last_hidden_state[:, crop_start:]
                out_mask = out_mask[:, crop_start:] if use_attention_mask else None

        if output_hidden_states:
            return last_hidden_state, out_mask, hidden_states
        return last_hidden_state, out_mask

    def __call__(self, text, use_attention_mask=None,
                 output_hidden_states=False, hidden_state_skip_layer=None):
        batch_encoding = self.text2tokens(text)
        return self.encode(batch_encoding,
                           use_attention_mask=use_attention_mask,
                           output_hidden_states=output_hidden_states,
                           hidden_state_skip_layer=hidden_state_skip_layer)


# TODO(synk): the real module loads pretrained HF weights + a BPE tokenizer
# (CLIP/LLaMA) and has an i2v/LLaVA image branch; here weights/tokenizer are
# synthetic/deterministic and the image branch is not implemented.

if __name__ == "__main__":
    encoder = PallasTextEncoder(
        max_length=MAX_LEN,
        prompt_template={"template": "Describe: {}", "crop_start": 2},
        hidden_state_skip_layer=None,
        apply_final_norm=False,
        use_attention_mask=True,
        seed=0,
    )
    texts = ["a cat", "a dog running"]
    hidden_state, attention_mask = encoder(texts)
    hidden_state = jax.block_until_ready(hidden_state)
    attention_mask = jax.block_until_ready(attention_mask)
    assert hidden_state.shape == (2, MAX_LEN - 2, HIDDEN)
    assert attention_mask.shape == (2, MAX_LEN - 2)
    assert bool(jnp.all(jnp.isfinite(hidden_state)))
    print("KERNEL_OK")
</pallas_src>

<mosaic_0001>
module attributes {stable_mosaic.version = 11 : i64} {
  func.func @kernel(%arg0: memref<32xi32, #tpu.memory_space<smem>>, %arg1: memref<2x1x16xf32, #tpu.memory_space<vmem>>, %arg2: memref<64x32xf32, #tpu.memory_space<vmem>>, %arg3: memref<2x1x32xf32, #tpu.memory_space<vmem>>, %arg4: memref<2x32x32xf32, #tpu.memory_space<vmem>>, %arg5: memref<2x32x32xf32, #tpu.memory_space<vmem>>, %arg6: memref<2x32x32xf32, #tpu.memory_space<vmem>>, %arg7: memref<2x32x32xf32, #tpu.memory_space<vmem>>, %arg8: memref<2x1x32xf32, #tpu.memory_space<vmem>>, %arg9: memref<2x32x64xf32, #tpu.memory_space<vmem>>, %arg10: memref<2x32x64xf32, #tpu.memory_space<vmem>>, %arg11: memref<2x64x32xf32, #tpu.memory_space<vmem>>, %arg12: memref<1x32xf32, #tpu.memory_space<vmem>>, %arg13: memref<32x32xf32, #tpu.memory_space<vmem>>, %arg14: memref<32x32xf32, #tpu.memory_space<vmem>>, %arg15: memref<32x32xf32, #tpu.memory_space<vmem>>) attributes {dimension_semantics = [], scalar_prefetch = 0 : i64, scratch_operands = 2 : i64, tpu.core_type = #tpu.core_type<tc>} {
    %c0 = arith.constant 0 : index
    %0 = memref.load %arg0[%c0] : memref<32xi32, #tpu.memory_space<smem>>
    %1 = arith.index_cast %0 : i32 to index
    %c0_0 = arith.constant 0 : index
    %2 = vector.load %arg2[%1, %c0_0] : memref<64x32xf32, #tpu.memory_space<vmem>>, vector<1x32xf32>
    %c0_1 = arith.constant 0 : index
    %c0_2 = arith.constant 0 : index
    %3 = vector.load %arg14[%c0_1, %c0_2] : memref<32x32xf32, #tpu.memory_space<vmem>>, vector<1x32xf32>
    tpu.vector_store %arg14[%c0_1, %c0_2], %2 {strides = array<i32>} : memref<32x32xf32, #tpu.memory_space<vmem>>, vector<1x32xf32>,
    %c1 = arith.constant 1 : index
    %4 = memref.load %arg0[%c1] : memref<32xi32, #tpu.memory_space<smem>>
    %5 = arith.index_cast %4 : i32 to index
    %c0_3 = arith.constant 0 : index
    %6 = vector.load %arg2[%5, %c0_3] : memref<64x32xf32, #tpu.memory_space<vmem>>, vector<1x32xf32>
    %c1_4 = arith.constant 1 : index
    %c0_5 = arith.constant 0 : index
    %7 = vector.load %arg14[%c1_4, %c0_5] : memref<32x32xf32, #tpu.memory_space<vmem>>, vector<1x32xf32>
    tpu.vector_store %arg14[%c1_4, %c0_5], %6 {strides = array<i32>} : memref<32x32xf32, #tpu.memory_space<vmem>>, vector<1x32xf32>,
    %c2 = arith.constant 2 : index
    %8 = memref.load %arg0[%c2] : memref<32xi32, #tpu.memory_space<smem>>
    %9 = arith.index_cast %8 : i32 to index
    %c0_6 = arith.constant 0 : index
    %10 = vector.load %arg2[%9, %c0_6] : memref<64x32xf32, #tpu.memory_space<vmem>>, vector<1x32xf32>
    %c2_7 = arith.constant 2 : index
    %c0_8 = arith.constant 0 : index
    %11 = vector.load %arg14[%c2_7, %c0_8] : memref<32x32xf32, #tpu.memory_space<vmem>>, vector<1x32xf32>
    tpu.vector_store %arg14[%c2_7, %c0_8], %10 {strides = array<i32>} : memref<32x32xf32, #tpu.memory_space<vmem>>, vector<1x32xf32>,
    %c3 = arith.constant 3 : index
    %12 = memref.load %arg0[%c3] : memref<32xi32, #tpu.memory_space<smem>>
    %13 = arith.index_cast %12 : i32 to index
    %c0_9 = arith.constant 0 : index
    %14 = vector.load %arg2[%13, %c0_9] : memref<64x32xf32, #tpu.memory_space<vmem>>, vector<1x32xf32>
    %c3_10 = arith.constant 3 : index
    %c0_11 = arith.constant 0 : index
    %15 = vector.load %arg14[%c3_10, %c0_11] : memref<32x32xf32, #tpu.memory_space<vmem>>, vector<1x32xf32>
    tpu.vector_store %arg14[%c3_10, %c0_11], %14 {strides = array<i32>} : memref<32x32xf32, #tpu.memory_space<vmem>>, vector<1x32xf32>,
    %c4 = arith.constant 4 : index
    %16 = memref.load %arg0[%c4] : memref<32xi32, #tpu.memory_space<smem>>
    %17 = arith.index_cast %16 : i32 to index
    %c0_12 = arith.constant 0 : index
    %18 = vector.load %arg2[%17, %c0_12] : memref<64x32xf32, #tpu.memory_space<vmem>>, vector<1x32xf32>
    %c4_13 = arith.constant 4 : index
    %c0_14 = arith.constant 0 : index
    %19 = vector.load %arg14[%c4_13, %c0_14] : memref<32x32xf32, #tpu.memory_space<vmem>>, vector<1x32xf32>
    tpu.vector_store %arg14[%c4_13, %c0_14], %18 {strides = array<i32>} : memref<32x32xf32, #tpu.memory_space<vmem>>, vector<1x32xf32>,
    %c5 = arith.constant 5 : index
    %20 = memref.load %arg0[%c5] : memref<32xi32, #tpu.memory_space<smem>>
    %21 = arith.index_cast %20 : i32 to index
    %c0_15 = arith.constant 0 : index
    %22 = vector.load %arg2[%21, %c0_15] : memref<64x32xf32, #tpu.memory_space<vmem>>, vector<1x32xf32>
    %c5_16 = arith.constant 5 : index
    %c0_17 = arith.constant 0 : index
    %23 = vector.load %arg14[%c5_16, %c0_17] : memref<32x32xf32, #tpu.memory_space<vmem>>, vector<1x32xf32>
    tpu.vector_store %arg14[%c5_16, %c0_17], %22 {strides = array<i32>} : memref<32x32xf32, #tpu.memory_space<vmem>>, vector<1x32xf32>,
    %c6 = arith.constant 6 : index
    %24 = memref.load %arg0[%c6] : memref<32xi32, #tpu.memory_space<smem>>
    %25 = arith.index_cast %24 : i32 to index
    %c0_18 = arith.constant 0 : index
    %26 = vector.load %arg2[%25, %c0_18] : memref<64x32xf32, #tpu.memory_space<vmem>>, vector<1x32xf32>
    %c6_19 = arith.constant 6 : index
    %c0_20 = arith.constant 0 : index
    %27 = vector.load %arg14[%c6_19, %c0_20] : memref<32x32xf32, #tpu.memory_space<vmem>>, vector<1x32xf32>
    tpu.vector_store %arg14[%c6_19, %c0_20], %26 {strides = array<i32>} : memref<32x32xf32, #tpu.memory_space<vmem>>, vector<1x32xf32>,
    %c7 = arith.constant 7 : index
    %28 = memref.load %arg0[%c7] : memref<32xi32, #tpu.memory_space<smem>>
    %29 = arith.index_cast %28 : i32 to index
    %c0_21 = arith.constant 0 : index
    %30 = vector.load %arg2[%29, %c0_21] : memref<64x32xf32, #tpu.memory_space<vmem>>, vector<1x32xf32>
    %c7_22 = arith.constant 7 : index
    %c0_23 = arith.constant 0 : index
    %31 = vector.load %arg14[%c7_22, %c0_23] : memref<32x32xf32, #tpu.memory_space<vmem>>, vector<1x32xf32>
    tpu.vector_store %arg14[%c7_22, %c0_23], %30 {strides = array<i32>} : memref<32x32xf32, #tpu.memory_space<vmem>>, vector<1x32xf32>,
    %c8 = arith.constant 8 : index
    %32 = memref.load %arg0[%c8] : memref<32xi32, #tpu.memory_space<smem>>
    %33 = arith.index_cast %32 : i32 to index
    %c0_24 = arith.constant 0 : index
    %34 = vector.load %arg2[%33, %c0_24] : memref<64x32xf32, #tpu.memory_space<vmem>>, vector<1x32xf32>
    %c8_25 = arith.constant 8 : index
    %c0_26 = arith.constant 0 : index
    %35 = vector.load %arg14[%c8_25, %c0_26] : memref<32x32xf32, #tpu.memory_space<vmem>>, vector<1x32xf32>
    tpu.vector_store %arg14[%c8_25, %c0_26], %34 {strides = array<i32>} : memref<32x32xf32, #tpu.memory_space<vmem>>, vector<1x32xf32>,
    %c9 = arith.constant 9 : index
    %36 = memref.load %arg0[%c9] : memref<32xi32, #tpu.memory_space<smem>>
    %37 = arith.index_cast %36 : i32 to index
    %c0_27 = arith.constant 0 : index
    %38 = vector.load %arg2[%37, %c0_27] : memref<64x32xf32, #tpu.memory_space<vmem>>, vector<1x32xf32>
    %c9_28 = arith.constant 9 : index
    %c0_29 = arith.constant 0 : index
    %39 = vector.load %arg14[%c9_28, %c0_29] : memref<32x32xf32, #tpu.memory_space<vmem>>, vector<1x32xf32>
    tpu.vector_store %arg14[%c9_28, %c0_29], %38 {strides = array<i32>} : memref<32x32xf32, #tpu.memory_space<vmem>>, vector<1x32xf32>,
    %c10 = arith.constant 10 : index
    %40 = memref.load %arg0[%c10] : memref<32xi32, #tpu.memory_space<smem>>
    %41 = arith.index_cast %40 : i32 to index
    %c0_30 = arith.constant 0 : index
    %42 = vector.load %arg2[%41, %c0_30] : memref<64x32xf32, #tpu.memory_space<vmem>>, vector<1x32xf32>
    %c10_31 = arith.constant 10 : index
    %c0_32 = arith.constant 0 : index
    %43 = vector.load %arg14[%c10_31, %c0_32] : memref<32x32xf32, #tpu.memory_space<vmem>>, vector<1x32xf32>
    tpu.vector_store %arg14[%c10_31, %c0_32], %42 {strides = array<i32>} : memref<32x32xf32, #tpu.memory_space<vmem>>, vector<1x32xf32>,
    %c11 = arith.constant 11 : index
    %44 = memref.load %arg0[%c11] : memref<32xi32, #tpu.memory_space<smem>>
    %45 = arith.index_cast %44 : i32 to index
    %c0_33 = arith.constant 0 : index
    %46 = vector.load %arg2[%45, %c0_33] : memref<64x32xf32, #tpu.memory_space<vmem>>, vector<1x32xf32>
    %c11_34 = arith.constant 11 : index
    %c0_35 = arith.constant 0 : index
    %47 = vector.load %arg14[%c11_34, %c0_35] : memref<32x32xf32, #tpu.memory_space<vmem>>, vector<1x32xf32>
    tpu.vector_store %arg14[%c11_34, %c0_35], %46 {strides = array<i32>} : memref<32x32xf32, #tpu.memory_space<vmem>>, vector<1x32xf32>,
    %c12 = arith.constant 12 : index
    %48 = memref.load %arg0[%c12] : memref<32xi32, #tpu.memory_space<smem>>
    %49 = arith.index_cast %48 : i32 to index
    %c0_36 = arith.constant 0 : index
    %50 = vector.load %arg2[%49, %c0_36] : memref<64x32xf32, #tpu.memory_space<vmem>>, vector<1x32xf32>
    %c12_37 = arith.constant 12 : index
    %c0_38 = arith.constant 0 : index
    %51 = vector.load %arg14[%c12_37, %c0_38] : memref<32x32xf32, #tpu.memory_space<vmem>>, vector<1x32xf32>
    tpu.vector_store %arg14[%c12_37, %c0_38], %50 {strides = array<i32>} : memref<32x32xf32, #tpu.memory_space<vmem>>, vector<1x32xf32>,
    %c13 = arith.constant 13 : index
    %52 = memref.load %arg0[%c13] : memref<32xi32, #tpu.memory_space<smem>>
    %53 = arith.index_cast %52 : i32 to index
    %c0_39 = arith.constant 0 : index
    %54 = vector.load %arg2[%53, %c0_39] : memref<64x32xf32, #tpu.memory_space<vmem>>, vector<1x32xf32>
    %c13_40 = arith.constant 13 : index
    %c0_41 = arith.constant 0 : index
    %55 = vector.load %arg14[%c13_40, %c0_41] : memref<32x32xf32, #tpu.memory_space<vmem>>, vector<1x32xf32>
    tpu.vector_store %arg14[%c13_40, %c0_41], %54 {strides = array<i32>} : memref<32x32xf32, #tpu.memory_space<vmem>>, vector<1x32xf32>,
    %c14 = arith.constant 14 : index
    %56 = memref.load %arg0[%c14] : memref<32xi32, #tpu.memory_space<smem>>
    %57 = arith.index_cast %56 : i32 to index
    %c0_42 = arith.constant 0 : index
    %58 = vector.load %arg2[%57, %c0_42] : memref<64x32xf32, #tpu.memory_space<vmem>>, vector<1x32xf32>
    %c14_43 = arith.constant 14 : index
    %c0_44 = arith.constant 0 : index
    %59 = vector.load %arg14[%c14_43, %c0_44] : memref<32x32xf32, #tpu.memory_space<vmem>>, vector<1x32xf32>
    tpu.vector_store %arg14[%c14_43, %c0_44], %58 {strides = array<i32>} : memref<32x32xf32, #tpu.memory_space<vmem>>, vector<1x32xf32>,
    %c15 = arith.constant 15 : index
    %60 = memref.load %arg0[%c15] : memref<32xi32, #tpu.memory_space<smem>>
    %61 = arith.index_cast %60 : i32 to index
    %c0_45 = arith.constant 0 : index
    %62 = vector.load %arg2[%61, %c0_45] : memref<64x32xf32, #tpu.memory_space<vmem>>, vector<1x32xf32>
    %c15_46 = arith.constant 15 : index
    %c0_47 = arith.constant 0 : index
    %63 = vector.load %arg14[%c15_46, %c0_47] : memref<32x32xf32, #tpu.memory_space<vmem>>, vector<1x32xf32>
    tpu.vector_store %arg14[%c15_46, %c0_47], %62 {strides = array<i32>} : memref<32x32xf32, #tpu.memory_space<vmem>>, vector<1x32xf32>,
    %c16 = arith.constant 16 : index
    %64 = memref.load %arg0[%c16] : memref<32xi32, #tpu.memory_space<smem>>
    %65 = arith.index_cast %64 : i32 to index
    %c0_48 = arith.constant 0 : index
    %66 = vector.load %arg2[%65, %c0_48] : memref<64x32xf32, #tpu.memory_space<vmem>>, vector<1x32xf32>
    %c16_49 = arith.constant 16 : index
    %c0_50 = arith.constant 0 : index
    %67 = vector.load %arg14[%c16_49, %c0_50] : memref<32x32xf32, #tpu.memory_space<vmem>>, vector<1x32xf32>
    tpu.vector_store %arg14[%c16_49, %c0_50], %66 {strides = array<i32>} : memref<32x32xf32, #tpu.memory_space<vmem>>, vector<1x32xf32>,
    %c17 = arith.constant 17 : index
    %68 = memref.load %arg0[%c17] : memref<32xi32, #tpu.memory_space<smem>>
    %69 = arith.index_cast %68 : i32 to index
    %c0_51 = arith.constant 0 : index
    %70 = vector.load %arg2[%69, %c0_51] : memref<64x32xf32, #tpu.memory_space<vmem>>, vector<1x32xf32>
    %c17_52 = arith.constant 17 : index
    %c0_53 = arith.constant 0 : index
    %71 = vector.load %arg14[%c17_52, %c0_53] : memref<32x32xf32, #tpu.memory_space<vmem>>, vector<1x32xf32>
    tpu.vector_store %arg14[%c17_52, %c0_53], %70 {strides = array<i32>} : memref<32x32xf32, #tpu.memory_space<vmem>>, vector<1x32xf32>,
    %c18 = arith.constant 18 : index
    %72 = memref.load %arg0[%c18] : memref<32xi32, #tpu.memory_space<smem>>
    %73 = arith.index_cast %72 : i32 to index
    %c0_54 = arith.constant 0 : index
    %74 = vector.load %arg2[%73, %c0_54] : memref<64x32xf32, #tpu.memory_space<vmem>>, vector<1x32xf32>
    %c18_55 = arith.constant 18 : index
    %c0_56 = arith.constant 0 : index
    %75 = vector.load %arg14[%c18_55, %c0_56] : memref<32x32xf32, #tpu.memory_space<vmem>>, vector<1x32xf32>
    tpu.vector_store %arg14[%c18_55, %c0_56], %74 {strides = array<i32>} : memref<32x32xf32, #tpu.memory_space<vmem>>, vector<1x32xf32>,
    %c19 = arith.constant 19 : index
    %76 = memref.load %arg0[%c19] : memref<32xi32, #tpu.memory_space<smem>>
    %77 = arith.index_cast %76 : i32 to index
    %c0_57 = arith.constant 0 : index
    %78 = vector.load %arg2[%77, %c0_57] : memref<64x32xf32, #tpu.memory_space<vmem>>, vector<1x32xf32>
    %c19_58 = arith.constant 19 : index
    %c0_59 = arith.constant 0 : index
    %79 = vector.load %arg14[%c19_58, %c0_59] : memref<32x32xf32, #tpu.memory_space<vmem>>, vector<1x32xf32>
    tpu.vector_store %arg14[%c19_58, %c0_59], %78 {strides = array<i32>} : memref<32x32xf32, #tpu.memory_space<vmem>>, vector<1x32xf32>,
    %c20 = arith.constant 20 : index
    %80 = memref.load %arg0[%c20] : memref<32xi32, #tpu.memory_space<smem>>
    %81 = arith.index_cast %80 : i32 to index
    %c0_60 = arith.constant 0 : index
    %82 = vector.load %arg2[%81, %c0_60] : memref<64x32xf32, #tpu.memory_space<vmem>>, vector<1x32xf32>
    %c20_61 = arith.constant 20 : index
    %c0_62 = arith.constant 0 : index
    %83 = vector.load %arg14[%c20_61, %c0_62] : memref<32x32xf32, #tpu.memory_space<vmem>>, vector<1x32xf32>
    tpu.vector_store %arg14[%c20_61, %c0_62], %82 {strides = array<i32>} : memref<32x32xf32, #tpu.memory_space<vmem>>, vector<1x32xf32>,
    %c21 = arith.constant 21 : index
    %84 = memref.load %arg0[%c21] : memref<32xi32, #tpu.memory_space<smem>>
    %85 = arith.index_cast %84 : i32 to index
    %c0_63 = arith.constant 0 : index
    %86 = vector.load %arg2[%85, %c0_63] : memref<64x32xf32, #tpu.memory_space<vmem>>, vector<1x32xf32>
    %c21_64 = arith.constant 21 : index
    %c0_65 = arith.constant 0 : index
    %87 = vector.load %arg14[%c21_64, %c0_65] : memref<32x32xf32, #tpu.memory_space<vmem>>, vector<1x32xf32>
    tpu.vector_store %arg14[%c21_64, %c0_65], %86 {strides = array<i32>} : memref<32x32xf32, #tpu.memory_space<vmem>>, vector<1x32xf32>,
    %c22 = arith.constant 22 : index
    %88 = memref.load %arg0[%c22] : memref<32xi32, #tpu.memory_space<smem>>
    %89 = arith.index_cast %88 : i32 to index
    %c0_66 = arith.constant 0 : index
    %90 = vector.load %arg2[%89, %c0_66] : memref<64x32xf32, #tpu.memory_space<vmem>>, vector<1x32xf32>
    %c22_67 = arith.constant 22 : index
    %c0_68 = arith.constant 0 : index
    %91 = vector.load %arg14[%c22_67, %c0_68] : memref<32x32xf32, #tpu.memory_space<vmem>>, vector<1x32xf32>
    tpu.vector_store %arg14[%c22_67, %c0_68], %90 {strides = array<i32>} : memref<32x32xf32, #tpu.memory_space<vmem>>, vector<1x32xf32>,
    %c23 = arith.constant 23 : index
    %92 = memref.load %arg0[%c23] : memref<32xi32, #tpu.memory_space<smem>>
    %93 = arith.index_cast %92 : i32 to index
    %c0_69 = arith.constant 0 : index
    %94 = vector.load %arg2[%93, %c0_69] : memref<64x32xf32, #tpu.memory_space<vmem>>, vector<1x32xf32>
    %c23_70 = arith.constant 23 : index
    %c0_71 = arith.constant 0 : index
    %95 = vector.load %arg14[%c23_70, %c0_71] : memref<32x32xf32, #tpu.memory_space<vmem>>, vector<1x32xf32>
    tpu.vector_store %arg14[%c23_70, %c0_71], %94 {strides = array<i32>} : memref<32x32xf32, #tpu.memory_space<vmem>>, vector<1x32xf32>,
    %c24 = arith.constant 24 : index
    %96 = memref.load %arg0[%c24] : memref<32xi32, #tpu.memory_space<smem>>
    %97 = arith.index_cast %96 : i32 to index
    %c0_72 = arith.constant 0 : index
    %98 = vector.load %arg2[%97, %c0_72] : memref<64x32xf32, #tpu.memory_space<vmem>>, vector<1x32xf32>
    %c24_73 = arith.constant 24 : index
    %c0_74 = arith.constant 0 : index
    %99 = vector.load %arg14[%c24_73, %c0_74] : memref<32x32xf32, #tpu.memory_space<vmem>>, vector<1x32xf32>
    tpu.vector_store %arg14[%c24_73, %c0_74], %98 {strides = array<i32>} : memref<32x32xf32, #tpu.memory_space<vmem>>, vector<1x32xf32>,
    %c25 = arith.constant 25 : index
    %100 = memref.load %arg0[%c25] : memref<32xi32, #tpu.memory_space<smem>>
    %101 = arith.index_cast %100 : i32 to index
    %c0_75 = arith.constant 0 : index
    %102 = vector.load %arg2[%101, %c0_75] : memref<64x32xf32, #tpu.memory_space<vmem>>, vector<1x32xf32>
    %c25_76 = arith.constant 25 : index
    %c0_77 = arith.constant 0 : index
    %103 = vector.load %arg14[%c25_76, %c0_77] : memref<32x32xf32, #tpu.memory_space<vmem>>, vector<1x32xf32>
    tpu.vector_store %arg14[%c25_76, %c0_77], %102 {strides = array<i32>} : memref<32x32xf32, #tpu.memory_space<vmem>>, vector<1x32xf32>,
    %c26 = arith.constant 26 : index
    %104 = memref.load %arg0[%c26] : memref<32xi32, #tpu.memory_space<smem>>
    %105 = arith.index_cast %104 : i32 to index
    %c0_78 = arith.constant 0 : index
    %106 = vector.load %arg2[%105, %c0_78] : memref<64x32xf32, #tpu.memory_space<vmem>>, vector<1x32xf32>
    %c26_79 = arith.constant 26 : index
    %c0_80 = arith.constant 0 : index
    %107 = vector.load %arg14[%c26_79, %c0_80] : memref<32x32xf32, #tpu.memory_space<vmem>>, vector<1x32xf32>
    tpu.vector_store %arg14[%c26_79, %c0_80], %106 {strides = array<i32>} : memref<32x32xf32, #tpu.memory_space<vmem>>, vector<1x32xf32>,
    %c27 = arith.constant 27 : index
    %108 = memref.load %arg0[%c27] : memref<32xi32, #tpu.memory_space<smem>>
    %109 = arith.index_cast %108 : i32 to index
    %c0_81 = arith.constant 0 : index
    %110 = vector.load %arg2[%109, %c0_81] : memref<64x32xf32, #tpu.memory_space<vmem>>, vector<1x32xf32>
    %c27_82 = arith.constant 27 : index
    %c0_83 = arith.constant 0 : index
    %111 = vector.load %arg14[%c27_82, %c0_83] : memref<32x32xf32, #tpu.memory_space<vmem>>, vector<1x32xf32>
    tpu.vector_store %arg14[%c27_82, %c0_83], %110 {strides = array<i32>} : memref<32x32xf32, #tpu.memory_space<vmem>>, vector<1x32xf32>,
    %c28 = arith.constant 28 : index
    %112 = memref.load %arg0[%c28] : memref<32xi32, #tpu.memory_space<smem>>
    %113 = arith.index_cast %112 : i32 to index
    %c0_84 = arith.constant 0 : index
    %114 = vector.load %arg2[%113, %c0_84] : memref<64x32xf32, #tpu.memory_space<vmem>>, vector<1x32xf32>
    %c28_85 = arith.constant 28 : index
    %c0_86 = arith.constant 0 : index
    %115 = vector.load %arg14[%c28_85, %c0_86] : memref<32x32xf32, #tpu.memory_space<vmem>>, vector<1x32xf32>
    tpu.vector_store %arg14[%c28_85, %c0_86], %114 {strides = array<i32>} : memref<32x32xf32, #tpu.memory_space<vmem>>, vector<1x32xf32>,
    %c29 = arith.constant 29 : index
    %116 = memref.load %arg0[%c29] : memref<32xi32, #tpu.memory_space<smem>>
    %117 = arith.index_cast %116 : i32 to index
    %c0_87 = arith.constant 0 : index
    %118 = vector.load %arg2[%117, %c0_87] : memref<64x32xf32, #tpu.memory_space<vmem>>, vector<1x32xf32>
    %c29_88 = arith.constant 29 : index
    %c0_89 = arith.constant 0 : index
    %119 = vector.load %arg14[%c29_88, %c0_89] : memref<32x32xf32, #tpu.memory_space<vmem>>, vector<1x32xf32>
    tpu.vector_store %arg14[%c29_88, %c0_89], %118 {strides = array<i32>} : memref<32x32xf32, #tpu.memory_space<vmem>>, vector<1x32xf32>,
    %c30 = arith.constant 30 : index
    %120 = memref.load %arg0[%c30] : memref<32xi32, #tpu.memory_space<smem>>
    %121 = arith.index_cast %120 : i32 to index
    %c0_90 = arith.constant 0 : index
    %122 = vector.load %arg2[%121, %c0_90] : memref<64x32xf32, #tpu.memory_space<vmem>>, vector<1x32xf32>
    %c30_91 = arith.constant 30 : index
    %c0_92 = arith.constant 0 : index
    %123 = vector.load %arg14[%c30_91, %c0_92] : memref<32x32xf32, #tpu.memory_space<vmem>>, vector<1x32xf32>
    tpu.vector_store %arg14[%c30_91, %c0_92], %122 {strides = array<i32>} : memref<32x32xf32, #tpu.memory_space<vmem>>, vector<1x32xf32>,
    %c31 = arith.constant 31 : index
    %124 = memref.load %arg0[%c31] : memref<32xi32, #tpu.memory_space<smem>>
    %125 = arith.index_cast %124 : i32 to index
    %c0_93 = arith.constant 0 : index
    %126 = vector.load %arg2[%125, %c0_93] : memref<64x32xf32, #tpu.memory_space<vmem>>, vector<1x32xf32>
    %c31_94 = arith.constant 31 : index
    %c0_95 = arith.constant 0 : index
    %127 = vector.load %arg14[%c31_94, %c0_95] : memref<32x32xf32, #tpu.memory_space<vmem>>, vector<1x32xf32>
    tpu.vector_store %arg14[%c31_94, %c0_95], %126 {strides = array<i32>} : memref<32x32xf32, #tpu.memory_space<vmem>>, vector<1x32xf32>,
    %c0_96 = arith.constant 0 : index
    %c0_97 = arith.constant 0 : index
    %128 = vector.load %arg14[%c0_96, %c0_97] : memref<32x32xf32, #tpu.memory_space<vmem>>, vector<32x32xf32>
    %129 = tpu.iota {dimensions = array<i32: 0>} : vector<16x16xi32>
    %130 = tpu.iota {dimensions = array<i32: 1>} : vector<16x16xi32>
    %131 = arith.cmpi sge, %129, %130 : vector<16x16xi32>
    %c0_98 = arith.constant 0 : index
    %c0_99 = arith.constant 0 : index
    %c0_100 = arith.constant 0 : index
    %132 = vector.load %arg1[%c0_98, %c0_99, %c0_100] : memref<2x1x16xf32, #tpu.memory_space<vmem>>, vector<1x1x16xf32>
    %133 = vector.shape_cast %132 : vector<1x1x16xf32> to vector<1x16xf32>
    %cst = arith.constant 5.000000e-01 : f32
    %134 = vector.broadcast %cst : f32 to vector<1x16xf32>
    %135 = arith.cmpf ogt, %133, %134 : vector<1x16xf32>
    %136 = vector.shape_cast %135 : vector<1x16xi1> to vector<1x16xi1>
    %137 = vector.broadcast %136 : vector<1x16xi1> to vector<16x16xi1>
    %138 = arith.andi %131, %137 : vector<16x16xi1>
    %cst_101 = arith.constant 0.000000e+00 : f32
    %cst_102 = arith.constant -1.000000e+09 : f32
    %139 = vector.broadcast %cst_101 : f32 to vector<16x16xf32>
    %140 = vector.broadcast %cst_102 : f32 to vector<16x16xf32>
    %141 = arith.select %138, %139, %140 : vector<16x16xi1>, vector<16x16xf32>
    %c1_103 = arith.constant 1 : index
    %c0_104 = arith.constant 0 : index
    %c0_105 = arith.constant 0 : index
    %142 = vector.load %arg1[%c1_103, %c0_104, %c0_105] : memref<2x1x16xf32, #tpu.memory_space<vmem>>, vector<1x1x16xf32>
    %143 = vector.shape_cast %142 : vector<1x1x16xf32> to vector<1x16xf32>
    %cst_106 = arith.constant 5.000000e-01 : f32
    %144 = vector.broadcast %cst_106 : f32 to vector<1x16xf32>
    %145 = arith.cmpf ogt, %143, %144 : vector<1x16xf32>
    %146 = vector.shape_cast %145 : vector<1x16xi1> to vector<1x16xi1>
    %147 = vector.broadcast %146 : vector<1x16xi1> to vector<16x16xi1>
    %148 = arith.andi %131, %147 : vector<16x16xi1>
    %cst_107 = arith.constant 0.000000e+00 : f32
    %cst_108 = arith.constant -1.000000e+09 : f32
    %149 = vector.broadcast %cst_107 : f32 to vector<16x16xf32>
    %150 = vector.broadcast %cst_108 : f32 to vector<16x16xf32>
    %151 = arith.select %148, %149, %150 : vector<16x16xi1>, vector<16x16xf32>
    %c0_109 = arith.constant 0 : index
    %c0_110 = arith.constant 0 : index
    %c0_111 = arith.constant 0 : index
    %152 = vector.load %arg3[%c0_109, %c0_110, %c0_111] : memref<2x1x32xf32, #tpu.memory_space<vmem>>, vector<1x1x32xf32>
    %153 = vector.shape_cast %152 : vector<1x1x32xf32> to vector<1x32xf32>
    %c0_112 = arith.constant 0 : index
    %c0_113 = arith.constant 0 : index
    %c0_114 = arith.constant 0 : index
    %154 = vector.load %arg4[%c0_112, %c0_113, %c0_114] : memref<2x32x32xf32, #tpu.memory_space<vmem>>, vector<1x32x32xf32>
    %155 = vector.shape_cast %154 : vector<1x32x32xf32> to vector<32x32xf32>
    %c0_115 = arith.constant 0 : index
    %c0_116 = arith.constant 0 : index
    %c0_117 = arith.constant 0 : index
    %156 = vector.load %arg5[%c0_115, %c0_116, %c0_117] : memref<2x32x32xf32, #tpu.memory_space<vmem>>, vector<1x32x32xf32>
    %157 = vector.shape_cast %156 : vector<1x32x32xf32> to vector<32x32xf32>
    %c0_118 = arith.constant 0 : index
    %c0_119 = arith.constant 0 : index
    %c0_120 = arith.constant 0 : index
    %158 = vector.load %arg6[%c0_118, %c0_119, %c0_120] : memref<2x32x32xf32, #tpu.memory_space<vmem>>, vector<1x32x32xf32>
    %159 = vector.shape_cast %158 : vector<1x32x32xf32> to vector<32x32xf32>
    %c0_121 = arith.constant 0 : index
    %c0_122 = arith.constant 0 : index
    %c0_123 = arith.constant 0 : index
    %160 = vector.load %arg7[%c0_121, %c0_122, %c0_123] : memref<2x32x32xf32, #tpu.memory_space<vmem>>, vector<1x32x32xf32>
    %161 = vector.shape_cast %160 : vector<1x32x32xf32> to vector<32x32xf32>
    %c0_124 = arith.constant 0 : index
    %c0_125 = arith.constant 0 : index
    %c0_126 = arith.constant 0 : index
    %162 = vector.load %arg8[%c0_124, %c0_125, %c0_126] : memref<2x1x32xf32, #tpu.memory_space<vmem>>, vector<1x1x32xf32>
    %163 = vector.shape_cast %162 : vector<1x1x32xf32> to vector<1x32xf32>
    %c0_127 = arith.constant 0 : index
    %c0_128 = arith.constant 0 : index
    %c0_129 = arith.constant 0 : index
    %164 = vector.load %arg9[%c0_127, %c0_128, %c0_129] : memref<2x32x64xf32, #tpu.memory_space<vmem>>, vector<1x32x64xf32>
    %165 = vector.shape_cast %164 : vector<1x32x64xf32> to vector<32x64xf32>
    %c0_130 = arith.constant 0 : index
    %c0_131 = arith.constant 0 : index
    %c0_132 = arith.constant 0 : index
    %166 = vector.load %arg10[%c0_130, %c0_131, %c0_132] : memref<2x32x64xf32, #tpu.memory_space<vmem>>, vector<1x32x64xf32>
    %167 = vector.shape_cast %166 : vector<1x32x64xf32> to vector<32x64xf32>
    %c0_133 = arith.constant 0 : index
    %c0_134 = arith.constant 0 : index
    %c0_135 = arith.constant 0 : index
    %168 = vector.load %arg11[%c0_133, %c0_134, %c0_135] : memref<2x64x32xf32, #tpu.memory_space<vmem>>, vector<1x64x32xf32>
    %169 = vector.shape_cast %168 : vector<1x64x32xf32> to vector<64x32xf32>
    %170 = arith.mulf %128, %128 : vector<32x32xf32>
    %cst_136 = arith.constant dense<0.000000e+00> : vector<32xf32>
    %171 = vector.multi_reduction <add>, %170, %cst_136 [1] : vector<32x32xf32> to vector<32xf32>
    %172 = vector.shape_cast %171 : vector<32xf32> to vector<32x1xf32>
    %cst_137 = arith.constant 3.200000e+01 : f32
    %173 = vector.broadcast %cst_137 : f32 to vector<32x1xf32>
    %174 = arith.divf %172, %173 : vector<32x1xf32>
    %cst_138 = arith.constant 9.99999997E-7 : f32
    %175 = vector.broadcast %cst_138 : f32 to vector<32x1xf32>
    %176 = arith.addf %174, %175 : vector<32x1xf32>
    %177 = math.rsqrt %176 : vector<32x1xf32>
    %178 = vector.broadcast %177 : vector<32x1xf32> to vector<32x32xf32>
    %179 = arith.mulf %128, %178 : vector<32x32xf32>
    %180 = vector.broadcast %153 : vector<1x32xf32> to vector<32x32xf32>
    %181 = arith.mulf %179, %180 : vector<32x32xf32>
    %cst_139 = arith.constant dense<0.000000e+00> : vector<32x32xf32>
    %182 = tpu.matmul %181, %155, %cst_139 {dimension_numbers = #tpu.dot_dimension_numbers<[1], [0], [0], [1], [0, 0, 1, 1], [], []>} : vector<32x32xf32>, vector<32x32xf32>, vector<32x32xf32> -> vector<32x32xf32>
    %cst_140 = arith.constant dense<0.000000e+00> : vector<32x32xf32>
    %183 = tpu.matmul %181, %157, %cst_140 {dimension_numbers = #tpu.dot_dimension_numbers<[1], [0], [0], [1], [0, 0, 1, 1], [], []>} : vector<32x32xf32>, vector<32x32xf32>, vector<32x32xf32> -> vector<32x32xf32>
    %cst_141 = arith.constant dense<0.000000e+00> : vector<32x32xf32>
    %184 = tpu.matmul %181, %159, %cst_141 {dimension_numbers = #tpu.dot_dimension_numbers<[1], [0], [0], [1], [0, 0, 1, 1], [], []>} : vector<32x32xf32>, vector<32x32xf32>, vector<32x32xf32> -> vector<32x32xf32>
    %185 = vector.extract_strided_slice %182 {offsets = [0, 0], sizes = [16, 32], strides = [1, 1]} : vector<32x32xf32> to vector<16x32xf32>
    %186 = vector.extract_strided_slice %183 {offsets = [0, 0], sizes = [16, 32], strides = [1, 1]} : vector<32x32xf32> to vector<16x32xf32>
    %187 = vector.extract_strided_slice %184 {offsets = [0, 0], sizes = [16, 32], strides = [1, 1]} : vector<32x32xf32> to vector<16x32xf32>
    %188 = vector.extract_strided_slice %185 {offsets = [0, 0], sizes = [16, 8], strides = [1, 1]} : vector<16x32xf32> to vector<16x8xf32>
    %189 = vector.extract_strided_slice %186 {offsets = [0, 0], sizes = [16, 8], strides = [1, 1]} : vector<16x32xf32> to vector<16x8xf32>
    %190 = vector.extract_strided_slice %187 {offsets = [0, 0], sizes = [16, 8], strides = [1, 1]} : vector<16x32xf32> to vector<16x8xf32>
    %cst_142 = arith.constant dense<0.000000e+00> : vector<16x16xf32>
    %191 = tpu.matmul %188, %189, %cst_142 {dimension_numbers = #tpu.dot_dimension_numbers<[1], [1], [0], [0], [0, 0, 1, 0], [], []>} : vector<16x8xf32>, vector<16x8xf32>, vector<16x16xf32> -> vector<16x16xf32>
    %cst_143 = arith.constant 0.353553385 : f32
    %192 = vector.broadcast %cst_143 : f32 to vector<16x16xf32>
    %193 = arith.mulf %191, %192 : vector<16x16xf32>
    %194 = arith.addf %193, %141 : vector<16x16xf32>
    %cst_144 = arith.constant dense<0xFF800000> : vector<16xf32>
    %195 = vector.multi_reduction <maximumf>, %194, %cst_144 [1] : vector<16x16xf32> to vector<16xf32>
    %196 = vector.shape_cast %195 : vector<16xf32> to vector<16x1xf32>
    %197 = vector.broadcast %196 : vector<16x1xf32> to vector<16x16xf32>
    %198 = arith.subf %194, %197 : vector<16x16xf32>
    %199 = math.exp %198 : vector<16x16xf32>
    %cst_145 = arith.constant dense<0.000000e+00> : vector<16xf32>
    %200 = vector.multi_reduction <add>, %199, %cst_145 [1] : vector<16x16xf32> to vector<16xf32>
    %201 = vector.shape_cast %200 : vector<16xf32> to vector<16x1xf32>
    %202 = tpu.reciprocal %201 {approx = true} : vector<16x1xf32> -> vector<16x1xf32>
    %203 = vector.broadcast %202 : vector<16x1xf32> to vector<16x16xf32>
    %204 = arith.mulf %199, %203 : vector<16x16xf32>
    %cst_146 = arith.constant dense<0.000000e+00> : vector<16x8xf32>
    %205 = tpu.matmul %204, %190, %cst_146 {dimension_numbers = #tpu.dot_dimension_numbers<[1], [0], [0], [1], [0, 0, 1, 1], [], []>} : vector<16x16xf32>, vector<16x8xf32>, vector<16x8xf32> -> vector<16x8xf32>
    %c0_147 = arith.constant 0 : index
    %c0_148 = arith.constant 0 : index
    %206 = vector.load %arg15[%c0_147, %c0_148] : memref<32x32xf32, #tpu.memory_space<vmem>>, vector<16x8xf32>
    tpu.vector_store %arg15[%c0_147, %c0_148], %205 {strides = array<i32>} : memref<32x32xf32, #tpu.memory_space<vmem>>, vector<16x8xf32>,
    %207 = vector.extract_strided_slice %185 {offsets = [0, 8], sizes = [16, 8], strides = [1, 1]} : vector<16x32xf32> to vector<16x8xf32>
    %208 = vector.extract_strided_slice %186 {offsets = [0, 8], sizes = [16, 8], strides = [1, 1]} : vector<16x32xf32> to vector<16x8xf32>
    %209 = vector.extract_strided_slice %187 {offsets = [0, 8], sizes = [16, 8], strides = [1, 1]} : vector<16x32xf32> to vector<16x8xf32>
    %cst_149 = arith.constant dense<0.000000e+00> : vector<16x16xf32>
    %210 = tpu.matmul %207, %208, %cst_149 {dimension_numbers = #tpu.dot_dimension_numbers<[1], [1], [0], [0], [0, 0, 1, 0], [], []>} : vector<16x8xf32>, vector<16x8xf32>, vector<16x16xf32> -> vector<16x16xf32>
    %cst_150 = arith.constant 0.353553385 : f32
    %211 = vector.broadcast %cst_150 : f32 to vector<16x16xf32>
    %212 = arith.mulf %210, %211 : vector<16x16xf32>
    %213 = arith.addf %212, %141 : vector<16x16xf32>
    %cst_151 = arith.constant dense<0xFF800000> : vector<16xf32>
    %214 = vector.multi_reduction <maximumf>, %213, %cst_151 [1] : vector<16x16xf32> to vector<16xf32>
    %215 = vector.shape_cast %214 : vector<16xf32> to vector<16x1xf32>
    %216 = vector.broadcast %215 : vector<16x1xf32> to vector<16x16xf32>
    %217 = arith.subf %213, %216 : vector<16x16xf32>
    %218 = math.exp %217 : vector<16x16xf32>
    %cst_152 = arith.constant dense<0.000000e+00> : vector<16xf32>
    %219 = vector.multi_reduction <add>, %218, %cst_152 [1] : vector<16x16xf32> to vector<16xf32>
    %220 = vector.shape_cast %219 : vector<16xf32> to vector<16x1xf32>
    %221 = tpu.reciprocal %220 {approx = true} : vector<16x1xf32> -> vector<16x1xf32>
    %222 = vector.broadcast %221 : vector<16x1xf32> to vector<16x16xf32>
    %223 = arith.mulf %218, %222 : vector<16x16xf32>
    %cst_153 = arith.constant dense<0.000000e+00> : vector<16x8xf32>
    %224 = tpu.matmul %223, %209, %cst_153 {dimension_numbers = #tpu.dot_dimension_numbers<[1], [0], [0], [1], [0, 0, 1, 1], [], []>} : vector<16x16xf32>, vector<16x8xf32>, vector<16x8xf32> -> vector<16x8xf32>
    %c0_154 = arith.constant 0 : index
    %c8_155 = arith.constant 8 : index
    %225 = vector.load %arg15[%c0_154, %c8_155] : memref<32x32xf32, #tpu.memory_space<vmem>>, vector<16x8xf32>
    tpu.vector_store %arg15[%c0_154, %c8_155], %224 {strides = array<i32>} : memref<32x32xf32, #tpu.memory_space<vmem>>, vector<16x8xf32>,
    %226 = vector.extract_strided_slice %185 {offsets = [0, 16], sizes = [16, 8], strides = [1, 1]} : vector<16x32xf32> to vector<16x8xf32>
    %227 = vector.extract_strided_slice %186 {offsets = [0, 16], sizes = [16, 8], strides = [1, 1]} : vector<16x32xf32> to vector<16x8xf32>
    %228 = vector.extract_strided_slice %187 {offsets = [0, 16], sizes = [16, 8], strides = [1, 1]} : vector<16x32xf32> to vector<16x8xf32>
    %cst_156 = arith.constant dense<0.000000e+00> : vector<16x16xf32>
    %229 = tpu.matmul %226, %227, %cst_156 {dimension_numbers = #tpu.dot_dimension_numbers<[1], [1], [0], [0], [0, 0, 1, 0], [], []>} : vector<16x8xf32>, vector<16x8xf32>, vector<16x16xf32> -> vector<16x16xf32>
    %cst_157 = arith.constant 0.353553385 : f32
    %230 = vector.broadcast %cst_157 : f32 to vector<16x16xf32>
    %231 = arith.mulf %229, %230 : vector<16x16xf32>
    %232 = arith.addf %231, %141 : vector<16x16xf32>
    %cst_158 = arith.constant dense<0xFF800000> : vector<16xf32>
    %233 = vector.multi_reduction <maximumf>, %232, %cst_158 [1] : vector<16x16xf32> to vector<16xf32>
    %234 = vector.shape_cast %233 : vector<16xf32> to vector<16x1xf32>
    %235 = vector.broadcast %234 : vector<16x1xf32> to vector<16x16xf32>
    %236 = arith.subf %232, %235 : vector<16x16xf32>
    %237 = math.exp %236 : vector<16x16xf32>
    %cst_159 = arith.constant dense<0.000000e+00> : vector<16xf32>
    %238 = vector.multi_reduction <add>, %237, %cst_159 [1] : vector<16x16xf32> to vector<16xf32>
    %239 = vector.shape_cast %238 : vector<16xf32> to vector<16x1xf32>
    %240 = tpu.reciprocal %239 {approx = true} : vector<16x1xf32> -> vector<16x1xf32>
    %241 = vector.broadcast %240 : vector<16x1xf32> to vector<16x16xf32>
    %242 = arith.mulf %237, %241 : vector<16x16xf32>
    %cst_160 = arith.constant dense<0.000000e+00> : vector<16x8xf32>
    %243 = tpu.matmul %242, %228, %cst_160 {dimension_numbers = #tpu.dot_dimension_numbers<[1], [0], [0], [1], [0, 0, 1, 1], [], []>} : vector<16x16xf32>, vector<16x8xf32>, vector<16x8xf32> -> vector<16x8xf32>
    %c0_161 = arith.constant 0 : index
    %c16_162 = arith.constant 16 : index
    %244 = vector.load %arg15[%c0_161, %c16_162] : memref<32x32xf32, #tpu.memory_space<vmem>>, vector<16x8xf32>
    tpu.vector_store %arg15[%c0_161, %c16_162], %243 {strides = array<i32>} : memref<32x32xf32, #tpu.memory_space<vmem>>, vector<16x8xf32>,
    %245 = vector.extract_strided_slice %185 {offsets = [0, 24], sizes = [16, 8], strides = [1, 1]} : vector<16x32xf32> to vector<16x8xf32>
    %246 = vector.extract_strided_slice %186 {offsets = [0, 24], sizes = [16, 8], strides = [1, 1]} : vector<16x32xf32> to vector<16x8xf32>
    %247 = vector.extract_strided_slice %187 {offsets = [0, 24], sizes = [16, 8], strides = [1, 1]} : vector<16x32xf32> to vector<16x8xf32>
    %cst_163 = arith.constant dense<0.000000e+00> : vector<16x16xf32>
    %248 = tpu.matmul %245, %246, %cst_163 {dimension_numbers = #tpu.dot_dimension_numbers<[1], [1], [0], [0], [0, 0, 1, 0], [], []>} : vector<16x8xf32>, vector<16x8xf32>, vector<16x16xf32> -> vector<16x16xf32>
    %cst_164 = arith.constant 0.353553385 : f32
    %249 = vector.broadcast %cst_164 : f32 to vector<16x16xf32>
    %250 = arith.mulf %248, %249 : vector<16x16xf32>
    %251 = arith.addf %250, %141 : vector<16x16xf32>
    %cst_165 = arith.constant dense<0xFF800000> : vector<16xf32>
    %252 = vector.multi_reduction <maximumf>, %251, %cst_165 [1] : vector<16x16xf32> to vector<16xf32>
    %253 = vector.shape_cast %252 : vector<16xf32> to vector<16x1xf32>
    %254 = vector.broadcast %253 : vector<16x1xf32> to vector<16x16xf32>
    %255 = arith.subf %251, %254 : vector<16x16xf32>
    %256 = math.exp %255 : vector<16x16xf32>
    %cst_166 = arith.constant dense<0.000000e+00> : vector<16xf32>
    %257 = vector.multi_reduction <add>, %256, %cst_166 [1] : vector<16x16xf32> to vector<16xf32>
    %258 = vector.shape_cast %257 : vector<16xf32> to vector<16x1xf32>
    %259 = tpu.reciprocal %258 {approx = true} : vector<16x1xf32> -> vector<16x1xf32>
    %260 = vector.broadcast %259 : vector<16x1xf32> to vector<16x16xf32>
    %261 = arith.mulf %256, %260 : vector<16x16xf32>
    %cst_167 = arith.constant dense<0.000000e+00> : vector<16x8xf32>
    %262 = tpu.matmul %261, %247, %cst_167 {dimension_numbers = #tpu.dot_dimension_numbers<[1], [0], [0], [1], [0, 0, 1, 1], [], []>} : vector<16x16xf32>, vector<16x8xf32>, vector<16x8xf32> -> vector<16x8xf32>
    %c0_168 = arith.constant 0 : index
    %c24_169 = arith.constant 24 : index
    %263 = vector.load %arg15[%c0_168, %c24_169] : memref<32x32xf32, #tpu.memory_space<vmem>>, vector<16x8xf32>
    tpu.vector_store %arg15[%c0_168, %c24_169], %262 {strides = array<i32>} : memref<32x32xf32, #tpu.memory_space<vmem>>, vector<16x8xf32>,
    %264 = vector.extract_strided_slice %182 {offsets = [16, 0], sizes = [16, 32], strides = [1, 1]} : vector<32x32xf32> to vector<16x32xf32>
    %265 = vector.extract_strided_slice %183 {offsets = [16, 0], sizes = [16, 32], strides = [1, 1]} : vector<32x32xf32> to vector<16x32xf32>
    %266 = vector.extract_strided_slice %184 {offsets = [16, 0], sizes = [16, 32], strides = [1, 1]} : vector<32x32xf32> to vector<16x32xf32>
    %267 = vector.extract_strided_slice %264 {offsets = [0, 0], sizes = [16, 8], strides = [1, 1]} : vector<16x32xf32> to vector<16x8xf32>
    %268 = vector.extract_strided_slice %265 {offsets = [0, 0], sizes = [16, 8], strides = [1, 1]} : vector<16x32xf32> to vector<16x8xf32>
    %269 = vector.extract_strided_slice %266 {offsets = [0, 0], sizes = [16, 8], strides = [1, 1]} : vector<16x32xf32> to vector<16x8xf32>
    %cst_170 = arith.constant dense<0.000000e+00> : vector<16x16xf32>
    %270 = tpu.matmul %267, %268, %cst_170 {dimension_numbers = #tpu.dot_dimension_numbers<[1], [1], [0], [0], [0, 0, 1, 0], [], []>} : vector<16x8xf32>, vector<16x8xf32>, vector<16x16xf32> -> vector<16x16xf32>
    %cst_171 = arith.constant 0.353553385 : f32
    %271 = vector.broadcast %cst_171 : f32 to vector<16x16xf32>
    %272 = arith.mulf %270, %271 : vector<16x16xf32>
    %273 = arith.addf %272, %151 : vector<16x16xf32>
    %cst_172 = arith.constant dense<0xFF800000> : vector<16xf32>
    %274 = vector.multi_reduction <maximumf>, %273, %cst_172 [1] : vector<16x16xf32> to vector<16xf32>
    %275 = vector.shape_cast %274 : vector<16xf32> to vector<16x1xf32>
    %276 = vector.broadcast %275 : vector<16x1xf32> to vector<16x16xf32>
    %277 = arith.subf %273, %276 : vector<16x16xf32>
    %278 = math.exp %277 : vector<16x16xf32>
    %cst_173 = arith.constant dense<0.000000e+00> : vector<16xf32>
    %279 = vector.multi_reduction <add>, %278, %cst_173 [1] : vector<16x16xf32> to vector<16xf32>
    %280 = vector.shape_cast %279 : vector<16xf32> to vector<16x1xf32>
    %281 = tpu.reciprocal %280 {approx = true} : vector<16x1xf32> -> vector<16x1xf32>
    %282 = vector.broadcast %281 : vector<16x1xf32> to vector<16x16xf32>
    %283 = arith.mulf %278, %282 : vector<16x16xf32>
    %cst_174 = arith.constant dense<0.000000e+00> : vector<16x8xf32>
    %284 = tpu.matmul %283, %269, %cst_174 {dimension_numbers = #tpu.dot_dimension_numbers<[1], [0], [0], [1], [0, 0, 1, 1], [], []>} : vector<16x16xf32>, vector<16x8xf32>, vector<16x8xf32> -> vector<16x8xf32>
    %c16_175 = arith.constant 16 : index
    %c0_176 = arith.constant 0 : index
    %285 = vector.load %arg15[%c16_175, %c0_176] : memref<32x32xf32, #tpu.memory_space<vmem>>, vector<16x8xf32>
    tpu.vector_store %arg15[%c16_175, %c0_176], %284 {strides = array<i32>} : memref<32x32xf32, #tpu.memory_space<vmem>>, vector<16x8xf32>,
    %286 = vector.extract_strided_slice %264 {offsets = [0, 8], sizes = [16, 8], strides = [1, 1]} : vector<16x32xf32> to vector<16x8xf32>
    %287 = vector.extract_strided_slice %265 {offsets = [0, 8], sizes = [16, 8], strides = [1, 1]} : vector<16x32xf32> to vector<16x8xf32>
    %288 = vector.extract_strided_slice %266 {offsets = [0, 8], sizes = [16, 8], strides = [1, 1]} : vector<16x32xf32> to vector<16x8xf32>
    %cst_177 = arith.constant dense<0.000000e+00> : vector<16x16xf32>
    %289 = tpu.matmul %286, %287, %cst_177 {dimension_numbers = #tpu.dot_dimension_numbers<[1], [1], [0], [0], [0, 0, 1, 0], [], []>} : vector<16x8xf32>, vector<16x8xf32>, vector<16x16xf32> -> vector<16x16xf32>
    %cst_178 = arith.constant 0.353553385 : f32
    %290 = vector.broadcast %cst_178 : f32 to vector<16x16xf32>
    %291 = arith.mulf %289, %290 : vector<16x16xf32>
    %292 = arith.addf %291, %151 : vector<16x16xf32>
    %cst_179 = arith.constant dense<0xFF800000> : vector<16xf32>
    %293 = vector.multi_reduction <maximumf>, %292, %cst_179 [1] : vector<16x16xf32> to vector<16xf32>
    %294 = vector.shape_cast %293 : vector<16xf32> to vector<16x1xf32>
    %295 = vector.broadcast %294 : vector<16x1xf32> to vector<16x16xf32>
    %296 = arith.subf %292, %295 : vector<16x16xf32>
    %297 = math.exp %296 : vector<16x16xf32>
    %cst_180 = arith.constant dense<0.000000e+00> : vector<16xf32>
    %298 = vector.multi_reduction <add>, %297, %cst_180 [1] : vector<16x16xf32> to vector<16xf32>
    %299 = vector.shape_cast %298 : vector<16xf32> to vector<16x1xf32>
    %300 = tpu.reciprocal %299 {approx = true} : vector<16x1xf32> -> vector<16x1xf32>
    %301 = vector.broadcast %300 : vector<16x1xf32> to vector<16x16xf32>
    %302 = arith.mulf %297, %301 : vector<16x16xf32>
    %cst_181 = arith.constant dense<0.000000e+00> : vector<16x8xf32>
    %303 = tpu.matmul %302, %288, %cst_181 {dimension_numbers = #tpu.dot_dimension_numbers<[1], [0], [0], [1], [0, 0, 1, 1], [], []>} : vector<16x16xf32>, vector<16x8xf32>, vector<16x8xf32> -> vector<16x8xf32>
    %c16_182 = arith.constant 16 : index
    %c8_183 = arith.constant 8 : index
    %304 = vector.load %arg15[%c16_182, %c8_183] : memref<32x32xf32, #tpu.memory_space<vmem>>, vector<16x8xf32>
    tpu.vector_store %arg15[%c16_182, %c8_183], %303 {strides = array<i32>} : memref<32x32xf32, #tpu.memory_space<vmem>>, vector<16x8xf32>,
    %305 = vector.extract_strided_slice %264 {offsets = [0, 16], sizes = [16, 8], strides = [1, 1]} : vector<16x32xf32> to vector<16x8xf32>
    %306 = vector.extract_strided_slice %265 {offsets = [0, 16], sizes = [16, 8], strides = [1, 1]} : vector<16x32xf32> to vector<16x8xf32>
    %307 = vector.extract_strided_slice %266 {offsets = [0, 16], sizes = [16, 8], strides = [1, 1]} : vector<16x32xf32> to vector<16x8xf32>
    %cst_184 = arith.constant dense<0.000000e+00> : vector<16x16xf32>
    %308 = tpu.matmul %305, %306, %cst_184 {dimension_numbers = #tpu.dot_dimension_numbers<[1], [1], [0], [0], [0, 0, 1, 0], [], []>} : vector<16x8xf32>, vector<16x8xf32>, vector<16x16xf32> -> vector<16x16xf32>
    %cst_185 = arith.constant 0.353553385 : f32
    %309 = vector.broadcast %cst_185 : f32 to vector<16x16xf32>
    %310 = arith.mulf %308, %309 : vector<16x16xf32>
    %311 = arith.addf %310, %151 : vector<16x16xf32>
    %cst_186 = arith.constant dense<0xFF800000> : vector<16xf32>
    %312 = vector.multi_reduction <maximumf>, %311, %cst_186 [1] : vector<16x16xf32> to vector<16xf32>
    %313 = vector.shape_cast %312 : vector<16xf32> to vector<16x1xf32>
    %314 = vector.broadcast %313 : vector<16x1xf32> to vector<16x16xf32>
    %315 = arith.subf %311, %314 : vector<16x16xf32>
    %316 = math.exp %315 : vector<16x16xf32>
    %cst_187 = arith.constant dense<0.000000e+00> : vector<16xf32>
    %317 = vector.multi_reduction <add>, %316, %cst_187 [1] : vector<16x16xf32> to vector<16xf32>
    %318 = vector.shape_cast %317 : vector<16xf32> to vector<16x1xf32>
    %319 = tpu.reciprocal %318 {approx = true} : vector<16x1xf32> -> vector<16x1xf32>
    %320 = vector.broadcast %319 : vector<16x1xf32> to vector<16x16xf32>
    %321 = arith.mulf %316, %320 : vector<16x16xf32>
    %cst_188 = arith.constant dense<0.000000e+00> : vector<16x8xf32>
    %322 = tpu.matmul %321, %307, %cst_188 {dimension_numbers = #tpu.dot_dimension_numbers<[1], [0], [0], [1], [0, 0, 1, 1], [], []>} : vector<16x16xf32>, vector<16x8xf32>, vector<16x8xf32> -> vector<16x8xf32>
    %c16_189 = arith.constant 16 : index
    %c16_190 = arith.constant 16 : index
    %323 = vector.load %arg15[%c16_189, %c16_190] : memref<32x32xf32, #tpu.memory_space<vmem>>, vector<16x8xf32>
    tpu.vector_store %arg15[%c16_189, %c16_190], %322 {strides = array<i32>} : memref<32x32xf32, #tpu.memory_space<vmem>>, vector<16x8xf32>,
    %324 = vector.extract_strided_slice %264 {offsets = [0, 24], sizes = [16, 8], strides = [1, 1]} : vector<16x32xf32> to vector<16x8xf32>
    %325 = vector.extract_strided_slice %265 {offsets = [0, 24], sizes = [16, 8], strides = [1, 1]} : vector<16x32xf32> to vector<16x8xf32>
    %326 = vector.extract_strided_slice %266 {offsets = [0, 24], sizes = [16, 8], strides = [1, 1]} : vector<16x32xf32> to vector<16x8xf32>
    %cst_191 = arith.constant dense<0.000000e+00> : vector<16x16xf32>
    %327 = tpu.matmul %324, %325, %cst_191 {dimension_numbers = #tpu.dot_dimension_numbers<[1], [1], [0], [0], [0, 0, 1, 0], [], []>} : vector<16x8xf32>, vector<16x8xf32>, vector<16x16xf32> -> vector<16x16xf32>
    %cst_192 = arith.constant 0.353553385 : f32
    %328 = vector.broadcast %cst_192 : f32 to vector<16x16xf32>
    %329 = arith.mulf %327, %328 : vector<16x16xf32>
    %330 = arith.addf %329, %151 : vector<16x16xf32>
    %cst_193 = arith.constant dense<0xFF800000> : vector<16xf32>
    %331 = vector.multi_reduction <maximumf>, %330, %cst_193 [1] : vector<16x16xf32> to vector<16xf32>
    %332 = vector.shape_cast %331 : vector<16xf32> to vector<16x1xf32>
    %333 = vector.broadcast %332 : vector<16x1xf32> to vector<16x16xf32>
    %334 = arith.subf %330, %333 : vector<16x16xf32>
    %335 = math.exp %334 : vector<16x16xf32>
    %cst_194 = arith.constant dense<0.000000e+00> : vector<16xf32>
    %336 = vector.multi_reduction <add>, %335, %cst_194 [1] : vector<16x16xf32> to vector<16xf32>
    %337 = vector.shape_cast %336 : vector<16xf32> to vector<16x1xf32>
    %338 = tpu.reciprocal %337 {approx = true} : vector<16x1xf32> -> vector<16x1xf32>
    %339 = vector.broadcast %338 : vector<16x1xf32> to vector<16x16xf32>
    %340 = arith.mulf %335, %339 : vector<16x16xf32>
    %cst_195 = arith.constant dense<0.000000e+00> : vector<16x8xf32>
    %341 = tpu.matmul %340, %326, %cst_195 {dimension_numbers = #tpu.dot_dimension_numbers<[1], [0], [0], [1], [0, 0, 1, 1], [], []>} : vector<16x16xf32>, vector<16x8xf32>, vector<16x8xf32> -> vector<16x8xf32>
    %c16_196 = arith.constant 16 : index
    %c24_197 = arith.constant 24 : index
    %342 = vector.load %arg15[%c16_196, %c24_197] : memref<32x32xf32, #tpu.memory_space<vmem>>, vector<16x8xf32>
    tpu.vector_store %arg15[%c16_196, %c24_197], %341 {strides = array<i32>} : memref<32x32xf32, #tpu.memory_space<vmem>>, vector<16x8xf32>,
    %c0_198 = arith.constant 0 : index
    %c0_199 = arith.constant 0 : index
    %343 = vector.load %arg15[%c0_198, %c0_199] : memref<32x32xf32, #tpu.memory_space<vmem>>, vector<32x32xf32>
    %cst_200 = arith.constant dense<0.000000e+00> : vector<32x32xf32>
    %344 = tpu.matmul %343, %161, %cst_200 {dimension_numbers = #tpu.dot_dimension_numbers<[1], [0], [0], [1], [0, 0, 1, 1], [], []>} : vector<32x32xf32>, vector<32x32xf32>, vector<32x32xf32> -> vector<32x32xf32>
    %345 = arith.addf %128, %344 : vector<32x32xf32>
    %346 = arith.mulf %345, %345 : vector<32x32xf32>
    %cst_201 = arith.constant dense<0.000000e+00> : vector<32xf32>
    %347 = vector.multi_reduction <add>, %346, %cst_201 [1] : vector<32x32xf32> to vector<32xf32>
    %348 = vector.shape_cast %347 : vector<32xf32> to vector<32x1xf32>
    %cst_202 = arith.constant 3.200000e+01 : f32
    %349 = vector.broadcast %cst_202 : f32 to vector<32x1xf32>
    %350 = arith.divf %348, %349 : vector<32x1xf32>
    %cst_203 = arith.constant 9.99999997E-7 : f32
    %351 = vector.broadcast %cst_203 : f32 to vector<32x1xf32>
    %352 = arith.addf %350, %351 : vector<32x1xf32>
    %353 = math.rsqrt %352 : vector<32x1xf32>
    %354 = vector.broadcast %353 : vector<32x1xf32> to vector<32x32xf32>
    %355 = arith.mulf %345, %354 : vector<32x32xf32>
    %356 = vector.broadcast %163 : vector<1x32xf32> to vector<32x32xf32>
    %357 = arith.mulf %355, %356 : vector<32x32xf32>
    %cst_204 = arith.constant dense<0.000000e+00> : vector<32x64xf32>
    %358 = tpu.matmul %357, %165, %cst_204 {dimension_numbers = #tpu.dot_dimension_numbers<[1], [0], [0], [1], [0, 0, 1, 1], [], []>} : vector<32x32xf32>, vector<32x64xf32>, vector<32x64xf32> -> vector<32x64xf32>
    %cst_205 = arith.constant dense<0.000000e+00> : vector<32x64xf32>
    %359 = tpu.matmul %357, %167, %cst_205 {dimension_numbers = #tpu.dot_dimension_numbers<[1], [0], [0], [1], [0, 0, 1, 1], [], []>} : vector<32x32xf32>, vector<32x64xf32>, vector<32x64xf32> -> vector<32x64xf32>
    %360 = arith.negf %358 : vector<32x64xf32>
    %361 = math.exp %360 : vector<32x64xf32>
    %cst_206 = arith.constant 1.000000e+00 : f32
    %362 = vector.broadcast %cst_206 : f32 to vector<32x64xf32>
    %363 = arith.addf %362, %361 : vector<32x64xf32>
    %364 = arith.divf %362, %363 : vector<32x64xf32>
    %365 = arith.mulf %358, %364 : vector<32x64xf32>
    %366 = arith.mulf %365, %359 : vector<32x64xf32>
    %cst_207 = arith.constant dense<0.000000e+00> : vector<32x32xf32>
    %367 = tpu.matmul %366, %169, %cst_207 {dimension_numbers = #tpu.dot_dimension_numbers<[1], [0], [0], [1], [0, 0, 1, 1], [], []>} : vector<32x64xf32>, vector<64x32xf32>, vector<32x32xf32> -> vector<32x32xf32>
    %368 = arith.addf %345, %367 : vector<32x32xf32>
    %c1_208 = arith.constant 1 : index
    %c0_209 = arith.constant 0 : index
    %c0_210 = arith.constant 0 : index
    %369 = vector.load %arg3[%c1_208, %c0_209, %c0_210] : memref<2x1x32xf32, #tpu.memory_space<vmem>>, vector<1x1x32xf32>
    %370 = vector.shape_cast %369 : vector<1x1x32xf32> to vector<1x32xf32>
    %c1_211 = arith.constant 1 : index
    %c0_212 = arith.constant 0 : index
    %c0_213 = arith.constant 0 : index
    %371 = vector.load %arg4[%c1_211, %c0_212, %c0_213] : memref<2x32x32xf32, #tpu.memory_space<vmem>>, vector<1x32x32xf32>
    %372 = vector.shape_cast %371 : vector<1x32x32xf32> to vector<32x32xf32>
    %c1_214 = arith.constant 1 : index
    %c0_215 = arith.constant 0 : index
    %c0_216 = arith.constant 0 : index
    %373 = vector.load %arg5[%c1_214, %c0_215, %c0_216] : memref<2x32x32xf32, #tpu.memory_space<vmem>>, vector<1x32x32xf32>
    %374 = vector.shape_cast %373 : vector<1x32x32xf32> to vector<32x32xf32>
    %c1_217 = arith.constant 1 : index
    %c0_218 = arith.constant 0 : index
    %c0_219 = arith.constant 0 : index
    %375 = vector.load %arg6[%c1_217, %c0_218, %c0_219] : memref<2x32x32xf32, #tpu.memory_space<vmem>>, vector<1x32x32xf32>
    %376 = vector.shape_cast %375 : vector<1x32x32xf32> to vector<32x32xf32>
    %c1_220 = arith.constant 1 : index
    %c0_221 = arith.constant 0 : index
    %c0_222 = arith.constant 0 : index
    %377 = vector.load %arg7[%c1_220, %c0_221, %c0_222] : memref<2x32x32xf32, #tpu.memory_space<vmem>>, vector<1x32x32xf32>
    %378 = vector.shape_cast %377 : vector<1x32x32xf32> to vector<32x32xf32>
    %c1_223 = arith.constant 1 : index
    %c0_224 = arith.constant 0 : index
    %c0_225 = arith.constant 0 : index
    %379 = vector.load %arg8[%c1_223, %c0_224, %c0_225] : memref<2x1x32xf32, #tpu.memory_space<vmem>>, vector<1x1x32xf32>
    %380 = vector.shape_cast %379 : vector<1x1x32xf32> to vector<1x32xf32>
    %c1_226 = arith.constant 1 : index
    %c0_227 = arith.constant 0 : index
    %c0_228 = arith.constant 0 : index
    %381 = vector.load %arg9[%c1_226, %c0_227, %c0_228] : memref<2x32x64xf32, #tpu.memory_space<vmem>>, vector<1x32x64xf32>
    %382 = vector.shape_cast %381 : vector<1x32x64xf32> to vector<32x64xf32>
    %c1_229 = arith.constant 1 : index
    %c0_230 = arith.constant 0 : index
    %c0_231 = arith.constant 0 : index
    %383 = vector.load %arg10[%c1_229, %c0_230, %c0_231] : memref<2x32x64xf32, #tpu.memory_space<vmem>>, vector<1x32x64xf32>
    %384 = vector.shape_cast %383 : vector<1x32x64xf32> to vector<32x64xf32>
    %c1_232 = arith.constant 1 : index
    %c0_233 = arith.constant 0 : index
    %c0_234 = arith.constant 0 : index
    %385 = vector.load %arg11[%c1_232, %c0_233, %c0_234] : memref<2x64x32xf32, #tpu.memory_space<vmem>>, vector<1x64x32xf32>
    %386 = vector.shape_cast %385 : vector<1x64x32xf32> to vector<64x32xf32>
    %387 = arith.mulf %368, %368 : vector<32x32xf32>
    %cst_235 = arith.constant dense<0.000000e+00> : vector<32xf32>
    %388 = vector.multi_reduction <add>, %387, %cst_235 [1] : vector<32x32xf32> to vector<32xf32>
    %389 = vector.shape_cast %388 : vector<32xf32> to vector<32x1xf32>
    %cst_236 = arith.constant 3.200000e+01 : f32
    %390 = vector.broadcast %cst_236 : f32 to vector<32x1xf32>
    %391 = arith.divf %389, %390 : vector<32x1xf32>
    %cst_237 = arith.constant 9.99999997E-7 : f32
    %392 = vector.broadcast %cst_237 : f32 to vector<32x1xf32>
    %393 = arith.addf %391, %392 : vector<32x1xf32>
    %394 = math.rsqrt %393 : vector<32x1xf32>
    %395 = vector.broadcast %394 : vector<32x1xf32> to vector<32x32xf32>
    %396 = arith.mulf %368, %395 : vector<32x32xf32>
    %397 = vector.broadcast %370 : vector<1x32xf32> to vector<32x32xf32>
    %398 = arith.mulf %396, %397 : vector<32x32xf32>
    %cst_238 = arith.constant dense<0.000000e+00> : vector<32x32xf32>
    %399 = tpu.matmul %398, %372, %cst_238 {dimension_numbers = #tpu.dot_dimension_numbers<[1], [0], [0], [1], [0, 0, 1, 1], [], []>} : vector<32x32xf32>, vector<32x32xf32>, vector<32x32xf32> -> vector<32x32xf32>
    %cst_239 = arith.constant dense<0.000000e+00> : vector<32x32xf32>
    %400 = tpu.matmul %398, %374, %cst_239 {dimension_numbers = #tpu.dot_dimension_numbers<[1], [0], [0], [1], [0, 0, 1, 1], [], []>} : vector<32x32xf32>, vector<32x32xf32>, vector<32x32xf32> -> vector<32x32xf32>
    %cst_240 = arith.constant dense<0.000000e+00> : vector<32x32xf32>
    %401 = tpu.matmul %398, %376, %cst_240 {dimension_numbers = #tpu.dot_dimension_numbers<[1], [0], [0], [1], [0, 0, 1, 1], [], []>} : vector<32x32xf32>, vector<32x32xf32>, vector<32x32xf32> -> vector<32x32xf32>
    %402 = vector.extract_strided_slice %399 {offsets = [0, 0], sizes = [16, 32], strides = [1, 1]} : vector<32x32xf32> to vector<16x32xf32>
    %403 = vector.extract_strided_slice %400 {offsets = [0, 0], sizes = [16, 32], strides = [1, 1]} : vector<32x32xf32> to vector<16x32xf32>
    %404 = vector.extract_strided_slice %401 {offsets = [0, 0], sizes = [16, 32], strides = [1, 1]} : vector<32x32xf32> to vector<16x32xf32>
    %405 = vector.extract_strided_slice %402 {offsets = [0, 0], sizes = [16, 8], strides = [1, 1]} : vector<16x32xf32> to vector<16x8xf32>
    %406 = vector.extract_strided_slice %403 {offsets = [0, 0], sizes = [16, 8], strides = [1, 1]} : vector<16x32xf32> to vector<16x8xf32>
    %407 = vector.extract_strided_slice %404 {offsets = [0, 0], sizes = [16, 8], strides = [1, 1]} : vector<16x32xf32> to vector<16x8xf32>
    %cst_241 = arith.constant dense<0.000000e+00> : vector<16x16xf32>
    %408 = tpu.matmul %405, %406, %cst_241 {dimension_numbers = #tpu.dot_dimension_numbers<[1], [1], [0], [0], [0, 0, 1, 0], [], []>} : vector<16x8xf32>, vector<16x8xf32>, vector<16x16xf32> -> vector<16x16xf32>
    %cst_242 = arith.constant 0.353553385 : f32
    %409 = vector.broadcast %cst_242 : f32 to vector<16x16xf32>
    %410 = arith.mulf %408, %409 : vector<16x16xf32>
    %411 = arith.addf %410, %141 : vector<16x16xf32>
    %cst_243 = arith.constant dense<0xFF800000> : vector<16xf32>
    %412 = vector.multi_reduction <maximumf>, %411, %cst_243 [1] : vector<16x16xf32> to vector<16xf32>
    %413 = vector.shape_cast %412 : vector<16xf32> to vector<16x1xf32>
    %414 = vector.broadcast %413 : vector<16x1xf32> to vector<16x16xf32>
    %415 = arith.subf %411, %414 : vector<16x16xf32>
    %416 = math.exp %415 : vector<16x16xf32>
    %cst_244 = arith.constant dense<0.000000e+00> : vector<16xf32>
    %417 = vector.multi_reduction <add>, %416, %cst_244 [1] : vector<16x16xf32> to vector<16xf32>
    %418 = vector.shape_cast %417 : vector<16xf32> to vector<16x1xf32>
    %419 = tpu.reciprocal %418 {approx = true} : vector<16x1xf32> -> vector<16x1xf32>
    %420 = vector.broadcast %419 : vector<16x1xf32> to vector<16x16xf32>
    %421 = arith.mulf %416, %420 : vector<16x16xf32>
    %cst_245 = arith.constant dense<0.000000e+00> : vector<16x8xf32>
    %422 = tpu.matmul %421, %407, %cst_245 {dimension_numbers = #tpu.dot_dimension_numbers<[1], [0], [0], [1], [0, 0, 1, 1], [], []>} : vector<16x16xf32>, vector<16x8xf32>, vector<16x8xf32> -> vector<16x8xf32>
    %c0_246 = arith.constant 0 : index
    %c0_247 = arith.constant 0 : index
    %423 = vector.load %arg15[%c0_246, %c0_247] : memref<32x32xf32, #tpu.memory_space<vmem>>, vector<16x8xf32>
    tpu.vector_store %arg15[%c0_246, %c0_247], %422 {strides = array<i32>} : memref<32x32xf32, #tpu.memory_space<vmem>>, vector<16x8xf32>,
    %424 = vector.extract_strided_slice %402 {offsets = [0, 8], sizes = [16, 8], strides = [1, 1]} : vector<16x32xf32> to vector<16x8xf32>
    %425 = vector.extract_strided_slice %403 {offsets = [0, 8], sizes = [16, 8], strides = [1, 1]} : vector<16x32xf32> to vector<16x8xf32>
    %426 = vector.extract_strided_slice %404 {offsets = [0, 8], sizes = [16, 8], strides = [1, 1]} : vector<16x32xf32> to vector<16x8xf32>
    %cst_248 = arith.constant dense<0.000000e+00> : vector<16x16xf32>
    %427 = tpu.matmul %424, %425, %cst_248 {dimension_numbers = #tpu.dot_dimension_numbers<[1], [1], [0], [0], [0, 0, 1, 0], [], []>} : vector<16x8xf32>, vector<16x8xf32>, vector<16x16xf32> -> vector<16x16xf32>
    %cst_249 = arith.constant 0.353553385 : f32
    %428 = vector.broadcast %cst_249 : f32 to vector<16x16xf32>
    %429 = arith.mulf %427, %428 : vector<16x16xf32>
    %430 = arith.addf %429, %141 : vector<16x16xf32>
    %cst_250 = arith.constant dense<0xFF800000> : vector<16xf32>
    %431 = vector.multi_reduction <maximumf>, %430, %cst_250 [1] : vector<16x16xf32> to vector<16xf32>
    %432 = vector.shape_cast %431 : vector<16xf32> to vector<16x1xf32>
    %433 = vector.broadcast %432 : vector<16x1xf32> to vector<16x16xf32>
    %434 = arith.subf %430, %433 : vector<16x16xf32>
    %435 = math.exp %434 : vector<16x16xf32>
    %cst_251 = arith.constant dense<0.000000e+00> : vector<16xf32>
    %436 = vector.multi_reduction <add>, %435, %cst_251 [1] : vector<16x16xf32> to vector<16xf32>
    %437 = vector.shape_cast %436 : vector<16xf32> to vector<16x1xf32>
    %438 = tpu.reciprocal %437 {approx = true} : vector<16x1xf32> -> vector<16x1xf32>
    %439 = vector.broadcast %438 : vector<16x1xf32> to vector<16x16xf32>
    %440 = arith.mulf %435, %439 : vector<16x16xf32>
    %cst_252 = arith.constant dense<0.000000e+00> : vector<16x8xf32>
    %441 = tpu.matmul %440, %426, %cst_252 {dimension_numbers = #tpu.dot_dimension_numbers<[1], [0], [0], [1], [0, 0, 1, 1], [], []>} : vector<16x16xf32>, vector<16x8xf32>, vector<16x8xf32> -> vector<16x8xf32>
    %c0_253 = arith.constant 0 : index
    %c8_254 = arith.constant 8 : index
    %442 = vector.load %arg15[%c0_253, %c8_254] : memref<32x32xf32, #tpu.memory_space<vmem>>, vector<16x8xf32>
    tpu.vector_store %arg15[%c0_253, %c8_254], %441 {strides = array<i32>} : memref<32x32xf32, #tpu.memory_space<vmem>>, vector<16x8xf32>,
    %443 = vector.extract_strided_slice %402 {offsets = [0, 16], sizes = [16, 8], strides = [1, 1]} : vector<16x32xf32> to vector<16x8xf32>
    %444 = vector.extract_strided_slice %403 {offsets = [0, 16], sizes = [16, 8], strides = [1, 1]} : vector<16x32xf32> to vector<16x8xf32>
    %445 = vector.extract_strided_slice %404 {offsets = [0, 16], sizes = [16, 8], strides = [1, 1]} : vector<16x32xf32> to vector<16x8xf32>
    %cst_255 = arith.constant dense<0.000000e+00> : vector<16x16xf32>
    %446 = tpu.matmul %443, %444, %cst_255 {dimension_numbers = #tpu.dot_dimension_numbers<[1], [1], [0], [0], [0, 0, 1, 0], [], []>} : vector<16x8xf32>, vector<16x8xf32>, vector<16x16xf32> -> vector<16x16xf32>
    %cst_256 = arith.constant 0.353553385 : f32
    %447 = vector.broadcast %cst_256 : f32 to vector<16x16xf32>
    %448 = arith.mulf %446, %447 : vector<16x16xf32>
    %449 = arith.addf %448, %141 : vector<16x16xf32>
    %cst_257 = arith.constant dense<0xFF800000> : vector<16xf32>
    %450 = vector.multi_reduction <maximumf>, %449, %cst_257 [1] : vector<16x16xf32> to vector<16xf32>
    %451 = vector.shape_cast %450 : vector<16xf32> to vector<16x1xf32>
    %452 = vector.broadcast %451 : vector<16x1xf32> to vector<16x16xf32>
    %453 = arith.subf %449, %452 : vector<16x16xf32>
    %454 = math.exp %453 : vector<16x16xf32>
    %cst_258 = arith.constant dense<0.000000e+00> : vector<16xf32>
    %455 = vector.multi_reduction <add>, %454, %cst_258 [1] : vector<16x16xf32> to vector<16xf32>
    %456 = vector.shape_cast %455 : vector<16xf32> to vector<16x1xf32>
    %457 = tpu.reciprocal %456 {approx = true} : vector<16x1xf32> -> vector<16x1xf32>
    %458 = vector.broadcast %457 : vector<16x1xf32> to vector<16x16xf32>
    %459 = arith.mulf %454, %458 : vector<16x16xf32>
    %cst_259 = arith.constant dense<0.000000e+00> : vector<16x8xf32>
    %460 = tpu.matmul %459, %445, %cst_259 {dimension_numbers = #tpu.dot_dimension_numbers<[1], [0], [0], [1], [0, 0, 1, 1], [], []>} : vector<16x16xf32>, vector<16x8xf32>, vector<16x8xf32> -> vector<16x8xf32>
    %c0_260 = arith.constant 0 : index
    %c16_261 = arith.constant 16 : index
    %461 = vector.load %arg15[%c0_260, %c16_261] : memref<32x32xf32, #tpu.memory_space<vmem>>, vector<16x8xf32>
    tpu.vector_store %arg15[%c0_260, %c16_261], %460 {strides = array<i32>} : memref<32x32xf32, #tpu.memory_space<vmem>>, vector<16x8xf32>,
    %462 = vector.extract_strided_slice %402 {offsets = [0, 24], sizes = [16, 8], strides = [1, 1]} : vector<16x32xf32> to vector<16x8xf32>
    %463 = vector.extract_strided_slice %403 {offsets = [0, 24], sizes = [16, 8], strides = [1, 1]} : vector<16x32xf32> to vector<16x8xf32>
    %464 = vector.extract_strided_slice %404 {offsets = [0, 24], sizes = [16, 8], strides = [1, 1]} : vector<16x32xf32> to vector<16x8xf32>
    %cst_262 = arith.constant dense<0.000000e+00> : vector<16x16xf32>
    %465 = tpu.matmul %462, %463, %cst_262 {dimension_numbers = #tpu.dot_dimension_numbers<[1], [1], [0], [0], [0, 0, 1, 0], [], []>} : vector<16x8xf32>, vector<16x8xf32>, vector<16x16xf32> -> vector<16x16xf32>
    %cst_263 = arith.constant 0.353553385 : f32
    %466 = vector.broadcast %cst_263 : f32 to vector<16x16xf32>
    %467 = arith.mulf %465, %466 : vector<16x16xf32>
    %468 = arith.addf %467, %141 : vector<16x16xf32>
    %cst_264 = arith.constant dense<0xFF800000> : vector<16xf32>
    %469 = vector.multi_reduction <maximumf>, %468, %cst_264 [1] : vector<16x16xf32> to vector<16xf32>
    %470 = vector.shape_cast %469 : vector<16xf32> to vector<16x1xf32>
    %471 = vector.broadcast %470 : vector<16x1xf32> to vector<16x16xf32>
    %472 = arith.subf %468, %471 : vector<16x16xf32>
    %473 = math.exp %472 : vector<16x16xf32>
    %cst_265 = arith.constant dense<0.000000e+00> : vector<16xf32>
    %474 = vector.multi_reduction <add>, %473, %cst_265 [1] : vector<16x16xf32> to vector<16xf32>
    %475 = vector.shape_cast %474 : vector<16xf32> to vector<16x1xf32>
    %476 = tpu.reciprocal %475 {approx = true} : vector<16x1xf32> -> vector<16x1xf32>
    %477 = vector.broadcast %476 : vector<16x1xf32> to vector<16x16xf32>
    %478 = arith.mulf %473, %477 : vector<16x16xf32>
    %cst_266 = arith.constant dense<0.000000e+00> : vector<16x8xf32>
    %479 = tpu.matmul %478, %464, %cst_266 {dimension_numbers = #tpu.dot_dimension_numbers<[1], [0], [0], [1], [0, 0, 1, 1], [], []>} : vector<16x16xf32>, vector<16x8xf32>, vector<16x8xf32> -> vector<16x8xf32>
    %c0_267 = arith.constant 0 : index
    %c24_268 = arith.constant 24 : index
    %480 = vector.load %arg15[%c0_267, %c24_268] : memref<32x32xf32, #tpu.memory_space<vmem>>, vector<16x8xf32>
    tpu.vector_store %arg15[%c0_267, %c24_268], %479 {strides = array<i32>} : memref<32x32xf32, #tpu.memory_space<vmem>>, vector<16x8xf32>,
    %481 = vector.extract_strided_slice %399 {offsets = [16, 0], sizes = [16, 32], strides = [1, 1]} : vector<32x32xf32> to vector<16x32xf32>
    %482 = vector.extract_strided_slice %400 {offsets = [16, 0], sizes = [16, 32], strides = [1, 1]} : vector<32x32xf32> to vector<16x32xf32>
    %483 = vector.extract_strided_slice %401 {offsets = [16, 0], sizes = [16, 32], strides = [1, 1]} : vector<32x32xf32> to vector<16x32xf32>
    %484 = vector.extract_strided_slice %481 {offsets = [0, 0], sizes = [16, 8], strides = [1, 1]} : vector<16x32xf32> to vector<16x8xf32>
    %485 = vector.extract_strided_slice %482 {offsets = [0, 0], sizes = [16, 8], strides = [1, 1]} : vector<16x32xf32> to vector<16x8xf32>
    %486 = vector.extract_strided_slice %483 {offsets = [0, 0], sizes = [16, 8], strides = [1, 1]} : vector<16x32xf32> to vector<16x8xf32>
    %cst_269 = arith.constant dense<0.000000e+00> : vector<16x16xf32>
    %487 = tpu.matmul %484, %485, %cst_269 {dimension_numbers = #tpu.dot_dimension_numbers<[1], [1], [0], [0], [0, 0, 1, 0], [], []>} : vector<16x8xf32>, vector<16x8xf32>, vector<16x16xf32> -> vector<16x16xf32>
    %cst_270 = arith.constant 0.353553385 : f32
    %488 = vector.broadcast %cst_270 : f32 to vector<16x16xf32>
    %489 = arith.mulf %487, %488 : vector<16x16xf32>
    %490 = arith.addf %489, %151 : vector<16x16xf32>
    %cst_271 = arith.constant dense<0xFF800000> : vector<16xf32>
    %491 = vector.multi_reduction <maximumf>, %490, %cst_271 [1] : vector<16x16xf32> to vector<16xf32>
    %492 = vector.shape_cast %491 : vector<16xf32> to vector<16x1xf32>
    %493 = vector.broadcast %492 : vector<16x1xf32> to vector<16x16xf32>
    %494 = arith.subf %490, %493 : vector<16x16xf32>
    %495 = math.exp %494 : vector<16x16xf32>
    %cst_272 = arith.constant dense<0.000000e+00> : vector<16xf32>
    %496 = vector.multi_reduction <add>, %495, %cst_272 [1] : vector<16x16xf32> to vector<16xf32>
    %497 = vector.shape_cast %496 : vector<16xf32> to vector<16x1xf32>
    %498 = tpu.reciprocal %497 {approx = true} : vector<16x1xf32> -> vector<16x1xf32>
    %499 = vector.broadcast %498 : vector<16x1xf32> to vector<16x16xf32>
    %500 = arith.mulf %495, %499 : vector<16x16xf32>
    %cst_273 = arith.constant dense<0.000000e+00> : vector<16x8xf32>
    %501 = tpu.matmul %500, %486, %cst_273 {dimension_numbers = #tpu.dot_dimension_numbers<[1], [0], [0], [1], [0, 0, 1, 1], [], []>} : vector<16x16xf32>, vector<16x8xf32>, vector<16x8xf32> -> vector<16x8xf32>
    %c16_274 = arith.constant 16 : index
    %c0_275 = arith.constant 0 : index
    %502 = vector.load %arg15[%c16_274, %c0_275] : memref<32x32xf32, #tpu.memory_space<vmem>>, vector<16x8xf32>
    tpu.vector_store %arg15[%c16_274, %c0_275], %501 {strides = array<i32>} : memref<32x32xf32, #tpu.memory_space<vmem>>, vector<16x8xf32>,
    %503 = vector.extract_strided_slice %481 {offsets = [0, 8], sizes = [16, 8], strides = [1, 1]} : vector<16x32xf32> to vector<16x8xf32>
    %504 = vector.extract_strided_slice %482 {offsets = [0, 8], sizes = [16, 8], strides = [1, 1]} : vector<16x32xf32> to vector<16x8xf32>
    %505 = vector.extract_strided_slice %483 {offsets = [0, 8], sizes = [16, 8], strides = [1, 1]} : vector<16x32xf32> to vector<16x8xf32>
    %cst_276 = arith.constant dense<0.000000e+00> : vector<16x16xf32>
    %506 = tpu.matmul %503, %504, %cst_276 {dimension_numbers = #tpu.dot_dimension_numbers<[1], [1], [0], [0], [0, 0, 1, 0], [], []>} : vector<16x8xf32>, vector<16x8xf32>, vector<16x16xf32> -> vector<16x16xf32>
    %cst_277 = arith.constant 0.353553385 : f32
    %507 = vector.broadcast %cst_277 : f32 to vector<16x16xf32>
    %508 = arith.mulf %506, %507 : vector<16x16xf32>
    %509 = arith.addf %508, %151 : vector<16x16xf32>
    %cst_278 = arith.constant dense<0xFF800000> : vector<16xf32>
    %510 = vector.multi_reduction <maximumf>, %509, %cst_278 [1] : vector<16x16xf32> to vector<16xf32>
    %511 = vector.shape_cast %510 : vector<16xf32> to vector<16x1xf32>
    %512 = vector.broadcast %511 : vector<16x1xf32> to vector<16x16xf32>
    %513 = arith.subf %509, %512 : vector<16x16xf32>
    %514 = math.exp %513 : vector<16x16xf32>
    %cst_279 = arith.constant dense<0.000000e+00> : vector<16xf32>
    %515 = vector.multi_reduction <add>, %514, %cst_279 [1] : vector<16x16xf32> to vector<16xf32>
    %516 = vector.shape_cast %515 : vector<16xf32> to vector<16x1xf32>
    %517 = tpu.reciprocal %516 {approx = true} : vector<16x1xf32> -> vector<16x1xf32>
    %518 = vector.broadcast %517 : vector<16x1xf32> to vector<16x16xf32>
    %519 = arith.mulf %514, %518 : vector<16x16xf32>
    %cst_280 = arith.constant dense<0.000000e+00> : vector<16x8xf32>
    %520 = tpu.matmul %519, %505, %cst_280 {dimension_numbers = #tpu.dot_dimension_numbers<[1], [0], [0], [1], [0, 0, 1, 1], [], []>} : vector<16x16xf32>, vector<16x8xf32>, vector<16x8xf32> -> vector<16x8xf32>
    %c16_281 = arith.constant 16 : index
    %c8_282 = arith.constant 8 : index
    %521 = vector.load %arg15[%c16_281, %c8_282] : memref<32x32xf32, #tpu.memory_space<vmem>>, vector<16x8xf32>
    tpu.vector_store %arg15[%c16_281, %c8_282], %520 {strides = array<i32>} : memref<32x32xf32, #tpu.memory_space<vmem>>, vector<16x8xf32>,
    %522 = vector.extract_strided_slice %481 {offsets = [0, 16], sizes = [16, 8], strides = [1, 1]} : vector<16x32xf32> to vector<16x8xf32>
    %523 = vector.extract_strided_slice %482 {offsets = [0, 16], sizes = [16, 8], strides = [1, 1]} : vector<16x32xf32> to vector<16x8xf32>
    %524 = vector.extract_strided_slice %483 {offsets = [0, 16], sizes = [16, 8], strides = [1, 1]} : vector<16x32xf32> to vector<16x8xf32>
    %cst_283 = arith.constant dense<0.000000e+00> : vector<16x16xf32>
    %525 = tpu.matmul %522, %523, %cst_283 {dimension_numbers = #tpu.dot_dimension_numbers<[1], [1], [0], [0], [0, 0, 1, 0], [], []>} : vector<16x8xf32>, vector<16x8xf32>, vector<16x16xf32> -> vector<16x16xf32>
    %cst_284 = arith.constant 0.353553385 : f32
    %526 = vector.broadcast %cst_284 : f32 to vector<16x16xf32>
    %527 = arith.mulf %525, %526 : vector<16x16xf32>
    %528 = arith.addf %527, %151 : vector<16x16xf32>
    %cst_285 = arith.constant dense<0xFF800000> : vector<16xf32>
    %529 = vector.multi_reduction <maximumf>, %528, %cst_285 [1] : vector<16x16xf32> to vector<16xf32>
    %530 = vector.shape_cast %529 : vector<16xf32> to vector<16x1xf32>
    %531 = vector.broadcast %530 : vector<16x1xf32> to vector<16x16xf32>
    %532 = arith.subf %528, %531 : vector<16x16xf32>
    %533 = math.exp %532 : vector<16x16xf32>
    %cst_286 = arith.constant dense<0.000000e+00> : vector<16xf32>
    %534 = vector.multi_reduction <add>, %533, %cst_286 [1] : vector<16x16xf32> to vector<16xf32>
    %535 = vector.shape_cast %534 : vector<16xf32> to vector<16x1xf32>
    %536 = tpu.reciprocal %535 {approx = true} : vector<16x1xf32> -> vector<16x1xf32>
    %537 = vector.broadcast %536 : vector<16x1xf32> to vector<16x16xf32>
    %538 = arith.mulf %533, %537 : vector<16x16xf32>
    %cst_287 = arith.constant dense<0.000000e+00> : vector<16x8xf32>
    %539 = tpu.matmul %538, %524, %cst_287 {dimension_numbers = #tpu.dot_dimension_numbers<[1], [0], [0], [1], [0, 0, 1, 1], [], []>} : vector<16x16xf32>, vector<16x8xf32>, vector<16x8xf32> -> vector<16x8xf32>
    %c16_288 = arith.constant 16 : index
    %c16_289 = arith.constant 16 : index
    %540 = vector.load %arg15[%c16_288, %c16_289] : memref<32x32xf32, #tpu.memory_space<vmem>>, vector<16x8xf32>
    tpu.vector_store %arg15[%c16_288, %c16_289], %539 {strides = array<i32>} : memref<32x32xf32, #tpu.memory_space<vmem>>, vector<16x8xf32>,
    %541 = vector.extract_strided_slice %481 {offsets = [0, 24], sizes = [16, 8], strides = [1, 1]} : vector<16x32xf32> to vector<16x8xf32>
    %542 = vector.extract_strided_slice %482 {offsets = [0, 24], sizes = [16, 8], strides = [1, 1]} : vector<16x32xf32> to vector<16x8xf32>
    %543 = vector.extract_strided_slice %483 {offsets = [0, 24], sizes = [16, 8], strides = [1, 1]} : vector<16x32xf32> to vector<16x8xf32>
    %cst_290 = arith.constant dense<0.000000e+00> : vector<16x16xf32>
    %544 = tpu.matmul %541, %542, %cst_290 {dimension_numbers = #tpu.dot_dimension_numbers<[1], [1], [0], [0], [0, 0, 1, 0], [], []>} : vector<16x8xf32>, vector<16x8xf32>, vector<16x16xf32> -> vector<16x16xf32>
    %cst_291 = arith.constant 0.353553385 : f32
    %545 = vector.broadcast %cst_291 : f32 to vector<16x16xf32>
    %546 = arith.mulf %544, %545 : vector<16x16xf32>
    %547 = arith.addf %546, %151 : vector<16x16xf32>
    %cst_292 = arith.constant dense<0xFF800000> : vector<16xf32>
    %548 = vector.multi_reduction <maximumf>, %547, %cst_292 [1] : vector<16x16xf32> to vector<16xf32>
    %549 = vector.shape_cast %548 : vector<16xf32> to vector<16x1xf32>
    %550 = vector.broadcast %549 : vector<16x1xf32> to vector<16x16xf32>
    %551 = arith.subf %547, %550 : vector<16x16xf32>
    %552 = math.exp %551 : vector<16x16xf32>
    %cst_293 = arith.constant dense<0.000000e+00> : vector<16xf32>
    %553 = vector.multi_reduction <add>, %552, %cst_293 [1] : vector<16x16xf32> to vector<16xf32>
    %554 = vector.shape_cast %553 : vector<16xf32> to vector<16x1xf32>
    %555 = tpu.reciprocal %554 {approx = true} : vector<16x1xf32> -> vector<16x1xf32>
    %556 = vector.broadcast %555 : vector<16x1xf32> to vector<16x16xf32>
    %557 = arith.mulf %552, %556 : vector<16x16xf32>
    %cst_294 = arith.constant dense<0.000000e+00> : vector<16x8xf32>
    %558 = tpu.matmul %557, %543, %cst_294 {dimension_numbers = #tpu.dot_dimension_numbers<[1], [0], [0], [1], [0, 0, 1, 1], [], []>} : vector<16x16xf32>, vector<16x8xf32>, vector<16x8xf32> -> vector<16x8xf32>
    %c16_295 = arith.constant 16 : index
    %c24_296 = arith.constant 24 : index
    %559 = vector.load %arg15[%c16_295, %c24_296] : memref<32x32xf32, #tpu.memory_space<vmem>>, vector<16x8xf32>
    tpu.vector_store %arg15[%c16_295, %c24_296], %558 {strides = array<i32>} : memref<32x32xf32, #tpu.memory_space<vmem>>, vector<16x8xf32>,
    %c0_297 = arith.constant 0 : index
    %c0_298 = arith.constant 0 : index
    %560 = vector.load %arg15[%c0_297, %c0_298] : memref<32x32xf32, #tpu.memory_space<vmem>>, vector<32x32xf32>
    %cst_299 = arith.constant dense<0.000000e+00> : vector<32x32xf32>
    %561 = tpu.matmul %560, %378, %cst_299 {dimension_numbers = #tpu.dot_dimension_numbers<[1], [0], [0], [1], [0, 0, 1, 1], [], []>} : vector<32x32xf32>, vector<32x32xf32>, vector<32x32xf32> -> vector<32x32xf32>
    %562 = arith.addf %368, %561 : vector<32x32xf32>
    %563 = arith.mulf %562, %562 : vector<32x32xf32>
    %cst_300 = arith.constant dense<0.000000e+00> : vector<32xf32>
    %564 = vector.multi_reduction <add>, %563, %cst_300 [1] : vector<32x32xf32> to vector<32xf32>
    %565 = vector.shape_cast %564 : vector<32xf32> to vector<32x1xf32>
    %cst_301 = arith.constant 3.200000e+01 : f32
    %566 = vector.broadcast %cst_301 : f32 to vector<32x1xf32>
    %567 = arith.divf %565, %566 : vector<32x1xf32>
    %cst_302 = arith.constant 9.99999997E-7 : f32
    %568 = vector.broadcast %cst_302 : f32 to vector<32x1xf32>
    %569 = arith.addf %567, %568 : vector<32x1xf32>
    %570 = math.rsqrt %569 : vector<32x1xf32>
    %571 = vector.broadcast %570 : vector<32x1xf32> to vector<32x32xf32>
    %572 = arith.mulf %562, %571 : vector<32x32xf32>
    %573 = vector.broadcast %380 : vector<1x32xf32> to vector<32x32xf32>
    %574 = arith.mulf %572, %573 : vector<32x32xf32>
    %cst_303 = arith.constant dense<0.000000e+00> : vector<32x64xf32>
    %575 = tpu.matmul %574, %382, %cst_303 {dimension_numbers = #tpu.dot_dimension_numbers<[1], [0], [0], [1], [0, 0, 1, 1], [], []>} : vector<32x32xf32>, vector<32x64xf32>, vector<32x64xf32> -> vector<32x64xf32>
    %cst_304 = arith.constant dense<0.000000e+00> : vector<32x64xf32>
    %576 = tpu.matmul %574, %384, %cst_304 {dimension_numbers = #tpu.dot_dimension_numbers<[1], [0], [0], [1], [0, 0, 1, 1], [], []>} : vector<32x32xf32>, vector<32x64xf32>, vector<32x64xf32> -> vector<32x64xf32>
    %577 = arith.negf %575 : vector<32x64xf32>
    %578 = math.exp %577 : vector<32x64xf32>
    %cst_305 = arith.constant 1.000000e+00 : f32
    %579 = vector.broadcast %cst_305 : f32 to vector<32x64xf32>
    %580 = arith.addf %579, %578 : vector<32x64xf32>
    %581 = arith.divf %579, %580 : vector<32x64xf32>
    %582 = arith.mulf %575, %581 : vector<32x64xf32>
    %583 = arith.mulf %582, %576 : vector<32x64xf32>
    %cst_306 = arith.constant dense<0.000000e+00> : vector<32x32xf32>
    %584 = tpu.matmul %583, %386, %cst_306 {dimension_numbers = #tpu.dot_dimension_numbers<[1], [0], [0], [1], [0, 0, 1, 1], [], []>} : vector<32x64xf32>, vector<64x32xf32>, vector<32x32xf32> -> vector<32x32xf32>
    %585 = arith.addf %562, %584 : vector<32x32xf32>
    %c0_307 = arith.constant 0 : index
    %c0_308 = arith.constant 0 : index
    %586 = vector.load %arg12[%c0_307, %c0_308] : memref<1x32xf32, #tpu.memory_space<vmem>>, vector<1x32xf32>
    %587 = arith.mulf %585, %585 : vector<32x32xf32>
    %cst_309 = arith.constant dense<0.000000e+00> : vector<32xf32>
    %588 = vector.multi_reduction <add>, %587, %cst_309 [1] : vector<32x32xf32> to vector<32xf32>
    %589 = vector.shape_cast %588 : vector<32xf32> to vector<32x1xf32>
    %cst_310 = arith.constant 3.200000e+01 : f32
    %590 = vector.broadcast %cst_310 : f32 to vector<32x1xf32>
    %591 = arith.divf %589, %590 : vector<32x1xf32>
    %cst_311 = arith.constant 9.99999997E-7 : f32
    %592 = vector.broadcast %cst_311 : f32 to vector<32x1xf32>
    %593 = arith.addf %591, %592 : vector<32x1xf32>
    %594 = math.rsqrt %593 : vector<32x1xf32>
    %595 = vector.broadcast %594 : vector<32x1xf32> to vector<32x32xf32>
    %596 = arith.mulf %585, %595 : vector<32x32xf32>
    %597 = vector.broadcast %586 : vector<1x32xf32> to vector<32x32xf32>
    %598 = arith.mulf %596, %597 : vector<32x32xf32>
    %c0_312 = arith.constant 0 : index
    %c0_313 = arith.constant 0 : index
    %599 = vector.load %arg13[%c0_312, %c0_313] : memref<32x32xf32, #tpu.memory_space<vmem>>, vector<32x32xf32>
    tpu.vector_store %arg13[%c0_312, %c0_313], %598 {strides = array<i32>} : memref<32x32xf32, #tpu.memory_space<vmem>>, vector<32x32xf32>,
    return
  }
}

</mosaic_0001>

<bundles_post_ra>
// kernel: tpu_custom_call.1
= control target key start
LH: loop header
LB: loop body
LE: loop exit
PB: predicated region body
PF: predicated region fallthrough
CT: control target
= control target key end

     0   :  { %18 = vsyncpa [#allocation7], 0  ;;  %s5033_s0 = inlined_call_operand.vmem [shape: s32[32], index: 0, kind: input, shape index: {}]   ;;  %s5034_s1 = inlined_call_operand.vmem [shape: f32[2,1,16], index: 1, kind: input, shape index: {}]   ;;  %s5035_s2 = inlined_call_operand.vmem [shape: f32[64,32], index: 2, kind: input, shape index: {}]   ;;  %s5036_s3 = inlined_call_operand.vmem [shape: f32[2,1,32], index: 3, kind: input, shape index: {}]   ;;  %s5037_s4 = inlined_call_operand.vmem [shape: f32[2,32,32], index: 4, kind: input, shape index: {}]   ;;  %s5038_s5 = inlined_call_operand.vmem [shape: f32[2,32,32], index: 5, kind: input, shape index: {}]   ;;  %s5039_s6 = inlined_call_operand.vmem [shape: f32[2,32,32], index: 6, kind: input, shape index: {}]   ;;  %s5040_s7 = inlined_call_operand.hbm [shape: f32[2,32,32], index: 7, kind: input, shape index: {}]   ;;  %s5041_s8 = inlined_call_operand.vmem [shape: f32[2,1,32], index: 8, kind: input, shape index: {}]   ;;  %s5042_s9 = inlined_call_operand.hbm [shape: f32[2,32,64], index: 9, kind: input, shape index: {}]   ;;  %s5043_s10 = inlined_call_operand.hbm [shape: f32[2,32,64], index: 10, kind: input, shape index: {}]   ;;  %s5044_s11 = inlined_call_operand.vmem [shape: f32[2,64,32], index: 11, kind: input, shape index: {}]   ;;  %s5045_s12 = inlined_call_operand.vmem [shape: f32[1,32], index: 12, kind: input, shape index: {}]   ;;  %s5046_s13 = inlined_call_operand.hbm [shape: f32[32,32], index: 13, kind: output, shape index: {}]  }
   0x1   :  { %19 = vsyncpa [#allocation5], 0 }
   0x2   :  { %20 = vsyncpa [#allocation10], 0 }
   0x3   :  { %21 = vsyncpa [#allocation6], 0  ;;  %s62_s27 = sshll.u32 %s5042_s9, 4  ;;  %s3794_s28 = smov [#allocation9]   ;;  %s63_s27 = int_to_ptr.hbm [resolvable:$true] %s62_s27 }
   0x4   :  { %s64_s29 = sshll.u32 %s3794_s28, 4  ;;  %s27_s15 = sshll.u32 %s5033_s0, 4  ;;  %s65_s29 = int_to_ptr.vmem [resolvable:$true] %s64_s29  ;;  %s28_s15 = int_to_ptr.vmem [resolvable:$true] %s27_s15 }
   0x5   :  { %s3795_s16 = smov 128   ;;  %s3796_s17 = smov 8  }
   0x6   :  { %70 = dma.hbm_to_vmem [thread:$0]  %s63_s27, 1024, %s65_s29, [#allocation10], %s3795_s16, %s3795_s16, %s3796_s17  }
   0x7   :  { %s3797_s18 = smov [#allocation4]   ;;  %s47_s9 = sshll.u32 %s5040_s7, 4  ;;  %s48_s9 = int_to_ptr.hbm [resolvable:$true] %s47_s9 }
   0x8   :  { %30 = dma.vmem_to_smem %s28_s15, 16, %s3797_s18, [#allocation7]  }
   0x9   :  { %s3798_s21 = smov [#allocation8]   ;;  %s75_s0 = sshll.u32 %s5043_s10, 4  ;;  %s76_s0 = int_to_ptr.hbm [resolvable:$true] %s75_s0 }
   0xa   :  { %s49_s22 = sshll.u32 %s3798_s21, 4  ;;  %s3799_s25 = smov [#allocation11]   ;;  %s50_s22 = int_to_ptr.vmem [resolvable:$true] %s49_s22 }
   0xb   :  { %55 = dma.hbm_to_vmem [thread:$0]  %s48_s9, 1024, %s50_s22, [#allocation5], %s3795_s16, %s3795_s16, %s3796_s17  }
   0xc   :  { %s77_s26 = sshll.u32 %s3799_s25, 4  ;;  %s78_s26 = int_to_ptr.vmem [resolvable:$true] %s77_s26 }
   0xd   :  { %83 = dma.hbm_to_vmem [thread:$0]  %s76_s0, 1024, %s78_s26, [#allocation10], %s3795_s16, %s3795_s16, %s3796_s17  }
   0xe   :  { %3786 = dma.done.wait [#allocation7], 16  }
   0xf   :  { %3787 = vsyncadd [#allocation7], 4294967280 }
  0x10   :  { %3788 = dma.done.wait [#allocation5], 1024  }
  0x11   :  { %3789 = vsyncadd [#allocation5], 4294966272 }
  0x12   :  { %3790 = dma.done.wait [#allocation10], 2048  }
  0x13   :  { %3791 = vsyncadd [#allocation10], 4294965248 }
  0x14   :  { %104 = sfence }
  0x15   :  { %s105_s7 = sld [smem:[#allocation4]]  ;;  %vm108_vm0 = vcmask 253952   ;;  %vm302_vm1 = vcmask 261120   ;;  %v3800_v44 = vmov 32.0   ;;  %v268_v48 = vld [vmem:[%s5037_s4 + $0x18] sm:$0xff]  ;;  %v267_v52 = vld [vmem:[%s5037_s4 + $0x10] sm:$0xff] }
  0x16   :  { %s3178_s10 = sld [smem:[#allocation4 + $0x1]]  ;;  %3472 = vrcp.f32 %v3800_v44  ;;  %v272_v49 = vld [vmem:[%s5038_s5 + $0x18] sm:$0xff]  ;;  %405 = vmatpush.msra.mxu0 %v268_v48  ;;  %v271_v53 = vld [vmem:[%s5038_s5 + $0x10] sm:$0xff]  ;;  %v266_v55 = vld [vmem:[%s5037_s4 + $0x8] sm:$0xff]  ;;  %vm480_vm15 = vcmask 64512  }
  0x17   :  { %s3179_s27 = sld [smem:[#allocation4 + $0x2]]  ;;  %v276_v50 = vld [vmem:[%s5039_s6 + $0x18] sm:$0xff]  ;;  %434 = vmatpush.msra.mxu1 %v272_v49  ;;  %v275_v54 = vld [vmem:[%s5039_s6 + $0x10] sm:$0xff]  ;;  %v270_v56 = vld [vmem:[%s5038_s5 + $0x8] sm:$0xff] }
  0x18   :  { %s3180_s28 = sld [smem:[#allocation4 + $0x3]]  ;;  %463 = vmatpush.msra.mxu2 %v276_v50  ;;  %406 = vmatpush.msra.mxu0 %v267_v52  ;;  %v274_v57 = vld [vmem:[%s5039_s6 + $0x8] sm:$0xff]  ;;  %v265_v59 = vld [vmem:[%s5037_s4] sm:$0xff] }
  0x19   :  { %s3181_s29 = sld [smem:[#allocation4 + $0x4]]  ;;  %435 = vmatpush.msra.mxu1 %v271_v53  ;;  %v269_v60 = vld [vmem:[%s5038_s5] sm:$0xff] }
  0x1a   :  { %s3182_s30 = sld [smem:[#allocation4 + $0x5]]  ;;  %464 = vmatpush.msra.mxu2 %v275_v54  ;;  %407 = vmatpush.msra.mxu0 %v266_v55  ;;  %v273_v61 = vld [vmem:[%s5039_s6] sm:$0xff] }
  0x1b   :  { %s106_s18 = scalar_lea.vmem %s5035_s2, %s105_s7  ;;  %s3183_s19 = sld [smem:[#allocation4 + $0x6]]  ;;  %436 = vmatpush.msra.mxu1 %v270_v56 }
  0x1c   :  { %v107_v0 = vld [vmem:[%s106_s18] sm:$0x1]  ;;  %s111_s21 = scalar_lea.vmem %s5035_s2, %s3178_s10  ;;  %s3184_s22 = sld [smem:[#allocation4 + $0x7]]  ;;  %v3473_v45 = vpop.eup %3472  ;;  %465 = vmatpush.msra.mxu2 %v274_v57  ;;  %408 = vmatpush.msra.mxu0 %v265_v59 }
  0x1d   :  { %109 = vst.msk [vmem:[#allocation2] sm:$0x1] %vm108_vm0, %v107_v0  ;;  %v112_v1 = vld [vmem:[%s111_s21] sm:$0x1]  ;;  %s115_s0 = scalar_lea.vmem %s5035_s2, %s3179_s27  ;;  %s3185_s25 = sld [smem:[#allocation4 + $0x8]]  ;;  %v316_v46 = vmul.f32 32.0, %v3473_v45  ;;  %vm320_vm2 = vweird.f32 %v3473_v45  ;;  %437 = vmatpush.msra.mxu1 %v269_v60 }
  0x1e   :  { %113 = vst.msk [vmem:[#allocation2 + $0x1] sm:$0x1] %vm108_vm0, %v112_v1  ;;  %v116_v2 = vld [vmem:[%s115_s0] sm:$0x1]  ;;  %s119_s14 = scalar_lea.vmem %s5035_s2, %s3180_s28  ;;  %s3186_s15 = sld [smem:[#allocation4 + $0x9]]  ;;  %466 = vmatpush.msra.mxu2 %v273_v61 }
  0x1f   :  { %117 = vst.msk [vmem:[#allocation2 + $0x2] sm:$0x1] %vm108_vm0, %v116_v2  ;;  %v120_v3 = vld [vmem:[%s119_s14] sm:$0x1]  ;;  %s123_s20 = scalar_lea.vmem %s5035_s2, %s3181_s29  ;;  %s3187_s9 = sld [smem:[#allocation4 + $0xa]]  ;;  %v317_v47 = vsub.f32 1.0, %v316_v46 }
  0x20   :  { %121 = vst.msk [vmem:[#allocation2 + $0x3] sm:$0x1] %vm108_vm0, %v120_v3  ;;  %v124_v4 = vld [vmem:[%s123_s20] sm:$0x1]  ;;  %s127_s23 = scalar_lea.vmem %s5035_s2, %s3182_s30  ;;  %s3188_s24 = sld [smem:[#allocation4 + $0xb]] }
  0x21   :  { %125 = vst.msk [vmem:[#allocation2 + $0x4] sm:$0x1] %vm108_vm0, %v124_v4  ;;  %v128_v5 = vld [vmem:[%s127_s23] sm:$0x1]  ;;  %s131_s26 = scalar_lea.vmem %s5035_s2, %s3183_s19  ;;  %s3189_s7 = sld [smem:[#allocation4 + $0xc]]  ;;  %v318_v51 = vmul.f32 %v3473_v45, %v317_v47 }
  0x22   :  { %129 = vst.msk [vmem:[#allocation2 + $0x5] sm:$0x1] %vm108_vm0, %v128_v5  ;;  %v132_v6 = vld [vmem:[%s131_s26] sm:$0x1]  ;;  %s135_s10 = scalar_lea.vmem %s5035_s2, %s3184_s22  ;;  %s3190_s18 = sld [smem:[#allocation4 + $0xd]] }
  0x23   :  { %133 = vst.msk [vmem:[#allocation2 + $0x6] sm:$0x1] %vm108_vm0, %v132_v6  ;;  %v136_v7 = vld [vmem:[%s135_s10] sm:$0x1]  ;;  %s139_s27 = scalar_lea.vmem %s5035_s2, %s3185_s25  ;;  %s3191_s21 = sld [smem:[#allocation4 + $0xe]]  ;;  %v319_v58 = vadd.f32 %v3473_v45, %v318_v51 }
  0x24   :  { %137 = vst.msk [vmem:[#allocation2 + $0x7] sm:$0x1] %vm108_vm0, %v136_v7  ;;  %v140_v8 = vld [vmem:[%s139_s27] sm:$0x1]  ;;  %s143_s28 = scalar_lea.vmem %s5035_s2, %s3186_s15  ;;  %s3192_s0 = sld [smem:[#allocation4 + $0xf]] }
  0x25   :  { %141 = vst.msk [vmem:[#allocation2 + $0x8] sm:$0x1] %vm108_vm0, %v140_v8  ;;  %v144_v9 = vld [vmem:[%s143_s28] sm:$0x1]  ;;  %s147_s29 = scalar_lea.vmem %s5035_s2, %s3187_s9  ;;  %s3193_s14 = sld [smem:[#allocation4 + $0x10]]  ;;  %v4096_v62 = vsel %vm320_vm2, %v3473_v45, %v319_v58 }
  0x26   :  { %145 = vst.msk [vmem:[#allocation2 + $0x9] sm:$0x1] %vm108_vm0, %v144_v9  ;;  %v148_v10 = vld [vmem:[%s147_s29] sm:$0x1]  ;;  %s151_s30 = scalar_lea.vmem %s5035_s2, %s3188_s24  ;;  %s3194_s20 = sld [smem:[#allocation4 + $0x11]] }
  0x27   :  { %149 = vst.msk [vmem:[#allocation2 + $0xa] sm:$0x1] %vm108_vm0, %v148_v10  ;;  %v152_v11 = vld [vmem:[%s151_s30] sm:$0x1]  ;;  %s155_s19 = scalar_lea.vmem %s5035_s2, %s3189_s7  ;;  %s3950_s23 = sld [smem:[#allocation4 + $0x12]] }
  0x28   :  { %153 = vst.msk [vmem:[#allocation2 + $0xb] sm:$0x1] %vm108_vm0, %v152_v11  ;;  %v156_v12 = vld [vmem:[%s155_s19] sm:$0x1]  ;;  %s159_s22 = scalar_lea.vmem %s5035_s2, %s3190_s18  ;;  %s3956_s26 = sld [smem:[#allocation4 + $0x13]] }
  0x29   :  { %157 = vst.msk [vmem:[#allocation2 + $0xc] sm:$0x1] %vm108_vm0, %v156_v12  ;;  %v160_v13 = vld [vmem:[%s159_s22] sm:$0x1]  ;;  %s163_s25 = scalar_lea.vmem %s5035_s2, %s3191_s21  ;;  %s3962_s10 = sld [smem:[#allocation4 + $0x14]] }
  0x2a   :  { %161 = vst.msk [vmem:[#allocation2 + $0xd] sm:$0x1] %vm108_vm0, %v160_v13  ;;  %v164_v14 = vld [vmem:[%s163_s25] sm:$0x1]  ;;  %s167_s15 = scalar_lea.vmem %s5035_s2, %s3192_s0  ;;  %s3968_s18 = sld [smem:[#allocation4 + $0x15]] }
  0x2b   :  { %v3970_v15 = vld [vmem:[#allocation2] sm:$0xff]  ;;  %165 = vst.msk [vmem:[#allocation2 + $0xe] sm:$0x1] %vm108_vm0, %v164_v14  ;;  %s171_s19 = scalar_lea.vmem %s5035_s2, %s3193_s14  ;;  %s3199_s22 = sld [smem:[#allocation4 + $0x16]] }
  0x2c   :  { %v168_v16 = vld [vmem:[%s167_s15] sm:$0x1]  ;;  %v298_v17 = vmul.f32 %v3970_v15, %v3970_v15  ;;  %s175_s28 = scalar_lea.vmem %s5035_s2, %s3194_s20  ;;  %s3200_s25 = sld [smem:[#allocation4 + $0x17]] }
  0x2d   :  { %169 = vst.msk [vmem:[#allocation2 + $0xf] sm:$0x1] %vm108_vm0, %v168_v16  ;;  %v172_v18 = vld [vmem:[%s171_s19] sm:$0x1]  ;;  %s179_s14 = scalar_lea.vmem %s5035_s2, %s3950_s23  ;;  %s3201_s19 = sld [smem:[#allocation4 + $0x18]] }
  0x2e   :  { %173 = vst.msk [vmem:[#allocation2 + $0x10] sm:$0x1] %vm108_vm0, %v172_v18  ;;  %v176_v19 = vld [vmem:[%s175_s28] sm:$0x1]  ;;  %v303_v20 = vsel %vm302_vm1, %v298_v17, 0.0  ;;  %s183_s15 = scalar_lea.vmem %s5035_s2, %s3956_s26  ;;  %s3202_s28 = sld [smem:[#allocation4 + $0x19]] }
  0x2f   :  { %177 = vst.msk [vmem:[#allocation2 + $0x11] sm:$0x1] %vm108_vm0, %v176_v19  ;;  %v180_v21 = vld [vmem:[%s179_s14] sm:$0x1]  ;;  %304 = vadd.xlane.f32.xlu0 %v303_v20  ;;  %s187_s27 = scalar_lea.vmem %s5035_s2, %s3962_s10  ;;  %s3203_s26 = sld [smem:[#allocation4 + $0x1a]] }
  0x30   :  { %181 = vst.msk [vmem:[#allocation2 + $0x12] sm:$0x1] %vm108_vm0, %v180_v21  ;;  %v184_v22 = vld [vmem:[%s183_s15] sm:$0x1]  ;;  %s191_s9 = scalar_lea.vmem %s5035_s2, %s3968_s18  ;;  %s3204_s10 = sld [smem:[#allocation4 + $0x1b]] }
  0x31   :  { %185 = vst.msk [vmem:[#allocation2 + $0x13] sm:$0x1] %vm108_vm0, %v184_v22  ;;  %v188_v23 = vld [vmem:[%s187_s27] sm:$0x1]  ;;  %s195_s14 = scalar_lea.vmem %s5035_s2, %s3199_s22  ;;  %s3205_s18 = sld [smem:[#allocation4 + $0x1c]] }
  0x32   :  { %189 = vst.msk [vmem:[#allocation2 + $0x14] sm:$0x1] %vm108_vm0, %v188_v23  ;;  %v192_v24 = vld [vmem:[%s191_s9] sm:$0x1]  ;;  %s199_s15 = scalar_lea.vmem %s5035_s2, %s3200_s25  ;;  %s3206_s20 = sld [smem:[#allocation4 + $0x1d]] }
  0x33   :  { %193 = vst.msk [vmem:[#allocation2 + $0x15] sm:$0x1] %vm108_vm0, %v192_v24  ;;  %v196_v26 = vld [vmem:[%s195_s14] sm:$0x1]  ;;  %s203_s27 = scalar_lea.vmem %s5035_s2, %s3201_s19  ;;  %s3207_s23 = sld [smem:[#allocation4 + $0x1e]] }
  0x34   :  { %v4008_v25 = vld [vmem:[#allocation2 + $0x8] sm:$0xff]  ;;  %197 = vst.msk [vmem:[#allocation2 + $0x16] sm:$0x1] %vm108_vm0, %v196_v26  ;;  %v200_v28 = vld [vmem:[%s199_s15] sm:$0x1]  ;;  %s207_s9 = scalar_lea.vmem %s5035_s2, %s3202_s28  ;;  %s3208_s24 = sld [smem:[#allocation4 + $0x1f]] }
  0x35   :  { %v299_v27 = vmul.f32 %v4008_v25, %v4008_v25  ;;  %201 = vst.msk [vmem:[#allocation2 + $0x17] sm:$0x1] %vm108_vm0, %v200_v28  ;;  %v204_v30 = vld [vmem:[%s203_s27] sm:$0x1]  ;;  %s211_s7 = scalar_lea.vmem %s5035_s2, %s3203_s26  ;;  %s3801_s30 = smov 112  }
  0x36   :  { %205 = vst.msk [vmem:[#allocation2 + $0x18] sm:$0x1] %vm108_vm0, %v204_v30  ;;  %v208_v31 = vld [vmem:[%s207_s9] sm:$0x1]  ;;  %s215_s15 = scalar_lea.vmem %s5035_s2, %s3204_s10  ;;  %s3803_s28 = smov 104  }
  0x37   :  { %v306_v29 = vsel %vm302_vm1, %v299_v27, 0.0  ;;  %209 = vst.msk [vmem:[#allocation2 + $0x19] sm:$0x1] %vm108_vm0, %v208_v31  ;;  %v212_v32 = vld [vmem:[%s211_s7] sm:$0x1]  ;;  %s219_s22 = scalar_lea.vmem %s5035_s2, %s3205_s18 }
  0x38   :  { %307 = vadd.xlane.f32.xlu0 %v306_v29  ;;  %213 = vst.msk [vmem:[#allocation2 + $0x1a] sm:$0x1] %vm108_vm0, %v212_v32  ;;  %v216_v33 = vld [vmem:[%s215_s15] sm:$0x1]  ;;  %s223_s26 = scalar_lea.vmem %s5035_s2, %s3206_s20  ;;  %s3802_s15 = smov 120  }
  0x39   :  { %217 = vst.msk [vmem:[#allocation2 + $0x1b] sm:$0x1] %vm108_vm0, %v216_v33  ;;  %v220_v34 = vld [vmem:[%s219_s22] sm:$0x1]  ;;  %s227_s10 = scalar_lea.vmem %s5035_s2, %s3207_s23  ;;  %s3131_s23 = sshll.u32 %s5046_s13, 4  ;;  %s3132_s23 = int_to_ptr.hbm [resolvable:$true] %s3131_s23 }
  0x3a   :  { %221 = vst.msk [vmem:[#allocation2 + $0x1c] sm:$0x1] %vm108_vm0, %v220_v34  ;;  %v224_v35 = vld [vmem:[%s223_s26] sm:$0x1]  ;;  %s231_s14 = scalar_lea.vmem %s5035_s2, %s3208_s24  ;;  %s3807_s26 = smov 24  }
  0x3b   :  { %225 = vst.msk [vmem:[#allocation2 + $0x1d] sm:$0x1] %vm108_vm0, %v224_v35  ;;  %v228_v37 = vld [vmem:[%s227_s10] sm:$0x1] }
  0x3c   :  { %v4044_v36 = vld [vmem:[#allocation2 + $0x10] sm:$0xff]  ;;  %229 = vst.msk [vmem:[#allocation2 + $0x1e] sm:$0x1] %vm108_vm0, %v228_v37  ;;  %v232_v39 = vld [vmem:[%s231_s14] sm:$0x1] }
  0x3d   :  { %v300_v38 = vmul.f32 %v4044_v36, %v4044_v36  ;;  %233 = vst.msk [vmem:[#allocation2 + $0x1f] sm:$0x1] %vm108_vm0, %v232_v39  ;;  %v3467_v17 = vld [vmem:[%s5036_s3] ss:$0 sm:$0xff] }
  0x3f   :  { %v309_v40 = vsel %vm302_vm1, %v300_v38, 0.0 }
  0x40   :  { %310 = vadd.xlane.f32.xlu1 %v309_v40 }
  0x44   :  { %v4055_v41 = vld [vmem:[#allocation2 + $0x18] sm:$0xff] }
  0x45   :  { %v301_v42 = vmul.f32 %v4055_v41, %v4055_v41 }
  0x47   :  { %v312_v43 = vsel %vm302_vm1, %v301_v42, 0.0 }
  0x48   :  { %313 = vadd.xlane.f32.xlu1 %v312_v43 }
  0xa2   :  { %v305_v63 = vpop.xlane.xlu0 %304 }
  0xa3   :  { %v322_v0 = vmul.f32 %v4096_v62, %v305_v63 }
  0xa5   :  { %v326_v1 = vadd.f32 1e-06, %v322_v0 }
  0xa7   :  { %3474 = vrsqrt.f32 %v326_v1  ;;  %vm336_vm4 = vweird.f32 %v326_v1 }
  0xab   :  { %v308_v2 = vpop.xlane.xlu0 %307 }
  0xac   :  { %v323_v3 = vmul.f32 %v4096_v62, %v308_v2 }
  0xad   :  { %v3475_v4 = vpop.eup %3474 }
  0xae   :  { %v327_v5 = vadd.f32 1e-06, %v323_v3  ;;  %v331_v6 = vmul.f32 %v3475_v4, %v326_v1  ;;  %vm337_vm3 = vweird.f32 %v3475_v4 }
  0xaf   :  { %vm338_vm5 = vmor %vm336_vm4, %vm337_vm3 }
  0xb0   :  { %3476 = vrsqrt.f32 %v327_v5  ;;  %v332_v7 = vmul.f32 %v3475_v4, %v331_v6  ;;  %vm346_vm7 = vweird.f32 %v327_v5 }
  0xb2   :  { %v333_v8 = vmul.f32 0.5, %v332_v7 }
  0xb3   :  { %v311_v9 = vpop.xlane.xlu1 %310 }
  0xb4   :  { %v334_v10 = vsub.f32 1.5, %v333_v8  ;;  %v324_v11 = vmul.f32 %v4096_v62, %v311_v9  ;;  %v238_v8 = vlaneseq  ;;  %v3804_v9 = vmov 0  }
  0xb6   :  { %v3477_v12 = vpop.eup %3476  ;;  %v328_v14 = vadd.f32 1e-06, %v324_v11  ;;  %v335_v16 = vmul.f32 %v3475_v4, %v334_v10  ;;  %v4174_v11 = vshrl.u32 %v238_v8, 7 }
  0xb7   :  { %v341_v13 = vmul.f32 %v3477_v12, %v327_v5  ;;  %vm347_vm6 = vweird.f32 %v3477_v12  ;;  %v245_v5 = vld [vmem:[%s5034_s1] sm:$0x1] }
  0xb8   :  { %3478 = vrsqrt.f32 %v328_v14  ;;  %v339_v19 = vsel %vm338_vm5, %v3475_v4, %v335_v16  ;;  %vm348_vm8 = vmor %vm346_vm7, %vm347_vm6  ;;  %vm356_vm9 = vweird.f32 %v328_v14  ;;  %vm246_vm0 = vcmp.gt.f32.partialorder %v245_v5, 0.5 }
  0xb9   :  { %v342_v18 = vmul.f32 %v3477_v12, %v341_v13  ;;  %v370_v20 = vmul.f32 %v339_v19, %v3970_v15  ;;  %v247_v10 = vsel %vm246_vm0, 1, %v3804_v9  ;;  %v4194_v19 = vadd.s32 8, %v4174_v11 }
  0xba   :  { %v248_v13 = vperm.slane %v247_v10, 0  ;;  %vm520_vm5 = vcmask 130048  }
  0xbb   :  { %v343_v21 = vmul.f32 0.5, %v342_v18  ;;  %v377_v22 = vmul.f32 %v3467_v17, %v370_v20  ;;  %v314_v24 = vpop.xlane.xlu1 %313 }
  0xbc   :  { %v325_v26 = vmul.f32 %v4096_v62, %v314_v24  ;;  %vm4183_vm3 = vcmp.eq.s32.totalorder %v248_v13, 1 }
  0xbd   :  { %v344_v23 = vsub.f32 1.5, %v343_v21  ;;  %3210 = vmatmul.msk.f32.vlgmr.msra.gmra.mxu0 %vm302_vm1, %v377_v22  ;;  %3214 = vmatmul.msk.f32.vlgmr.msra.gmra.mxu1 %vm302_vm1, %v377_v22 }
  0xbe   :  { %v3479_v27 = vpop.eup %3478  ;;  %3218 = vmatmul.msk.f32.vlgmr.msra.gmra.mxu2 %vm302_vm1, %v377_v22  ;;  %v329_v30 = vadd.f32 1e-06, %v325_v26  ;;  %v3805_v22 = vmov -1e+09  }
  0xbf   :  { %v345_v28 = vmul.f32 %v3477_v12, %v344_v23  ;;  %v351_v29 = vmul.f32 %v3479_v27, %v328_v14  ;;  %vm357_vm10 = vweird.f32 %v3479_v27 }
  0xc0   :  { %3480 = vrsqrt.f32 %v329_v30  ;;  %vm358_vm11 = vmor %vm356_vm9, %vm357_vm10  ;;  %vm366_vm12 = vweird.f32 %v329_v30 }
  0xc1   :  { %v349_v15 = vsel %vm348_vm8, %v3477_v12, %v345_v28  ;;  %v352_v31 = vmul.f32 %v3479_v27, %v351_v29  ;;  %v4176_v12 = vand.u32 127, %v238_v8 }
  0xc2   :  { %v371_v32 = vmul.f32 %v349_v15, %v4008_v25 }
  0xc3   :  { %v353_v33 = vmul.f32 0.5, %v352_v31  ;;  %vm243_vm2 = vcmp.ge.s32.totalorder %v4174_v11, %v4176_v12  ;;  %vm244_vm6 = vcmp.ge.s32.totalorder %v4194_v19, %v4176_v12 }
  0xc4   :  { %v378_v34 = vmul.f32 %v3467_v17, %v371_v32  ;;  %vm250_vm4 = vmand %vm243_vm2, %vm4183_vm3 }
  0xc5   :  { %v354_v35 = vsub.f32 1.5, %v353_v33  ;;  %v4197_v23 = vsel %vm250_vm4, 0.0, %v3805_v22  ;;  %vm251_vm7 = vmand %vm244_vm6, %vm4183_vm3 }
  0xc6   :  { %3211 = vmatmul.msk.f32.gmra.mxu0 %vm302_vm1, %v378_v34  ;;  %3215 = vmatmul.msk.f32.gmra.mxu1 %vm302_vm1, %v378_v34  ;;  %v3481_v37 = vpop.eup %3480  ;;  %v4217_v31 = vsel %vm251_vm7, 0.0, %v3805_v22 }
  0xc7   :  { %3219 = vmatmul.msk.f32.gmra.mxu2 %vm302_vm1, %v378_v34  ;;  %v355_v38 = vmul.f32 %v3479_v27, %v354_v35  ;;  %v361_v39 = vmul.f32 %v3481_v37, %v329_v30  ;;  %vm367_vm13 = vweird.f32 %v3481_v37 }
  0xc8   :  { %vm368_vm14 = vmor %vm366_vm12, %vm367_vm13  ;;  %vm684_vm12 = vcmask 130112   ;;  %vm795_vm13 = vcmask 195712  }
  0xc9   :  { %v359_v40 = vsel %vm358_vm11, %v3479_v27, %v355_v38  ;;  %v362_v42 = vmul.f32 %v3481_v37, %v361_v39 }
  0xca   :  { %v372_v43 = vmul.f32 %v359_v40, %v4044_v36 }
  0xcb   :  { %v363_v25 = vmul.f32 0.5, %v362_v42 }
  0xcc   :  { %v379_v44 = vmul.f32 %v3467_v17, %v372_v43 }
  0xcd   :  { %v364_v45 = vsub.f32 1.5, %v363_v25 }
  0xce   :  { %3216 = vmatmul.msk.f32.gmra.mxu1 %vm302_vm1, %v379_v44  ;;  %3212 = vmatmul.msk.f32.gmra.mxu0 %vm302_vm1, %v379_v44 }
  0xcf   :  { %3220 = vmatmul.msk.f32.gmra.mxu2 %vm302_vm1, %v379_v44  ;;  %v365_v46 = vmul.f32 %v3481_v37, %v364_v45 }
  0xd1   :  { %v369_v47 = vsel %vm368_vm14, %v3481_v37, %v365_v46  ;;  %vm906_vm14 = vcmask 261312  }
  0xd2   :  { %v373_v48 = vmul.f32 %v369_v47, %v4055_v41 }
  0xd4   :  { %v380_v49 = vmul.f32 %v3467_v17, %v373_v48 }
  0xd6   :  { %3217 = vmatmul.msk.f32.gmra.mxu1 %vm302_vm1, %v380_v49  ;;  %3213 = vmatmul.msk.f32.gmra.mxu0 %vm302_vm1, %v380_v49 }
  0xd7   :  { %3221 = vmatmul.msk.f32.gmra.mxu2 %vm302_vm1, %v380_v49 }
 0x13a   :  { %v410_v36 = vpop.f32.mrf.mxu0  ;;  %v439_v50 = vpop.f32.mrf.mxu1 }
 0x13b   :  { %691 = vrot.lane.b32.xlu2 %v439_v50, %s3801_s30  ;;  %578 = vrot.lane.b32.xlu0 %v439_v50, %s3802_s15 }
 0x13c   :  { %574 = vrot.lane.b32.xlu1 %v410_v36, %s3802_s15 }
 0x141   :  { %v468_v51 = vpop.f32.mrf.mxu2 }
 0x143   :  { %v442_v41 = vpop.f32.mrf.mxu1  ;;  %687 = vrot.lane.b32.xlu2 %v410_v36, %s3801_s30  ;;  %v413_v54 = vpop.f32.mrf.mxu0 }
 0x144   :  { %804 = vrot.lane.b32.xlu0 %v442_v41, %s3803_s28  ;;  %802 = vrot.lane.b32.xlu1 %v439_v50, %s3803_s28 }
 0x145   :  { %3222 = vmatpush.xpose.msk.msra.mxu3 %vm480_vm15, %v442_v41 }
 0x149   :  { %3223 = vmatpush.xpose.msk.msra.mxu3 %vm480_vm15, %v439_v50 }
 0x14a   :  { %v471_v52 = vpop.f32.mrf.mxu2 }
 0x14b   :  { %v445_v53 = vpop.f32.mrf.mxu1  ;;  %580 = vrot.lane.b32.xlu2 %v442_v41, %s3802_s15  ;;  %v416_v56 = vpop.f32.mrf.mxu0  ;;  %v3407_v58 = vpack.i.bf16 %v468_v51, %v471_v52 }
 0x14c   :  { %3224 = vmatmul.msk.f32.vlgmr.msra.gmra.mxu3 %vm480_vm15, %v410_v36  ;;  %798 = vrot.lane.b32.xlu0 %v410_v36, %s3803_s28 }
 0x14d   :  { %563 = vmatpush.msrb.mxu3 %v471_v52 }
 0x14f   :  { %564 = vmatpush.msrb.mxu3 %v468_v51 }
 0x152   :  { %v4231_v50 = vpop.f32.mrf.mxu2 }
 0x153   :  { %v448_v55 = vpop.f32.mrf.mxu1  ;;  %693 = vrot.lane.b32.xlu2 %v442_v41, %s3801_s30  ;;  %v4139_v57 = vpop.f32.mrf.mxu0 }
 0x154   :  { %3225 = vmatmul.msk.f32.gmra.mxu3 %vm480_vm15, %v413_v54  ;;  %1119 = vrot.lane.b32.xlu0 %v448_v55, %s3801_s30 }
 0x155   :  { %1007 = vrot.lane.b32.xlu1 %v448_v55, %s3802_s15 }
 0x15a   :  { %v4233_v52 = vpop.f32.mrf.mxu2 }
 0x15b   :  { %576 = vrot.lane.b32.xlu2 %v413_v54, %s3802_s15 }
 0x15c   :  { %1117 = vrot.lane.b32.xlu0 %v445_v53, %s3801_s30 }
 0x15d   :  { %1001 = vrot.lane.b32.xlu1 %v416_v56, %s3802_s15 }
 0x163   :  { %689 = vrot.lane.b32.xlu2 %v413_v54, %s3801_s30 }
 0x164   :  { %1229 = vrot.lane.b32.xlu0 %v448_v55, %s3803_s28 }
 0x165   :  { %1003 = vrot.lane.b32.xlu1 %v4139_v57, %s3802_s15 }
 0x16b   :  { %800 = vrot.lane.b32.xlu2 %v413_v54, %s3803_s28 }
 0x16c   :  { %1223 = vrot.lane.b32.xlu0 %v416_v56, %s3803_s28 }
 0x16d   :  { %1227 = vrot.lane.b32.xlu1 %v445_v53, %s3803_s28 }
 0x173   :  { %1005 = vrot.lane.b32.xlu2 %v445_v53, %s3802_s15 }
 0x174   :  { %3408 = vrot.lane.b32.xlu0 %v3407_v58, %s3802_s15 }
 0x175   :  { %3418 = vrot.lane.b32.xlu1 %v3407_v58, %s3803_s28 }
 0x17b   :  { %1113 = vrot.lane.b32.xlu2 %v416_v56, %s3801_s30 }
 0x183   :  { %1115 = vrot.lane.b32.xlu2 %v4139_v57, %s3801_s30 }
 0x18b   :  { %1225 = vrot.lane.b32.xlu2 %v4139_v57, %s3803_s28 }
 0x193   :  { %3413 = vrot.lane.b32.xlu2 %v3407_v58, %s3801_s30 }
 0x195   :  { %v692_v59 = vpop.permute.xlu2 %691 }
 0x19d   :  { %v688_v60 = vpop.permute.xlu2 %687 }
 0x1a5   :  { %v581_v61 = vpop.permute.xlu2 %580 }
 0x1a6   :  { %3228 = vmatpush.xpose.msk.msrb.mxu0 %vm480_vm15, %v581_v61 }
 0x1ad   :  { %v579_v63 = vpop.permute.xlu0 %578  ;;  %v694_v0 = vpop.permute.xlu2 %693 }
 0x1ae   :  { %3229 = vmatpush.xpose.msk.msrb.mxu0 %vm480_vm15, %v579_v63  ;;  %v575_v1 = vpop.permute.xlu1 %574  ;;  %3234 = vmatpush.xpose.msk.msrb.mxu2 %vm480_vm15, %v694_v0 }
 0x1b1   :  { %3230 = vmatmul.msk.f32.vlgmr.msrb.gmra.mxu0 %vm480_vm15, %v575_v1 }
 0x1b2   :  { %3235 = vmatpush.xpose.msk.msrb.mxu2 %vm480_vm15, %v692_v59 }
 0x1b5   :  { %3236 = vmatmul.msk.f32.vlgmr.msrb.gmra.mxu2 %vm480_vm15, %v688_v60  ;;  %v577_v3 = vpop.permute.xlu2 %576 }
 0x1b6   :  { %3246 = vmatpush.xpose.msk.msra.mxu2 %vm480_vm15, %v448_v55  ;;  %v805_v2 = vpop.permute.xlu0 %804  ;;  %v803_v4 = vpop.permute.xlu1 %802 }
 0x1b7   :  { %3240 = vmatpush.xpose.msk.msra.mxu0 %vm480_vm15, %v805_v2 }
 0x1b9   :  { %3231 = vmatmul.msk.f32.gmra.mxu0 %vm480_vm15, %v577_v3 }
 0x1ba   :  { %3247 = vmatpush.xpose.msk.msra.mxu2 %vm480_vm15, %v445_v53 }
 0x1bb   :  { %3241 = vmatpush.xpose.msk.msra.mxu0 %vm480_vm15, %v803_v4 }
 0x1bd   :  { %v690_v7 = vpop.permute.xlu2 %689 }
 0x1be   :  { %v799_v6 = vpop.permute.xlu0 %798  ;;  %3237 = vmatmul.msk.f32.gmra.mxu2 %vm480_vm15, %v690_v7 }
 0x1c1   :  { %3242 = vmatmul.msk.f32.vlgmr.msra.gmra.mxu0 %vm480_vm15, %v799_v6 }
 0x1c5   :  { %v801_v14 = vpop.permute.xlu2 %800 }
 0x1c6   :  { %v1120_v17 = vpop.permute.xlu0 %1119  ;;  %3248 = vmatmul.msk.f32.vlgmr.msra.gmra.mxu2 %vm480_vm15, %v416_v56 }
 0x1c7   :  { %v1008_v16 = vpop.permute.xlu1 %1007  ;;  %3258 = vmatpush.xpose.msk.msrb.mxu2 %vm480_vm15, %v1120_v17 }
 0x1c8   :  { %3252 = vmatpush.xpose.msk.msrb.mxu0 %vm480_vm15, %v1008_v16 }
 0x1c9   :  { %3243 = vmatmul.msk.f32.gmra.mxu0 %vm480_vm15, %v801_v14 }
 0x1cd   :  { %v1006_v21 = vpop.permute.xlu2 %1005 }
 0x1ce   :  { %v1118_v27 = vpop.permute.xlu0 %1117  ;;  %3249 = vmatmul.msk.f32.gmra.mxu2 %vm480_vm15, %v4139_v57  ;;  %3253 = vmatpush.xpose.msk.msrb.mxu0 %vm480_vm15, %v1006_v21  ;;  %v3209_v57 = vld [vmem:[%s5034_s1 + $0x1] sm:$0x1]  ;;  %s3806_s1 = smov 16  }
 0x1cf   :  { %v510_v20 = vpop.f32.mrf.mxu3  ;;  %v1002_v26 = vpop.permute.xlu1 %1001  ;;  %3259 = vmatpush.xpose.msk.msrb.mxu2 %vm480_vm15, %v1118_v27  ;;  %vm256_vm8 = vcmp.gt.f32.partialorder %v3209_v57, 0.5 }
 0x1d0   :  { %v516_v24 = vmul.f32 0.35355338, %v510_v20  ;;  %v257_v0 = vsel %vm256_vm8, 1, %v3804_v9 }
 0x1d1   :  { %3254 = vmatmul.msk.f32.vlgmr.msrb.gmra.mxu0 %vm480_vm15, %v1002_v26  ;;  %v258_v4 = vperm.slane %v257_v0, 0 }
 0x1d2   :  { %v4206_v28 = vadd.f32 %v516_v24, %v4197_v23 }
 0x1d3   :  { %vm4259_vm9 = vcmp.eq.s32.totalorder %v258_v4, 1 }
 0x1d4   :  { %v521_v29 = vsel %vm520_vm5, %v4206_v28, -inf  ;;  %vm260_vm10 = vmand %vm243_vm2, %vm4259_vm9 }
 0x1d5   :  { %522 = vmax.xlane.f32.xlu1 %v521_v29  ;;  %v1114_v15 = vpop.permute.xlu2 %1113  ;;  %v4275_v21 = vsel %vm260_vm10, 0.0, %v3805_v22  ;;  %vm261_vm11 = vmand %vm244_vm6, %vm4259_vm9 }
 0x1d6   :  { %v1230_v34 = vpop.permute.xlu0 %1229  ;;  %3260 = vmatmul.msk.f32.vlgmr.msrb.gmra.mxu2 %vm480_vm15, %v1114_v15 }
 0x1d7   :  { %v513_v30 = vpop.f32.mrf.mxu3  ;;  %v1004_v33 = vpop.permute.xlu1 %1003  ;;  %3264 = vmatpush.xpose.msk.msra.mxu0 %vm480_vm15, %v1230_v34 }
 0x1d8   :  { %v517_v32 = vmul.f32 0.35355338, %v513_v30 }
 0x1d9   :  { %3255 = vmatmul.msk.f32.gmra.mxu0 %vm480_vm15, %v1004_v33 }
 0x1da   :  { %v4222_v35 = vadd.f32 %v517_v32, %v4217_v31 }
 0x1dc   :  { %v524_v37 = vsel %vm520_vm5, %v4222_v35, -inf }
 0x1dd   :  { %525 = vmax.xlane.f32.xlu2 %v524_v37  ;;  %v1116_v38 = vpop.permute.xlu2 %1115 }
 0x1de   :  { %v1224_v40 = vpop.permute.xlu0 %1223  ;;  %3261 = vmatmul.msk.f32.gmra.mxu2 %vm480_vm15, %v1116_v38 }
 0x1df   :  { %v1228_v39 = vpop.permute.xlu1 %1227 }
 0x1e0   :  { %3265 = vmatpush.xpose.msk.msra.mxu0 %vm480_vm15, %v1228_v39 }
 0x1e3   :  { %3266 = vmatmul.msk.f32.vlgmr.msra.gmra.mxu0 %vm480_vm15, %v1224_v40 }
 0x1e5   :  { %v1226_v42 = vpop.permute.xlu2 %1225 }
 0x1e6   :  { %v3409_v43 = vpop.permute.xlu0 %3408 }
 0x1e7   :  { %v3419_v25 = vpop.permute.xlu1 %3418  ;;  %v3410_v44 = vunpack.i.l.bf16 %v3409_v43  ;;  %v3411_v45 = vunpack.i.h.bf16 %v3409_v43 }
 0x1e8   :  { %v3420_v46 = vunpack.i.l.bf16 %v3419_v25  ;;  %v3421_v47 = vunpack.i.h.bf16 %v3419_v25 }
 0x1e9   :  { %667 = vmatpush.msrb.mxu1 %v3410_v44 }
 0x1eb   :  { %3267 = vmatmul.msk.f32.gmra.mxu0 %vm480_vm15, %v1226_v42  ;;  %668 = vmatpush.msrb.mxu1 %v3411_v45 }
 0x1ed   :  { %889 = vmatpush.msra.mxu1 %v3420_v46  ;;  %v3414_v48 = vpop.permute.xlu2 %3413 }
 0x1ee   :  { %v3415_v49 = vunpack.i.l.bf16 %v3414_v48  ;;  %v3416_v36 = vunpack.i.h.bf16 %v3414_v48  ;;  %v4307_v48 = vsel %vm261_vm11, 0.0, %v3805_v22 }
 0x1ef   :  { %890 = vmatpush.msra.mxu1 %v3421_v47 }
 0x1f0   :  { %778 = vmatpush.msra.mxu3 %v3415_v49 }
 0x1f2   :  { %779 = vmatpush.msra.mxu3 %v3416_v36 }
 0x22e   :  { %v607_v51 = vpop.f32.mrf.mxu0 }
 0x22f   :  { %v613_v41 = vmul.f32 0.35355338, %v607_v51 }
 0x231   :  { %v4236_v53 = vadd.f32 %v613_v41, %v4197_v23 }
 0x233   :  { %v617_v54 = vsel %vm520_vm5, %v4236_v53, -inf }
 0x234   :  { %618 = vmax.xlane.f32.xlu0 %v617_v54 }
 0x236   :  { %v610_v55 = vpop.f32.mrf.mxu0 }
 0x237   :  { %v614_v56 = vmul.f32 0.35355338, %v610_v55 }
 0x238   :  { %v720_v58 = vpop.f32.mrf.mxu2 }
 0x239   :  { %v4244_v59 = vadd.f32 %v614_v56, %v4217_v31  ;;  %v726_v60 = vmul.f32 0.35355338, %v720_v58 }
 0x23b   :  { %v620_v61 = vsel %vm520_vm5, %v4244_v59, -inf  ;;  %v4249_v63 = vadd.f32 %v726_v60, %v4197_v23 }
 0x23c   :  { %621 = vmax.xlane.f32.xlu1 %v620_v61 }
 0x23d   :  { %v730_v1 = vsel %vm520_vm5, %v4249_v63, -inf }
 0x23e   :  { %v831_v2 = vpop.f32.mrf.mxu0  ;;  %731 = vmax.xlane.f32.xlu0 %v730_v1 }
 0x23f   :  { %v837_v3 = vmul.f32 0.35355338, %v831_v2 }
 0x241   :  { %v4255_v5 = vadd.f32 %v837_v3, %v4197_v23  ;;  %v723_v6 = vpop.f32.mrf.mxu2 }
 0x242   :  { %v727_v7 = vmul.f32 0.35355338, %v723_v6 }
 0x243   :  { %v841_v8 = vsel %vm520_vm5, %v4255_v5, -inf }
 0x244   :  { %842 = vmax.xlane.f32.xlu2 %v841_v8  ;;  %v4264_v9 = vadd.f32 %v727_v7, %v4217_v31 }
 0x246   :  { %v834_v13 = vpop.f32.mrf.mxu0  ;;  %v733_v16 = vsel %vm520_vm5, %v4264_v9, -inf }
 0x247   :  { %734 = vmax.xlane.f32.xlu1 %v733_v16  ;;  %v838_v37 = vmul.f32 0.35355338, %v834_v13 }
 0x248   :  { %v523_v14 = vpop.xlane.xlu1 %522 }
 0x249   :  { %v527_v17 = vsub.f32 %v4206_v28, %v523_v14  ;;  %v938_v20 = vpop.f32.mrf.mxu2  ;;  %v4293_v40 = vadd.f32 %v838_v37, %v4217_v31 }
 0x24a   :  { %v944_v24 = vmul.f32 0.35355338, %v938_v20 }
 0x24b   :  { %v529_v18 = vmul.f32 1.442695, %v527_v17  ;;  %v844_v47 = vsel %vm520_vm5, %v4293_v40, -inf }
 0x24c   :  { %v4278_v26 = vadd.f32 %v944_v24, %v4275_v21 }
 0x24d   :  { %3482 = vpow2.f32 %v529_v18 }
 0x24e   :  { %v1034_v29 = vpop.f32.mrf.mxu0  ;;  %v948_v30 = vsel %vm520_vm5, %v4278_v26, -inf }
 0x24f   :  { %v1040_v15 = vmul.f32 0.35355338, %v1034_v29  ;;  %949 = vmax.xlane.f32.xlu2 %v948_v30 }
 0x250   :  { %v526_v27 = vpop.xlane.xlu2 %525 }
 0x251   :  { %v528_v11 = vsub.f32 %v4222_v35, %v526_v27  ;;  %v941_v33 = vpop.f32.mrf.mxu2  ;;  %v4286_v34 = vadd.f32 %v1040_v15, %v4275_v21 }
 0x252   :  { %v945_v43 = vmul.f32 0.35355338, %v941_v33 }
 0x253   :  { %v4283_v28 = vpop.eup %3482  ;;  %v531_v32 = vmul.f32 1.442695, %v528_v11  ;;  %v1044_v39 = vsel %vm520_vm5, %v4286_v34, -inf }
 0x254   :  { %v533_v38 = vsel %vm520_vm5, %v4283_v28, 0.0  ;;  %1045 = vmax.xlane.f32.xlu1 %v1044_v39  ;;  %v4318_v36 = vadd.f32 %v945_v43, %v4307_v48 }
 0x255   :  { %3484 = vpow2.f32 %v531_v32  ;;  %534 = vadd.xlane.f32.xlu0 %v533_v38 }
 0x256   :  { %v1037_v35 = vpop.f32.mrf.mxu0  ;;  %v951_v56 = vsel %vm520_vm5, %v4318_v36, -inf }
 0x257   :  { %v1041_v44 = vmul.f32 0.35355338, %v1037_v35 }
 0x259   :  { %v1146_v25 = vpop.f32.mrf.mxu2  ;;  %v4315_v49 = vadd.f32 %v1041_v44, %v4307_v48 }
 0x25a   :  { %v1152_v45 = vmul.f32 0.35355338, %v1146_v25 }
 0x25b   :  { %v4300_v42 = vpop.eup %3484  ;;  %v1047_v22 = vsel %vm520_vm5, %v4315_v49, -inf }
 0x25c   :  { %v536_v46 = vsel %vm520_vm5, %v4300_v42, 0.0  ;;  %v4310_v12 = vadd.f32 %v1152_v45, %v4275_v21 }
 0x25d   :  { %537 = vadd.xlane.f32.xlu2 %v536_v46  ;;  %845 = vmax.xlane.f32.xlu0 %v844_v47 }
 0x25e   :  { %v1156_v19 = vsel %vm520_vm5, %v4310_v12, -inf }
 0x25f   :  { %1157 = vmax.xlane.f32.xlu1 %v1156_v19 }
 0x260   :  { %v1256_v51 = vpop.f32.mrf.mxu0 }
 0x261   :  { %v1149_v41 = vpop.f32.mrf.mxu2  ;;  %v1262_v54 = vmul.f32 0.35355338, %v1256_v51 }
 0x262   :  { %v1153_v55 = vmul.f32 0.35355338, %v1149_v41 }
 0x263   :  { %v4330_v60 = vadd.f32 %v1262_v54, %v4275_v21 }
 0x264   :  { %v4325_v57 = vadd.f32 %v1153_v55, %v4307_v48 }
 0x265   :  { %1048 = vmax.xlane.f32.xlu2 %v1047_v22  ;;  %952 = vmax.xlane.f32.xlu0 %v951_v56  ;;  %v1266_v1 = vsel %vm520_vm5, %v4330_v60, -inf }
 0x266   :  { %v1159_v58 = vsel %vm520_vm5, %v4325_v57, -inf }
 0x267   :  { %1160 = vmax.xlane.f32.xlu1 %v1159_v58 }
 0x268   :  { %v1259_v61 = vpop.f32.mrf.mxu0 }
 0x269   :  { %v1263_v0 = vmul.f32 0.35355338, %v1259_v61 }
 0x26b   :  { %v4335_v2 = vadd.f32 %v1263_v0, %v4307_v48 }
 0x26d   :  { %1267 = vmax.xlane.f32.xlu2 %v1266_v1  ;;  %v1269_v3 = vsel %vm520_vm5, %v4335_v2, -inf }
 0x26f   :  { %1270 = vmax.xlane.f32.xlu1 %v1269_v3 }
 0x2a7   :  { %v619_v4 = vpop.xlane.xlu0 %618 }
 0x2a8   :  { %v623_v6 = vsub.f32 %v4236_v53, %v619_v4 }
 0x2aa   :  { %v625_v7 = vmul.f32 1.442695, %v623_v6 }
 0x2ac   :  { %3486 = vpow2.f32 %v625_v7 }
 0x2af   :  { %v622_v8 = vpop.xlane.xlu1 %621 }
 0x2b0   :  { %v624_v10 = vsub.f32 %v4244_v59, %v622_v8 }
 0x2b1   :  { %v732_v16 = vpop.xlane.xlu0 %731 }
 0x2b2   :  { %v4341_v13 = vpop.eup %3486  ;;  %v627_v14 = vmul.f32 1.442695, %v624_v10  ;;  %v736_v17 = vsub.f32 %v4249_v63, %v732_v16 }
 0x2b3   :  { %v629_v18 = vsel %vm520_vm5, %v4341_v13, 0.0 }
 0x2b4   :  { %3488 = vpow2.f32 %v627_v14  ;;  %630 = vadd.xlane.f32.xlu0 %v629_v18  ;;  %v738_v20 = vmul.f32 1.442695, %v736_v17 }
 0x2b6   :  { %3490 = vpow2.f32 %v738_v20 }
 0x2b7   :  { %v843_v24 = vpop.xlane.xlu2 %842 }
 0x2b8   :  { %v847_v53 = vsub.f32 %v4255_v5, %v843_v24 }
 0x2ba   :  { %v4347_v27 = vpop.eup %3488  ;;  %v849_v29 = vmul.f32 1.442695, %v847_v53  ;;  %v735_v59 = vpop.xlane.xlu1 %734 }
 0x2bb   :  { %v632_v30 = vsel %vm520_vm5, %v4347_v27, 0.0  ;;  %v737_v11 = vsub.f32 %v4264_v9, %v735_v59 }
 0x2bc   :  { %633 = vadd.xlane.f32.xlu2 %v632_v30  ;;  %v4352_v63 = vpop.eup %3490  ;;  %3492 = vpow2.f32 %v849_v29 }
 0x2bd   :  { %v740_v15 = vmul.f32 1.442695, %v737_v11  ;;  %v742_v32 = vsel %vm520_vm5, %v4352_v63, 0.0 }
 0x2be   :  { %743 = vadd.xlane.f32.xlu1 %v742_v32 }
 0x2bf   :  { %3494 = vpow2.f32 %v740_v15 }
 0x2c2   :  { %v4356_v5 = vpop.eup %3492  ;;  %v950_v33 = vpop.xlane.xlu2 %949 }
 0x2c3   :  { %v954_v37 = vsub.f32 %v4278_v26, %v950_v33  ;;  %v853_v9 = vsel %vm520_vm5, %v4356_v5, 0.0 }
 0x2c5   :  { %v4359_v38 = vpop.eup %3494  ;;  %v956_v39 = vmul.f32 1.442695, %v954_v37 }
 0x2c6   :  { %854 = vadd.xlane.f32.xlu1 %v853_v9  ;;  %v745_v43 = vsel %vm520_vm5, %v4359_v38, 0.0 }
 0x2c7   :  { %3496 = vpow2.f32 %v956_v39  ;;  %746 = vadd.xlane.f32.xlu0 %v745_v43  ;;  %v1046_v22 = vpop.xlane.xlu1 %1045 }
 0x2c8   :  { %v535_v35 = vpop.xlane.xlu0 %534 }
 0x2c9   :  { %3498 = vrcp.f32 %v535_v35 }
 0x2cd   :  { %v4365_v25 = vpop.eup %3496 }
 0x2ce   :  { %v960_v26 = vsel %vm520_vm5, %v4365_v25, 0.0 }
 0x2cf   :  { %v3499_v44 = vpop.eup %3498  ;;  %961 = vadd.xlane.f32.xlu1 %v960_v26 }
 0x2d0   :  { %v538_v45 = vpop.xlane.xlu2 %537  ;;  %v846_v46 = vpop.xlane.xlu0 %845  ;;  %v541_v19 = vmul.f32 %v3499_v44, %v4283_v28  ;;  %v1050_v28 = vsub.f32 %v4286_v34, %v1046_v22  ;;  %v3427_v34 = vpack.i.bf16 %v4231_v50, %v4233_v52 }
 0x2d1   :  { %3500 = vrcp.f32 %v538_v45  ;;  %v848_v47 = vsub.f32 %v4293_v40, %v846_v46 }
 0x2d2   :  { %3226 = vmatmul.msk.f32.vlgmr.msrb.gmra.mxu3 %vm520_vm5, %v541_v19  ;;  %v1052_v0 = vmul.f32 1.442695, %v1050_v28  ;;  %v1158_v1 = vpop.xlane.xlu1 %1157 }
 0x2d3   :  { %v851_v51 = vmul.f32 1.442695, %v848_v47  ;;  %990 = vmatpush.msrb.mxu3 %v4233_v52 }
 0x2d5   :  { %3502 = vpow2.f32 %v851_v51  ;;  %991 = vmatpush.msrb.mxu3 %v4231_v50 }
 0x2d7   :  { %v3501_v41 = vpop.eup %3500 }
 0x2d8   :  { %v953_v54 = vpop.xlane.xlu0 %952  ;;  %v542_v55 = vmul.f32 %v3501_v41, %v4300_v42  ;;  %v1162_v42 = vsub.f32 %v4310_v12, %v1158_v1  ;;  %v1049_v4 = vpop.xlane.xlu2 %1048 }
 0x2d9   :  { %v955_v56 = vsub.f32 %v4318_v36, %v953_v54  ;;  %v1051_v8 = vsub.f32 %v4315_v49, %v1049_v4 }
 0x2da   :  { %3227 = vmatmul.msk.f32.gmra.mxu3 %vm520_vm5, %v542_v55  ;;  %v1164_v6 = vmul.f32 1.442695, %v1162_v42  ;;  %v1161_v18 = vpop.xlane.xlu1 %1160 }
 0x2db   :  { %v4376_v58 = vpop.eup %3502  ;;  %v958_v40 = vmul.f32 1.442695, %v955_v56  ;;  %v1054_v12 = vmul.f32 1.442695, %v1051_v8  ;;  %v1163_v30 = vsub.f32 %v4325_v57, %v1161_v18 }
 0x2dc   :  { %v856_v61 = vsel %vm520_vm5, %v4376_v58, 0.0 }
 0x2dd   :  { %857 = vadd.xlane.f32.xlu2 %v856_v61  ;;  %3504 = vpow2.f32 %v958_v40  ;;  %v1166_v15 = vmul.f32 1.442695, %v1163_v30 }
 0x2de   :  { %3506 = vpow2.f32 %v1052_v0 }
 0x2df   :  { %3508 = vpow2.f32 %v1164_v6 }
 0x2e0   :  { %v1268_v14 = vpop.xlane.xlu2 %1267  ;;  %3510 = vpow2.f32 %v1054_v12 }
 0x2e1   :  { %v1272_v17 = vsub.f32 %v4330_v60, %v1268_v14 }
 0x2e2   :  { %v1271_v24 = vpop.xlane.xlu1 %1270 }
 0x2e3   :  { %v4382_v3 = vpop.eup %3504  ;;  %v1274_v52 = vmul.f32 1.442695, %v1272_v17  ;;  %v1273_v60 = vsub.f32 %v4335_v2, %v1271_v24 }
 0x2e4   :  { %v963_v36 = vsel %vm520_vm5, %v4382_v3, 0.0  ;;  %v4389_v7 = vpop.eup %3506 }
 0x2e5   :  { %964 = vadd.xlane.f32.xlu0 %v963_v36  ;;  %v1056_v10 = vsel %vm520_vm5, %v4389_v7, 0.0  ;;  %v4395_v16 = vpop.eup %3508  ;;  %3512 = vpow2.f32 %v1274_v52  ;;  %v1276_v59 = vmul.f32 1.442695, %v1273_v60 }
 0x2e6   :  { %v1168_v50 = vsel %vm520_vm5, %v4395_v16, 0.0  ;;  %v4401_v49 = vpop.eup %3510 }
 0x2e7   :  { %v1059_v20 = vsel %vm520_vm5, %v4401_v49, 0.0  ;;  %3514 = vpow2.f32 %v1276_v59 }
 0x2e8   :  { %3428 = vrot.lane.b32.xlu1 %v3427_v34, %s3801_s30  ;;  %3516 = vpow2.f32 %v1166_v15 }
 0x2eb   :  { %v4405_v53 = vpop.eup %3512 }
 0x2ec   :  { %v1278_v29 = vsel %vm520_vm5, %v4405_v53, 0.0 }
 0x2ed   :  { %1057 = vadd.xlane.f32.xlu0 %v1056_v10  ;;  %v4411_v11 = vpop.eup %3514 }
 0x2ee   :  { %v1281_v32 = vsel %vm520_vm5, %v4411_v11, 0.0  ;;  %v4415_v33 = vpop.eup %3516 }
 0x2ef   :  { %v1171_v2 = vsel %vm520_vm5, %v4415_v33, 0.0 }
 0x2f5   :  { %3423 = vrot.lane.b32.xlu2 %v3427_v34, %s3802_s15  ;;  %1169 = vadd.xlane.f32.xlu0 %v1168_v50 }
 0x2fd   :  { %1060 = vadd.xlane.f32.xlu0 %v1059_v20 }
 0x305   :  { %1279 = vadd.xlane.f32.xlu0 %v1278_v29 }
 0x312   :  { %1282 = vadd.xlane.f32.xlu1 %v1281_v32 }
 0x319   :  { %3433 = vrot.lane.b32.xlu0 %v3427_v34, %s3803_s28 }
 0x31e   :  { %1172 = vadd.xlane.f32.xlu2 %v1171_v2 }
 0x327   :  { %v631_v37 = vpop.xlane.xlu0 %630 }
 0x328   :  { %3518 = vrcp.f32 %v631_v37 }
 0x32e   :  { %v3519_v39 = vpop.eup %3518 }
 0x32f   :  { %v634_v57 = vpop.xlane.xlu2 %633  ;;  %v637_v9 = vmul.f32 %v3519_v39, %v4341_v13 }
 0x330   :  { %3520 = vrcp.f32 %v634_v57 }
 0x331   :  { %3232 = vmatmul.msk.f32.vlgmr.msrb.gmra.mxu1 %vm520_vm5, %v637_v9  ;;  %v744_v35 = vpop.xlane.xlu1 %743 }
 0x332   :  { %3522 = vrcp.f32 %v744_v35 }
 0x336   :  { %v3521_v43 = vpop.eup %3520 }
 0x337   :  { %v638_v44 = vmul.f32 %v3521_v43, %v4347_v27 }
 0x338   :  { %v3523_v45 = vpop.eup %3522 }
 0x339   :  { %3233 = vmatmul.msk.f32.gmra.mxu1 %vm520_vm5, %v638_v44  ;;  %v750_v46 = vmul.f32 %v3523_v45, %v4352_v63  ;;  %v855_v26 = vpop.xlane.xlu1 %854 }
 0x33a   :  { %3524 = vrcp.f32 %v855_v26  ;;  %v747_v47 = vpop.xlane.xlu0 %746  ;;  %v279_v26 = vld [vmem:[#allocation8 + $0x10] sm:$0xff] }
 0x33b   :  { %3526 = vrcp.f32 %v747_v47  ;;  %3238 = vmatmul.msk.f32.vlgmr.msra.gmra.mxu3 %vm520_vm5, %v750_v46  ;;  %v280_v46 = vld [vmem:[#allocation8 + $0x18] sm:$0xff] }
 0x33c   :  { %1361 = vmatpush.msra.mxu2 %v280_v46 }
 0x33e   :  { %1362 = vmatpush.msra.mxu2 %v279_v26  ;;  %v3468_v26 = vld [vmem:[%s5041_s8] ss:$0 sm:$0xff] }
 0x340   :  { %v3525_v13 = vpop.eup %3524 }
 0x341   :  { %v3527_v19 = vpop.eup %3526  ;;  %v861_v51 = vmul.f32 %v3525_v13, %v4356_v5  ;;  %v278_v13 = vld [vmem:[#allocation8 + $0x8] sm:$0xff] }
 0x342   :  { %v962_v41 = vpop.xlane.xlu1 %961  ;;  %v751_v54 = vmul.f32 %v3527_v19, %v4359_v38  ;;  %v277_v19 = vld [vmem:[#allocation8] sm:$0xff]  ;;  %1363 = vmatpush.msra.mxu2 %v278_v13 }
 0x343   :  { %3528 = vrcp.f32 %v962_v41  ;;  %3244 = vmatmul.msk.f32.vlgmr.msra.gmra.mxu1 %vm520_vm5, %v861_v51 }
 0x344   :  { %3239 = vmatmul.msk.f32.gmra.mxu3 %vm520_vm5, %v751_v54  ;;  %1364 = vmatpush.msra.mxu2 %v277_v19 }
 0x349   :  { %v3529_v27 = vpop.eup %3528 }
 0x34a   :  { %v968_v63 = vmul.f32 %v3529_v27, %v4365_v25 }
 0x34c   :  { %3250 = vmatmul.msk.f32.vlgmr.msrb.gmra.mxu3 %vm520_vm5, %v968_v63 }
 0x350   :  { %v858_v55 = vpop.xlane.xlu2 %857 }
 0x351   :  { %3530 = vrcp.f32 %v858_v55 }
 0x355   :  { %v566_v22 = vpop.f32.mrf.mxu3 }
 0x356   :  { %572 = vst.msk [vmem:[#allocation3] sm:$0xff] %vm480_vm15, %v566_v22 }
 0x357   :  { %v3531_v56 = vpop.eup %3530 }
 0x358   :  { %v3424_v5 = vpop.permute.xlu2 %3423  ;;  %v862_v40 = vmul.f32 %v3531_v56, %v4376_v58  ;;  %v965_v28 = vpop.xlane.xlu0 %964 }
 0x359   :  { %v3425_v38 = vunpack.i.l.bf16 %v3424_v5  ;;  %3532 = vrcp.f32 %v965_v28  ;;  %v3426_v61 = vunpack.i.h.bf16 %v3424_v5 }
 0x35a   :  { %3245 = vmatmul.msk.f32.gmra.mxu1 %vm520_vm5, %v862_v40  ;;  %v3429_v0 = vpop.permute.xlu1 %3428 }
 0x35b   :  { %1094 = vmatpush.msrb.mxu1 %v3425_v38  ;;  %v3430_v25 = vunpack.i.l.bf16 %v3429_v0  ;;  %v3431_v42 = vunpack.i.h.bf16 %v3429_v0 }
 0x35d   :  { %1095 = vmatpush.msrb.mxu1 %v3426_v61  ;;  %v569_v1 = vpop.f32.mrf.mxu3  ;;  %1204 = vmatpush.msra.mxu3 %v3430_v25 }
 0x35e   :  { %573 = vst.msk [vmem:[#allocation3 + $0x8] sm:$0xff] %vm480_vm15, %v569_v1 }
 0x35f   :  { %v3533_v36 = vpop.eup %3532  ;;  %1205 = vmatpush.msra.mxu3 %v3431_v42  ;;  %v3674_v42 = vld [vmem:[#allocation2] sm:$0xff] }
 0x360   :  { %v1058_v4 = vpop.xlane.xlu0 %1057  ;;  %v969_v58 = vmul.f32 %v3533_v36, %v4382_v3 }
 0x361   :  { %3534 = vrcp.f32 %v1058_v4 }
 0x362   :  { %3251 = vmatmul.msk.f32.gmra.mxu3 %vm520_vm5, %v969_v58 }
 0x367   :  { %v3535_v6 = vpop.eup %3534 }
 0x368   :  { %v1064_v34 = vmul.f32 %v3535_v6, %v4389_v7  ;;  %v1170_v8 = vpop.xlane.xlu0 %1169 }
 0x369   :  { %3536 = vrcp.f32 %v1170_v8 }
 0x36a   :  { %3256 = vmatmul.msk.f32.vlgmr.msrb.gmra.mxu1 %vm520_vm5, %v1064_v34  ;;  %v3675_v34 = vld [vmem:[#allocation2 + $0x8] sm:$0xff] }
 0x36f   :  { %v3537_v10 = vpop.eup %3536 }
 0x370   :  { %v1176_v12 = vmul.f32 %v3537_v10, %v4395_v16  ;;  %v1061_v14 = vpop.xlane.xlu0 %1060 }
 0x371   :  { %3538 = vrcp.f32 %v1061_v14 }
 0x372   :  { %3262 = vmatmul.msk.f32.vlgmr.msra.gmra.mxu3 %vm520_vm5, %v1176_v12 }
 0x377   :  { %v3539_v17 = vpop.eup %3538 }
 0x378   :  { %v1065_v3 = vmul.f32 %v3539_v17, %v4401_v49  ;;  %v1280_v18 = vpop.xlane.xlu0 %1279  ;;  %v3676_v17 = vld [vmem:[#allocation2 + $0x10] sm:$0xff] }
 0x379   :  { %3540 = vrcp.f32 %v1280_v18 }
 0x37a   :  { %3257 = vmatmul.msk.f32.gmra.mxu1 %vm520_vm5, %v1065_v3 }
 0x37f   :  { %v3541_v52 = vpop.eup %3540 }
 0x380   :  { %v1286_v16 = vmul.f32 %v3541_v52, %v4405_v53  ;;  %v3677_v52 = vld [vmem:[#allocation2 + $0x18] sm:$0xff] }
 0x385   :  { %v1283_v50 = vpop.xlane.xlu1 %1282 }
 0x386   :  { %3542 = vrcp.f32 %v1283_v50 }
 0x38b   :  { %v3434_v7 = vpop.permute.xlu0 %3433 }
 0x38c   :  { %v3435_v20 = vunpack.i.l.bf16 %v3434_v7  ;;  %v3436_v24 = vunpack.i.h.bf16 %v3434_v7  ;;  %v3543_v29 = vpop.eup %3542 }
 0x38d   :  { %v1287_v59 = vmul.f32 %v3543_v29, %v4411_v11  ;;  %v289_v29 = vld [vmem:[#allocation11 + $0x18] sm:$0xff] }
 0x38e   :  { %1314 = vmatpush.msra.mxu1 %v3435_v20  ;;  %1510 = vmatpush.msrb.mxu0 %v289_v29 }
 0x390   :  { %1315 = vmatpush.msra.mxu1 %v3436_v24 }
 0x391   :  { %v1173_v60 = vpop.xlane.xlu2 %1172  ;;  %3268 = vmatmul.msk.f32.vlgmr.msra.gmra.mxu1 %vm520_vm5, %v1286_v16 }
 0x392   :  { %3544 = vrcp.f32 %v1173_v60  ;;  %v285_v60 = vld [vmem:[#allocation9 + $0x18] sm:$0xff] }
 0x393   :  { %1481 = vmatpush.msrb.mxu3 %v285_v60 }
 0x398   :  { %v3545_v49 = vpop.eup %3544 }
 0x399   :  { %v1177_v30 = vmul.f32 %v3545_v49, %v4415_v33  ;;  %3269 = vmatmul.msk.f32.gmra.mxu1 %vm520_vm5, %v1287_v59  ;;  %v284_v49 = vld [vmem:[#allocation9 + $0x10] sm:$0xff] }
 0x39a   :  { %v288_v59 = vld [vmem:[#allocation11 + $0x10] sm:$0xff]  ;;  %1482 = vmatpush.msrb.mxu3 %v284_v49  ;;  %v297_v49 = vld [vmem:[%s5044_s11 + $0x38] sm:$0xff] }
 0x39b   :  { %3263 = vmatmul.msk.f32.gmra.mxu3 %vm520_vm5, %v1177_v30  ;;  %1511 = vmatpush.msrb.mxu0 %v288_v59  ;;  %v283_v30 = vld [vmem:[#allocation9 + $0x8] sm:$0xff]  ;;  %v296_v59 = vld [vmem:[%s5044_s11 + $0x30] sm:$0xff] }
 0x39c   :  { %1483 = vmatpush.msrb.mxu3 %v283_v30  ;;  %1632 = vmatpush.msrb.mxu1 %v297_v49  ;;  %v295_v30 = vld [vmem:[%s5044_s11 + $0x28] sm:$0xff] }
 0x39e   :  { %1633 = vmatpush.msrb.mxu1 %v296_v59 }
 0x3a0   :  { %1634 = vmatpush.msrb.mxu1 %v295_v30 }
 0x3ae   :  { %v670_v15 = vpop.f32.mrf.mxu1 }
 0x3af   :  { %678 = vrot.lane.b32.xlu0 %v670_v15, %s3796_s17  ;;  %v287_v15 = vld [vmem:[#allocation11 + $0x8] sm:$0xff] }
 0x3b0   :  { %1512 = vmatpush.msrb.mxu0 %v287_v15  ;;  %v294_v15 = vld [vmem:[%s5044_s11 + $0x20] sm:$0xff] }
 0x3b1   :  { %1635 = vmatpush.msrb.mxu1 %v294_v15 }
 0x3b6   :  { %v673_v32 = vpop.f32.mrf.mxu1 }
 0x3b7   :  { %680 = vrot.lane.b32.xlu2 %v673_v32, %s3796_s17  ;;  %v282_v32 = vld [vmem:[#allocation9] sm:$0xff] }
 0x3b8   :  { %1484 = vmatpush.msrb.mxu3 %v282_v32  ;;  %v293_v32 = vld [vmem:[%s5044_s11 + $0x18] sm:$0xff] }
 0x3b9   :  { %1636 = vmatpush.msrb.mxu1 %v293_v32 }
 0x3be   :  { %v781_v53 = vpop.f32.mrf.mxu3 }
 0x3bf   :  { %789 = vrot.lane.b32.xlu0 %v781_v53, %s3806_s1  ;;  %v286_v53 = vld [vmem:[#allocation11] sm:$0xff] }
 0x3c0   :  { %v892_v2 = vpop.f32.mrf.mxu1  ;;  %1513 = vmatpush.msrb.mxu0 %v286_v53  ;;  %v292_v53 = vld [vmem:[%s5044_s11 + $0x10] sm:$0xff] }
 0x3c1   :  { %1637 = vmatpush.msrb.mxu1 %v292_v53 }
 0x3c7   :  { %v784_v37 = vpop.f32.mrf.mxu3  ;;  %900 = vrot.lane.b32.xlu0 %v892_v2, %s3807_s26 }
 0x3cf   :  { %v993_v11 = vpop.f32.mrf.mxu3  ;;  %791 = vrot.lane.b32.xlu0 %v784_v37, %s3806_s1 }
 0x3d0   :  { %999 = vst.msk [vmem:[#allocation3 + $0x10] sm:$0xff] %vm480_vm15, %v993_v11 }
 0x3d7   :  { %v895_v33 = vpop.f32.mrf.mxu1 }
 0x3d8   :  { %902 = vrot.lane.b32.xlu0 %v895_v33, %s3807_s26 }
 0x3e5   :  { %v996_v39 = vpop.f32.mrf.mxu3 }
 0x3e6   :  { %1000 = vst.msk [vmem:[#allocation3 + $0x18] sm:$0xff] %vm480_vm15, %v996_v39 }
 0x3e7   :  { %v1097_v57 = vpop.f32.mrf.mxu1 }
 0x3e8   :  { %1105 = vrot.lane.b32.xlu1 %v1097_v57, %s3796_s17 }
 0x3f5   :  { %v1207_v9 = vpop.f32.mrf.mxu3 }
 0x3f6   :  { %1215 = vrot.lane.b32.xlu0 %v1207_v9, %s3806_s1 }
 0x3f7   :  { %v1100_v35 = vpop.f32.mrf.mxu1 }
 0x3fe   :  { %1107 = vrot.lane.b32.xlu0 %v1100_v35, %s3796_s17 }
 0x40e   :  { %v1317_v43 = vpop.f32.mrf.mxu1 }
 0x40f   :  { %1325 = vrot.lane.b32.xlu2 %v1317_v43, %s3807_s26 }
 0x411   :  { %v681_v44 = vpop.permute.xlu2 %680 }
 0x412   :  { %686 = vst.msk [vmem:[#allocation3 + $0x8] sm:$0xff] %vm684_vm12, %v681_v44 }
 0x416   :  { %v1320_v45 = vpop.f32.mrf.mxu1 }
 0x417   :  { %1327 = vrot.lane.b32.xlu0 %v1320_v45, %s3807_s26 }
 0x41e   :  { %v1210_v47 = vpop.f32.mrf.mxu3 }
 0x41f   :  { %1217 = vrot.lane.b32.xlu2 %v1210_v47, %s3806_s1 }
 0x421   :  { %v679_v51 = vpop.permute.xlu0 %678 }
 0x422   :  { %685 = vst.msk [vmem:[#allocation3] sm:$0xff] %vm684_vm12, %v679_v51 }
 0x431   :  { %v790_v41 = vpop.permute.xlu0 %789 }
 0x432   :  { %796 = vst.msk [vmem:[#allocation3] sm:$0xff] %vm795_vm13, %v790_v41 }
 0x439   :  { %v901_v54 = vpop.permute.xlu0 %900 }
 0x43a   :  { %907 = vst.msk [vmem:[#allocation3] sm:$0xff] %vm906_vm14, %v901_v54 }
 0x441   :  { %v792_v27 = vpop.permute.xlu0 %791  ;;  %v1333_v63 = vld [vmem:[#allocation3] sm:$0xff] }
 0x442   :  { %797 = vst.msk [vmem:[#allocation3 + $0x8] sm:$0xff] %vm795_vm13, %v792_v27  ;;  %3270 = vmatmul.msk.f32.vlgmr.msra.gmra.mxu2 %vm302_vm1, %v1333_v63 }
 0x44a   :  { %v903_v55 = vpop.permute.xlu0 %902 }
 0x44b   :  { %908 = vst.msk [vmem:[#allocation3 + $0x8] sm:$0xff] %vm906_vm14, %v903_v55 }
 0x452   :  { %v1334_v22 = vld [vmem:[#allocation3 + $0x8] sm:$0xff] }
 0x453   :  { %3271 = vmatmul.msk.f32.gmra.mxu2 %vm302_vm1, %v1334_v22 }
 0x45a   :  { %v1106_v56 = vpop.permute.xlu1 %1105 }
 0x45b   :  { %1111 = vst.msk [vmem:[#allocation3 + $0x10] sm:$0xff] %vm684_vm12, %v1106_v56 }
 0x468   :  { %v1216_v5 = vpop.permute.xlu0 %1215 }
 0x469   :  { %1221 = vst.msk [vmem:[#allocation3 + $0x10] sm:$0xff] %vm795_vm13, %v1216_v5  ;;  %v1326_v40 = vpop.permute.xlu2 %1325 }
 0x46a   :  { %1331 = vst.msk [vmem:[#allocation3 + $0x10] sm:$0xff] %vm906_vm14, %v1326_v40 }
 0x470   :  { %v1108_v38 = vpop.permute.xlu0 %1107 }
 0x471   :  { %1112 = vst.msk [vmem:[#allocation3 + $0x18] sm:$0xff] %vm684_vm12, %v1108_v38  ;;  %v1335_v28 = vld [vmem:[#allocation3 + $0x10] sm:$0xff] }
 0x472   :  { %3272 = vmatmul.msk.f32.gmra.mxu2 %vm302_vm1, %v1335_v28 }
 0x479   :  { %v1218_v61 = vpop.permute.xlu2 %1217 }
 0x47a   :  { %1222 = vst.msk [vmem:[#allocation3 + $0x18] sm:$0xff] %vm795_vm13, %v1218_v61 }
 0x489   :  { %v1328_v0 = vpop.permute.xlu0 %1327 }
 0x48a   :  { %1332 = vst.msk [vmem:[#allocation3 + $0x18] sm:$0xff] %vm906_vm14, %v1328_v0 }
 0x491   :  { %v1336_v25 = vld [vmem:[#allocation3 + $0x18] sm:$0xff] }
 0x492   :  { %3273 = vmatmul.msk.f32.gmra.mxu2 %vm302_vm1, %v1336_v25 }
 0x4c5   :  { %v1366_v1 = vpop.f32.mrf.mxu2 }
 0x4c6   :  { %v4480_v36 = vadd.f32 %v3674_v42, %v1366_v1 }
 0x4c8   :  { %v1382_v4 = vmul.f32 %v4480_v36, %v4480_v36 }
 0x4ca   :  { %v1386_v58 = vsel %vm302_vm1, %v1382_v4, 0.0 }
 0x4cb   :  { %1387 = vadd.xlane.f32.xlu1 %v1386_v58 }
 0x4d6   :  { %v1369_v6 = vpop.f32.mrf.mxu2 }
 0x4d7   :  { %v4485_v8 = vadd.f32 %v3675_v34, %v1369_v6 }
 0x4d9   :  { %v1383_v10 = vmul.f32 %v4485_v8, %v4485_v8 }
 0x4db   :  { %v1389_v12 = vsel %vm302_vm1, %v1383_v10, 0.0 }
 0x4dc   :  { %1390 = vadd.xlane.f32.xlu2 %v1389_v12 }
 0x4f5   :  { %v1372_v14 = vpop.f32.mrf.mxu2 }
 0x4f6   :  { %v4490_v3 = vadd.f32 %v3676_v17, %v1372_v14 }
 0x4f8   :  { %v1384_v18 = vmul.f32 %v4490_v3, %v4490_v3 }
 0x4fa   :  { %v1392_v50 = vsel %vm302_vm1, %v1384_v18, 0.0 }
 0x4fb   :  { %1393 = vadd.xlane.f32.xlu0 %v1392_v50 }
 0x515   :  { %v1375_v7 = vpop.f32.mrf.mxu2 }
 0x516   :  { %v4495_v20 = vadd.f32 %v3677_v52, %v1375_v7 }
 0x518   :  { %v1385_v24 = vmul.f32 %v4495_v20, %v4495_v20 }
 0x51a   :  { %v1395_v16 = vsel %vm302_vm1, %v1385_v24, 0.0 }
 0x51b   :  { %1396 = vadd.xlane.f32.xlu1 %v1395_v16 }
 0x53e   :  { %v1388_v2 = vpop.xlane.xlu1 %1387 }
 0x53f   :  { %v1398_v37 = vmul.f32 %v1388_v2, %v4096_v62  ;;  %v291_v2 = vld [vmem:[%s5044_s11 + $0x8] sm:$0xff] }
 0x540   :  { %1638 = vmatpush.msrb.mxu1 %v291_v2 }
 0x541   :  { %v1402_v11 = vadd.f32 1e-06, %v1398_v37 }
 0x543   :  { %3546 = vrsqrt.f32 %v1402_v11  ;;  %vm1412_vm2 = vweird.f32 %v1402_v11 }
 0x549   :  { %v3547_v33 = vpop.eup %3546 }
 0x54a   :  { %v1407_v39 = vmul.f32 %v3547_v33, %v1402_v11  ;;  %vm1413_vm0 = vweird.f32 %v3547_v33 }
 0x54b   :  { %vm1414_vm3 = vmor %vm1412_vm2, %vm1413_vm0 }
 0x54c   :  { %v1408_v57 = vmul.f32 %v3547_v33, %v1407_v39 }
 0x54e   :  { %v1409_v9 = vmul.f32 0.5, %v1408_v57 }
 0x54f   :  { %v1391_v35 = vpop.xlane.xlu2 %1390 }
 0x550   :  { %v1399_v43 = vmul.f32 %v1391_v35, %v4096_v62  ;;  %v1410_v44 = vsub.f32 1.5, %v1409_v9 }
 0x552   :  { %v1403_v45 = vadd.f32 1e-06, %v1399_v43  ;;  %v1411_v46 = vmul.f32 %v3547_v33, %v1410_v44 }
 0x554   :  { %3548 = vrsqrt.f32 %v1403_v45  ;;  %v1415_v47 = vsel %vm1414_vm3, %v3547_v33, %v1411_v46  ;;  %vm1422_vm6 = vweird.f32 %v1403_v45  ;;  %v290_v33 = vld [vmem:[%s5044_s11] sm:$0xff] }
 0x555   :  { %v1446_v13 = vmul.f32 %v1415_v47, %v4480_v36  ;;  %1639 = vmatpush.msrb.mxu1 %v290_v33 }
 0x557   :  { %v1453_v19 = vmul.f32 %v3468_v26, %v1446_v13 }
 0x559   :  { %3274 = vmatmul.msk.f32.vlgmr.msrb.gmra.mxu3 %vm302_vm1, %v1453_v19  ;;  %3278 = vmatmul.msk.f32.vlgmr.msrb.gmra.mxu0 %vm302_vm1, %v1453_v19 }
 0x55a   :  { %v3549_v51 = vpop.eup %3548 }
 0x55b   :  { %v1417_v41 = vmul.f32 %v3549_v51, %v1403_v45  ;;  %vm1423_vm4 = vweird.f32 %v3549_v51 }
 0x55c   :  { %vm1424_vm7 = vmor %vm1422_vm6, %vm1423_vm4 }
 0x55d   :  { %v1418_v54 = vmul.f32 %v3549_v51, %v1417_v41 }
 0x55f   :  { %v1419_v27 = vmul.f32 0.5, %v1418_v54 }
 0x561   :  { %v1420_v63 = vsub.f32 1.5, %v1419_v27 }
 0x563   :  { %v1421_v55 = vmul.f32 %v3549_v51, %v1420_v63 }
 0x565   :  { %v1425_v22 = vsel %vm1424_vm7, %v3549_v51, %v1421_v55 }
 0x566   :  { %v1447_v56 = vmul.f32 %v1425_v22, %v4485_v8 }
 0x568   :  { %v1454_v5 = vmul.f32 %v3468_v26, %v1447_v56 }
 0x56a   :  { %3275 = vmatmul.msk.f32.gmra.mxu3 %vm302_vm1, %v1454_v5  ;;  %3279 = vmatmul.msk.f32.gmra.mxu0 %vm302_vm1, %v1454_v5 }
 0x56e   :  { %v1394_v40 = vpop.xlane.xlu0 %1393 }
 0x56f   :  { %v1400_v38 = vmul.f32 %v1394_v40, %v4096_v62 }
 0x571   :  { %v1404_v28 = vadd.f32 1e-06, %v1400_v38 }
 0x573   :  { %3550 = vrsqrt.f32 %v1404_v28  ;;  %vm1432_vm9 = vweird.f32 %v1404_v28 }
 0x579   :  { %v3551_v61 = vpop.eup %3550 }
 0x57a   :  { %v1427_v0 = vmul.f32 %v3551_v61, %v1404_v28  ;;  %vm1433_vm8 = vweird.f32 %v3551_v61 }
 0x57b   :  { %vm1434_vm10 = vmor %vm1432_vm9, %vm1433_vm8  ;;  %vm1611_vm8 = vcmask 523264  }
 0x57c   :  { %v1428_v25 = vmul.f32 %v3551_v61, %v1427_v0 }
 0x57e   :  { %v1429_v1 = vmul.f32 0.5, %v1428_v25 }
 0x580   :  { %v1430_v42 = vsub.f32 1.5, %v1429_v1 }
 0x582   :  { %v1431_v4 = vmul.f32 %v3551_v61, %v1430_v42 }
 0x584   :  { %v1435_v58 = vsel %vm1434_vm10, %v3551_v61, %v1431_v4 }
 0x585   :  { %v1448_v6 = vmul.f32 %v1435_v58, %v4490_v3 }
 0x587   :  { %v1455_v34 = vmul.f32 %v3468_v26, %v1448_v6 }
 0x589   :  { %3276 = vmatmul.msk.f32.gmra.mxu3 %vm302_vm1, %v1455_v34  ;;  %3280 = vmatmul.msk.f32.gmra.mxu0 %vm302_vm1, %v1455_v34 }
 0x58e   :  { %v1397_v10 = vpop.xlane.xlu1 %1396 }
 0x58f   :  { %v1401_v12 = vmul.f32 %v1397_v10, %v4096_v62 }
 0x591   :  { %v1405_v14 = vadd.f32 1e-06, %v1401_v12 }
 0x593   :  { %3552 = vrsqrt.f32 %v1405_v14  ;;  %vm1442_vm0 = vweird.f32 %v1405_v14 }
 0x599   :  { %v3553_v17 = vpop.eup %3552 }
 0x59a   :  { %v1437_v18 = vmul.f32 %v3553_v17, %v1405_v14  ;;  %vm1443_vm11 = vweird.f32 %v3553_v17 }
 0x59b   :  { %vm1444_vm2 = vmor %vm1442_vm0, %vm1443_vm11 }
 0x59c   :  { %v1438_v50 = vmul.f32 %v3553_v17, %v1437_v18 }
 0x59e   :  { %v1439_v7 = vmul.f32 0.5, %v1438_v50 }
 0x5a0   :  { %v1440_v52 = vsub.f32 1.5, %v1439_v7 }
 0x5a2   :  { %v1441_v24 = vmul.f32 %v3553_v17, %v1440_v52 }
 0x5a4   :  { %v1445_v16 = vsel %vm1444_vm2, %v3553_v17, %v1441_v24 }
 0x5a5   :  { %v1449_v60 = vmul.f32 %v1445_v16, %v4495_v20 }
 0x5a7   :  { %v1456_v29 = vmul.f32 %v3468_v26, %v1449_v60 }
 0x5a9   :  { %3277 = vmatmul.msk.f32.gmra.mxu3 %vm302_vm1, %v1456_v29  ;;  %3281 = vmatmul.msk.f32.gmra.mxu0 %vm302_vm1, %v1456_v29 }
 0x5d6   :  { %v1515_v55 = vpop.f32.mrf.mxu0 }
 0x5dc   :  { %v1486_v37 = vpop.f32.mrf.mxu3 }
 0x5dd   :  { %v3282_v11 = vmul.f32 -1.442695, %v1486_v37 }
 0x5df   :  { %3554 = vpow2.f32 %v3282_v11 }
 0x5e5   :  { %v3555_v39 = vpop.eup %3554 }
 0x5e6   :  { %v1539_v57 = vadd.f32 1.0, %v3555_v39 }
 0x5e7   :  { %v1518_v58 = vpop.f32.mrf.mxu0 }
 0x5e8   :  { %3556 = vrcp.f32 %v1539_v57  ;;  %v1554_v46 = vand.u32 2147483648, %v1539_v57  ;;  %v1552_v47 = vand.u32 2147483647, %v1539_v57  ;;  %vm1548_vm4 = vweird.f32 %v1539_v57 }
 0x5ea   :  { %v1555_v51 = vor.u32 1.1754944e-38, %v1554_v46  ;;  %vm1553_vm7 = vcmp.eq.f32.partialorder %v1552_v47, 8.507059e+37 }
 0x5ed   :  { %v1489_v9 = vpop.f32.mrf.mxu3 }
 0x5ee   :  { %v3283_v35 = vmul.f32 -1.442695, %v1489_v9  ;;  %v3557_v43 = vpop.eup %3556 }
 0x5ef   :  { %v1544_v44 = vmul.f32 %v3557_v43, %v1539_v57  ;;  %vm1549_vm3 = vweird.f32 %v3557_v43 }
 0x5f0   :  { %3558 = vpow2.f32 %v3283_v35  ;;  %vm1550_vm6 = vmor %vm1548_vm4, %vm1549_vm3 }
 0x5f1   :  { %v1545_v45 = vsub.f32 1.0, %v1544_v44 }
 0x5f3   :  { %v1546_v26 = vmul.f32 %v3557_v43, %v1545_v45 }
 0x5f5   :  { %v1547_v19 = vadd.f32 %v3557_v43, %v1546_v26 }
 0x5f6   :  { %v3559_v13 = vpop.eup %3558 }
 0x5f7   :  { %v1540_v41 = vadd.f32 1.0, %v3559_v13  ;;  %v1551_v54 = vsel %vm1550_vm6, %v3557_v43, %v1547_v19 }
 0x5f8   :  { %v1556_v27 = vsel %vm1553_vm7, %v1555_v51, %v1551_v54 }
 0x5f9   :  { %3560 = vrcp.f32 %v1540_v41  ;;  %v1603_v63 = vmul.f32 %v1556_v27, %v1486_v37  ;;  %v1569_v38 = vand.u32 2147483648, %v1540_v41  ;;  %v1567_v61 = vand.u32 2147483647, %v1540_v41 }
 0x5fa   :  { %vm1563_vm10 = vweird.f32 %v1540_v41 }
 0x5fb   :  { %v1607_v22 = vmul.f32 %v1603_v63, %v1515_v55  ;;  %v1570_v25 = vor.u32 1.1754944e-38, %v1569_v38  ;;  %vm1568_vm0 = vcmp.eq.f32.partialorder %v1567_v61, 8.507059e+37 }
 0x5fd   :  { %3286 = vmatmul.msk.f32.vlgmr.msrb.gmra.mxu1 %vm1611_vm8, %v1607_v22 }
 0x5ff   :  { %v3561_v56 = vpop.eup %3560 }
 0x600   :  { %v1559_v5 = vmul.f32 %v3561_v56, %v1540_v41  ;;  %vm1564_vm9 = vweird.f32 %v3561_v56 }
 0x601   :  { %vm1565_vm11 = vmor %vm1563_vm10, %vm1564_vm9 }
 0x602   :  { %v1560_v40 = vsub.f32 1.0, %v1559_v5 }
 0x604   :  { %v1561_v28 = vmul.f32 %v3561_v56, %v1560_v40 }
 0x606   :  { %v1562_v0 = vadd.f32 %v3561_v56, %v1561_v28  ;;  %v1521_v30 = vpop.f32.mrf.mxu0 }
 0x608   :  { %v1566_v1 = vsel %vm1565_vm11, %v3561_v56, %v1562_v0  ;;  %v3298_v0 = vld [vmem:[%s5038_s5 + $0x38] sm:$0xff] }
 0x609   :  { %v1571_v42 = vsel %vm1568_vm0, %v1570_v25, %v1566_v1  ;;  %v3302_v25 = vld [vmem:[%s5039_s6 + $0x38] sm:$0xff]  ;;  %1828 = vmatpush.msra.mxu3 %v3298_v0  ;;  %v3297_v1 = vld [vmem:[%s5038_s5 + $0x30] sm:$0xff] }
 0x60a   :  { %v1604_v4 = vmul.f32 %v1571_v42, %v1489_v9  ;;  %1857 = vmatpush.msra.mxu0 %v3302_v25  ;;  %v3301_v42 = vld [vmem:[%s5039_s6 + $0x30] sm:$0xff] }
 0x60b   :  { %1829 = vmatpush.msra.mxu3 %v3297_v1 }
 0x60c   :  { %v1608_v6 = vmul.f32 %v1604_v4, %v1518_v58  ;;  %v1492_v34 = vpop.f32.mrf.mxu3  ;;  %1858 = vmatpush.msra.mxu0 %v3301_v42  ;;  %v3292_v4 = vld [vmem:[%s5037_s4 + $0x28] sm:$0xff] }
 0x60d   :  { %v3284_v10 = vmul.f32 -1.442695, %v1492_v34  ;;  %v3296_v58 = vld [vmem:[%s5038_s5 + $0x28] sm:$0xff] }
 0x60e   :  { %3287 = vmatmul.msk.f32.gmra.mxu1 %vm1611_vm8, %v1608_v6  ;;  %v3300_v6 = vld [vmem:[%s5039_s6 + $0x28] sm:$0xff]  ;;  %1830 = vmatpush.msra.mxu3 %v3296_v58 }
 0x60f   :  { %3562 = vpow2.f32 %v3284_v10  ;;  %1859 = vmatpush.msra.mxu0 %v3300_v6  ;;  %v3295_v10 = vld [vmem:[%s5038_s5 + $0x20] sm:$0xff] }
 0x610   :  { %1831 = vmatpush.msra.mxu3 %v3295_v10 }
 0x615   :  { %v3563_v12 = vpop.eup %3562 }
 0x616   :  { %v1541_v14 = vadd.f32 1.0, %v3563_v12  ;;  %v3299_v12 = vld [vmem:[%s5039_s6 + $0x20] sm:$0xff] }
 0x617   :  { %1860 = vmatpush.msra.mxu0 %v3299_v12 }
 0x618   :  { %3564 = vrcp.f32 %v1541_v14  ;;  %v1584_v7 = vand.u32 2147483648, %v1541_v14  ;;  %v1582_v24 = vand.u32 2147483647, %v1541_v14  ;;  %vm1578_vm3 = vweird.f32 %v1541_v14 }
 0x61a   :  { %v1585_v60 = vor.u32 1.1754944e-38, %v1584_v7  ;;  %vm1583_vm6 = vcmp.eq.f32.partialorder %v1582_v24, 8.507059e+37 }
 0x61e   :  { %v3565_v17 = vpop.eup %3564 }
 0x61f   :  { %v1574_v18 = vmul.f32 %v3565_v17, %v1541_v14  ;;  %vm1579_vm2 = vweird.f32 %v3565_v17 }
 0x620   :  { %vm1580_vm4 = vmor %vm1578_vm3, %vm1579_vm2 }
 0x621   :  { %v1575_v50 = vsub.f32 1.0, %v1574_v18 }
 0x623   :  { %v1576_v52 = vmul.f32 %v3565_v17, %v1575_v50 }
 0x625   :  { %v1577_v16 = vadd.f32 %v3565_v17, %v1576_v52 }
 0x626   :  { %v1524_v47 = vpop.f32.mrf.mxu0 }
 0x627   :  { %v1581_v29 = vsel %vm1580_vm4, %v3565_v17, %v1577_v16 }
 0x628   :  { %v1586_v49 = vsel %vm1583_vm6, %v1585_v60, %v1581_v29 }
 0x629   :  { %v1605_v59 = vmul.f32 %v1586_v49, %v1492_v34  ;;  %v3291_v34 = vld [vmem:[%s5037_s4 + $0x20] sm:$0xff] }
 0x62b   :  { %v1609_v15 = vmul.f32 %v1605_v59, %v1521_v30  ;;  %v3469_v30 = vld [vmem:[%s5036_s3 + $0x1] ss:$0 sm:$0xff] }
 0x62c   :  { %v1495_v32 = vpop.f32.mrf.mxu3 }
 0x62d   :  { %v3285_v53 = vmul.f32 -1.442695, %v1495_v32  ;;  %3288 = vmatmul.msk.f32.gmra.mxu1 %vm1611_vm8, %v1609_v15 }
 0x62f   :  { %3566 = vpow2.f32 %v3285_v53 }
 0x635   :  { %v3567_v2 = vpop.eup %3566 }
 0x636   :  { %v1542_v37 = vadd.f32 1.0, %v3567_v2 }
 0x638   :  { %3568 = vrcp.f32 %v1542_v37  ;;  %v1599_v57 = vand.u32 2147483648, %v1542_v37  ;;  %v1597_v35 = vand.u32 2147483647, %v1542_v37  ;;  %vm1593_vm9 = vweird.f32 %v1542_v37 }
 0x63a   :  { %v1600_v44 = vor.u32 1.1754944e-38, %v1599_v57  ;;  %vm1598_vm11 = vcmp.eq.f32.partialorder %v1597_v35, 8.507059e+37 }
 0x63e   :  { %v3569_v11 = vpop.eup %3568 }
 0x63f   :  { %v1589_v33 = vmul.f32 %v3569_v11, %v1542_v37  ;;  %vm1594_vm7 = vweird.f32 %v3569_v11 }
 0x640   :  { %vm1595_vm10 = vmor %vm1593_vm9, %vm1594_vm7 }
 0x641   :  { %v1590_v39 = vsub.f32 1.0, %v1589_v33 }
 0x643   :  { %v1591_v9 = vmul.f32 %v3569_v11, %v1590_v39 }
 0x645   :  { %v1592_v43 = vadd.f32 %v3569_v11, %v1591_v9 }
 0x647   :  { %v1596_v45 = vsel %vm1595_vm10, %v3569_v11, %v1592_v43 }
 0x648   :  { %v1601_v46 = vsel %vm1598_vm11, %v1600_v44, %v1596_v45 }
 0x649   :  { %v1606_v26 = vmul.f32 %v1601_v46, %v1495_v32 }
 0x64b   :  { %v1610_v13 = vmul.f32 %v1606_v26, %v1524_v47 }
 0x64d   :  { %3289 = vmatmul.msk.f32.gmra.mxu1 %vm1611_vm8, %v1610_v13 }
 0x67a   :  { %v1641_v19 = vpop.f32.mrf.mxu1 }
 0x67b   :  { %v4548_v51 = vadd.f32 %v1641_v19, %v4480_v36 }
 0x67d   :  { %v1700_v41 = vmul.f32 %v4548_v51, %v4548_v51 }
 0x67f   :  { %v1704_v54 = vsel %vm302_vm1, %v1700_v41, 0.0 }
 0x680   :  { %1705 = vadd.xlane.f32.xlu2 %v1704_v54 }
 0x68b   :  { %v1644_v27 = vpop.f32.mrf.mxu1 }
 0x68c   :  { %v4554_v63 = vadd.f32 %v1644_v27, %v4485_v8 }
 0x68e   :  { %v1701_v55 = vmul.f32 %v4554_v63, %v4554_v63 }
 0x690   :  { %v1707_v22 = vsel %vm302_vm1, %v1701_v55, 0.0 }
 0x691   :  { %1708 = vadd.xlane.f32.xlu0 %v1707_v22 }
 0x6aa   :  { %v1647_v56 = vpop.f32.mrf.mxu1 }
 0x6ab   :  { %v4560_v36 = vadd.f32 %v1647_v56, %v4490_v3  ;;  %v3294_v3 = vld [vmem:[%s5037_s4 + $0x38] sm:$0xff] }
 0x6ac   :  { %1799 = vmatpush.msrb.mxu2 %v3294_v3 }
 0x6ad   :  { %v1702_v5 = vmul.f32 %v4560_v36, %v4560_v36 }
 0x6af   :  { %v1710_v40 = vsel %vm302_vm1, %v1702_v5, 0.0 }
 0x6b0   :  { %1711 = vadd.xlane.f32.xlu1 %v1710_v40 }
 0x6ca   :  { %v1650_v38 = vpop.f32.mrf.mxu1 }
 0x6cb   :  { %v4566_v8 = vadd.f32 %v1650_v38, %v4495_v20  ;;  %v3293_v20 = vld [vmem:[%s5037_s4 + $0x30] sm:$0xff] }
 0x6cc   :  { %1800 = vmatpush.msrb.mxu2 %v3293_v20 }
 0x6cd   :  { %v1703_v28 = vmul.f32 %v4566_v8, %v4566_v8 }
 0x6ce   :  { %1801 = vmatpush.msrb.mxu2 %v3292_v4 }
 0x6cf   :  { %v1713_v61 = vsel %vm302_vm1, %v1703_v28, 0.0 }
 0x6d0   :  { %1714 = vadd.xlane.f32.xlu2 %v1713_v61  ;;  %1802 = vmatpush.msrb.mxu2 %v3291_v34 }
 0x6f3   :  { %v1706_v14 = vpop.xlane.xlu2 %1705 }
 0x6f4   :  { %v1716_v17 = vmul.f32 %v1706_v14, %v4096_v62 }
 0x6f6   :  { %v1720_v18 = vadd.f32 1e-06, %v1716_v17 }
 0x6f8   :  { %3570 = vrsqrt.f32 %v1720_v18  ;;  %vm1730_vm2 = vweird.f32 %v1720_v18 }
 0x6fe   :  { %v3571_v50 = vpop.eup %3570 }
 0x6ff   :  { %v1725_v7 = vmul.f32 %v3571_v50, %v1720_v18  ;;  %vm1731_vm0 = vweird.f32 %v3571_v50 }
 0x700   :  { %vm1732_vm3 = vmor %vm1730_vm2, %vm1731_vm0 }
 0x701   :  { %v1726_v52 = vmul.f32 %v3571_v50, %v1725_v7 }
 0x703   :  { %v1727_v24 = vmul.f32 0.5, %v1726_v52 }
 0x704   :  { %v1709_v16 = vpop.xlane.xlu0 %1708 }
 0x705   :  { %v1717_v60 = vmul.f32 %v1709_v16, %v4096_v62  ;;  %v1728_v29 = vsub.f32 1.5, %v1727_v24 }
 0x707   :  { %v1721_v49 = vadd.f32 1e-06, %v1717_v60  ;;  %v1729_v59 = vmul.f32 %v3571_v50, %v1728_v29 }
 0x709   :  { %3572 = vrsqrt.f32 %v1721_v49  ;;  %v1733_v15 = vsel %vm1732_vm3, %v3571_v50, %v1729_v59  ;;  %vm1740_vm6 = vweird.f32 %v1721_v49 }
 0x70a   :  { %v1764_v32 = vmul.f32 %v1733_v15, %v4548_v51 }
 0x70c   :  { %v1771_v53 = vmul.f32 %v3469_v30, %v1764_v32 }
 0x70e   :  { %3312 = vmatmul.msk.f32.vlgmr.msrb.gmra.mxu2 %vm302_vm1, %v1771_v53  ;;  %3316 = vmatmul.msk.f32.vlgmr.msra.gmra.mxu3 %vm302_vm1, %v1771_v53 }
 0x70f   :  { %v3573_v2 = vpop.eup %3572  ;;  %3320 = vmatmul.msk.f32.vlgmr.msra.gmra.mxu0 %vm302_vm1, %v1771_v53 }
 0x710   :  { %v1735_v37 = vmul.f32 %v3573_v2, %v1721_v49  ;;  %vm1741_vm4 = vweird.f32 %v3573_v2 }
 0x711   :  { %vm1742_vm7 = vmor %vm1740_vm6, %vm1741_vm4 }
 0x712   :  { %v1736_v11 = vmul.f32 %v3573_v2, %v1735_v37 }
 0x714   :  { %v1737_v33 = vmul.f32 0.5, %v1736_v11 }
 0x716   :  { %v1738_v39 = vsub.f32 1.5, %v1737_v33 }
 0x718   :  { %v1739_v57 = vmul.f32 %v3573_v2, %v1738_v39 }
 0x71a   :  { %v1743_v9 = vsel %vm1742_vm7, %v3573_v2, %v1739_v57 }
 0x71b   :  { %v1765_v35 = vmul.f32 %v1743_v9, %v4554_v63 }
 0x71d   :  { %v1772_v43 = vmul.f32 %v3469_v30, %v1765_v35 }
 0x71f   :  { %3313 = vmatmul.msk.f32.gmra.mxu2 %vm302_vm1, %v1772_v43  ;;  %3317 = vmatmul.msk.f32.gmra.mxu3 %vm302_vm1, %v1772_v43 }
 0x720   :  { %3321 = vmatmul.msk.f32.gmra.mxu0 %vm302_vm1, %v1772_v43 }
 0x723   :  { %v1712_v44 = vpop.xlane.xlu1 %1711 }
 0x724   :  { %v1718_v45 = vmul.f32 %v1712_v44, %v4096_v62 }
 0x726   :  { %v1722_v46 = vadd.f32 1e-06, %v1718_v45 }
 0x728   :  { %3574 = vrsqrt.f32 %v1722_v46  ;;  %vm1750_vm10 = vweird.f32 %v1722_v46 }
 0x72e   :  { %v3575_v26 = vpop.eup %3574 }
 0x72f   :  { %v1745_v47 = vmul.f32 %v3575_v26, %v1722_v46  ;;  %vm1751_vm9 = vweird.f32 %v3575_v26 }
 0x730   :  { %vm1752_vm11 = vmor %vm1750_vm10, %vm1751_vm9 }
 0x731   :  { %v1746_v13 = vmul.f32 %v3575_v26, %v1745_v47 }
 0x733   :  { %v1747_v19 = vmul.f32 0.5, %v1746_v13 }
 0x735   :  { %v1748_v41 = vsub.f32 1.5, %v1747_v19 }
 0x737   :  { %v1749_v54 = vmul.f32 %v3575_v26, %v1748_v41 }
 0x739   :  { %v1753_v27 = vsel %vm1752_vm11, %v3575_v26, %v1749_v54 }
 0x73a   :  { %v1766_v55 = vmul.f32 %v1753_v27, %v4560_v36 }
 0x73c   :  { %v1773_v22 = vmul.f32 %v3469_v30, %v1766_v55 }
 0x73e   :  { %3314 = vmatmul.msk.f32.gmra.mxu2 %vm302_vm1, %v1773_v22  ;;  %3318 = vmatmul.msk.f32.gmra.mxu3 %vm302_vm1, %v1773_v22 }
 0x73f   :  { %3322 = vmatmul.msk.f32.gmra.mxu0 %vm302_vm1, %v1773_v22 }
 0x743   :  { %v1715_v56 = vpop.xlane.xlu2 %1714 }
 0x744   :  { %v1719_v5 = vmul.f32 %v1715_v56, %v4096_v62 }
 0x746   :  { %v1723_v40 = vadd.f32 1e-06, %v1719_v5 }
 0x748   :  { %3576 = vrsqrt.f32 %v1723_v40  ;;  %vm1760_vm2 = vweird.f32 %v1723_v40 }
 0x74e   :  { %v3577_v38 = vpop.eup %3576 }
 0x74f   :  { %v1755_v28 = vmul.f32 %v3577_v38, %v1723_v40  ;;  %vm1761_vm0 = vweird.f32 %v3577_v38 }
 0x750   :  { %vm1762_vm3 = vmor %vm1760_vm2, %vm1761_vm0 }
 0x751   :  { %v1756_v61 = vmul.f32 %v3577_v38, %v1755_v28 }
 0x753   :  { %v1757_v3 = vmul.f32 0.5, %v1756_v61 }
 0x755   :  { %v1758_v0 = vsub.f32 1.5, %v1757_v3 }
 0x757   :  { %v1759_v25 = vmul.f32 %v3577_v38, %v1758_v0 }
 0x759   :  { %v1763_v20 = vsel %vm1762_vm3, %v3577_v38, %v1759_v25 }
 0x75a   :  { %v1767_v1 = vmul.f32 %v1763_v20, %v4566_v8 }
 0x75c   :  { %v1774_v42 = vmul.f32 %v3469_v30, %v1767_v1 }
 0x75e   :  { %3315 = vmatmul.msk.f32.gmra.mxu2 %vm302_vm1, %v1774_v42  ;;  %3319 = vmatmul.msk.f32.gmra.mxu3 %vm302_vm1, %v1774_v42 }
 0x75f   :  { %3323 = vmatmul.msk.f32.gmra.mxu0 %vm302_vm1, %v1774_v42 }
 0x78c   :  { %v1862_v6 = vpop.f32.mrf.mxu0 }
 0x791   :  { %v1804_v4 = vpop.f32.mrf.mxu2  ;;  %v1833_v58 = vpop.f32.mrf.mxu3 }
 0x792   :  { %1970 = vrot.lane.b32.xlu1 %v1833_v58, %s3802_s15  ;;  %1966 = vrot.lane.b32.xlu2 %v1804_v4, %s3802_s15 }
 0x79a   :  { %2192 = vrot.lane.b32.xlu1 %v1833_v58, %s3803_s28 }
 0x79d   :  { %v1865_v34 = vpop.f32.mrf.mxu0 }
 0x79e   :  { %v4633_v10 = vpack.i.bf16 %v1862_v6, %v1865_v34 }
 0x7a2   :  { %v1836_v12 = vpop.f32.mrf.mxu3  ;;  %2082 = vrot.lane.b32.xlu1 %v1833_v58, %s3801_s30  ;;  %v1807_v14 = vpop.f32.mrf.mxu2 }
 0x7a3   :  { %1972 = vrot.lane.b32.xlu0 %v1836_v12, %s3802_s15  ;;  %3324 = vmatpush.xpose.msk.msra.mxu1 %vm480_vm15, %v1836_v12 }
 0x7a4   :  { %2194 = vrot.lane.b32.xlu2 %v1836_v12, %s3803_s28 }
 0x7a7   :  { %3325 = vmatpush.xpose.msk.msra.mxu1 %vm480_vm15, %v1833_v58 }
 0x7aa   :  { %3326 = vmatmul.msk.f32.vlgmr.msra.gmra.mxu1 %vm480_vm15, %v1804_v4  ;;  %2078 = vrot.lane.b32.xlu1 %v1804_v4, %s3801_s30 }
 0x7ab   :  { %1955 = vmatpush.msrb.mxu1 %v1865_v34  ;;  %1968 = vrot.lane.b32.xlu0 %v1807_v14, %s3802_s15 }
 0x7ac   :  { %2084 = vrot.lane.b32.xlu2 %v1836_v12, %s3801_s30 }
 0x7ad   :  { %1956 = vmatpush.msrb.mxu1 %v1862_v6 }
 0x7b2   :  { %3327 = vmatmul.msk.f32.gmra.mxu1 %vm480_vm15, %v1807_v14  ;;  %2080 = vrot.lane.b32.xlu1 %v1807_v14, %s3801_s30 }
 0x7b3   :  { %2188 = vrot.lane.b32.xlu0 %v1804_v4, %s3803_s28 }
 0x7bb   :  { %2190 = vrot.lane.b32.xlu0 %v1807_v14, %s3803_s28 }
 0x7bc   :  { %v4702_v3 = vpop.f32.mrf.mxu0 }
 0x7c1   :  { %v1839_v17 = vpop.f32.mrf.mxu3  ;;  %v1810_v18 = vpop.f32.mrf.mxu2 }
 0x7c2   :  { %2616 = vrot.lane.b32.xlu1 %v1839_v17, %s3803_s28 }
 0x7c3   :  { %2394 = vrot.lane.b32.xlu0 %v1839_v17, %s3802_s15 }
 0x7ca   :  { %2506 = vrot.lane.b32.xlu1 %v1839_v17, %s3801_s30 }
 0x7dc   :  { %v4704_v0 = vpop.f32.mrf.mxu0 }
 0x7e1   :  { %v1813_v50 = vpop.f32.mrf.mxu2  ;;  %v1842_v7 = vpop.f32.mrf.mxu3 }
 0x7e2   :  { %2396 = vrot.lane.b32.xlu2 %v1842_v7, %s3802_s15  ;;  %2504 = vrot.lane.b32.xlu1 %v1813_v50, %s3801_s30 }
 0x7e3   :  { %2392 = vrot.lane.b32.xlu0 %v1813_v50, %s3802_s15 }
 0x7ea   :  { %2390 = vrot.lane.b32.xlu2 %v1810_v18, %s3802_s15  ;;  %3438 = vrot.lane.b32.xlu1 %v4633_v10, %s3802_s15 }
 0x7eb   :  { %2612 = vrot.lane.b32.xlu0 %v1810_v18, %s3803_s28 }
 0x7ec   :  { %v1967_v52 = vpop.permute.xlu2 %1966 }
 0x7f2   :  { %2618 = vrot.lane.b32.xlu2 %v1842_v7, %s3803_s28 }
 0x7f3   :  { %2614 = vrot.lane.b32.xlu0 %v1813_v50, %s3803_s28 }
 0x7fa   :  { %2508 = vrot.lane.b32.xlu2 %v1842_v7, %s3801_s30 }
 0x7fe   :  { %v2195_v24 = vpop.permute.xlu2 %2194 }
 0x802   :  { %2502 = vrot.lane.b32.xlu2 %v1810_v18, %s3801_s30 }
 0x804   :  { %v1971_v16 = vpop.permute.xlu1 %1970 }
 0x806   :  { %v2085_v60 = vpop.permute.xlu2 %2084 }
 0x807   :  { %3336 = vmatpush.xpose.msk.msrb.mxu0 %vm480_vm15, %v2085_v60 }
 0x80a   :  { %3443 = vrot.lane.b32.xlu2 %v4633_v10, %s3803_s28 }
 0x80c   :  { %v2193_v29 = vpop.permute.xlu1 %2192 }
 0x814   :  { %v2083_v59 = vpop.permute.xlu1 %2082 }
 0x815   :  { %v1973_v49 = vpop.permute.xlu0 %1972  ;;  %3337 = vmatpush.xpose.msk.msrb.mxu0 %vm480_vm15, %v2083_v59 }
 0x816   :  { %3330 = vmatpush.xpose.msk.msra.mxu2 %vm480_vm15, %v1973_v49 }
 0x819   :  { %3348 = vmatpush.xpose.msk.msra.mxu0 %vm480_vm15, %v1842_v7 }
 0x81a   :  { %3331 = vmatpush.xpose.msk.msra.mxu2 %vm480_vm15, %v1971_v16 }
 0x81c   :  { %v2079_v30 = vpop.permute.xlu1 %2078 }
 0x81d   :  { %3349 = vmatpush.xpose.msk.msra.mxu0 %vm480_vm15, %v1839_v17  ;;  %3332 = vmatmul.msk.f32.vlgmr.msra.gmra.mxu2 %vm480_vm15, %v1967_v52  ;;  %v1969_v15 = vpop.permute.xlu0 %1968 }
 0x81e   :  { %3342 = vmatpush.xpose.msk.msrb.mxu2 %vm480_vm15, %v2195_v24  ;;  %3338 = vmatmul.msk.f32.vlgmr.msrb.gmra.mxu0 %vm480_vm15, %v2079_v30 }
 0x822   :  { %3343 = vmatpush.xpose.msk.msrb.mxu2 %vm480_vm15, %v2193_v29 }
 0x824   :  { %v2081_v32 = vpop.permute.xlu1 %2080 }
 0x825   :  { %3333 = vmatmul.msk.f32.gmra.mxu2 %vm480_vm15, %v1969_v15  ;;  %v2189_v2 = vpop.permute.xlu0 %2188 }
 0x826   :  { %3339 = vmatmul.msk.f32.gmra.mxu0 %vm480_vm15, %v2081_v32 }
 0x827   :  { %v1903_v53 = vpop.f32.mrf.mxu1 }
 0x828   :  { %v1909_v37 = vmul.f32 0.35355338, %v1903_v53 }
 0x82a   :  { %v4678_v11 = vadd.f32 %v1909_v37, %v4197_v23 }
 0x82c   :  { %v1913_v57 = vsel %vm520_vm5, %v4678_v11, -inf }
 0x82d   :  { %3344 = vmatmul.msk.f32.vlgmr.msrb.gmra.mxu2 %vm480_vm15, %v2189_v2  ;;  %v2191_v35 = vpop.permute.xlu0 %2190 }
 0x82e   :  { %3350 = vmatmul.msk.f32.vlgmr.msra.gmra.mxu0 %vm480_vm15, %v1810_v18 }
 0x82f   :  { %v1906_v33 = vpop.f32.mrf.mxu1 }
 0x830   :  { %v1910_v39 = vmul.f32 0.35355338, %v1906_v33 }
 0x832   :  { %v4684_v9 = vadd.f32 %v1910_v39, %v4217_v31 }
 0x833   :  { %1914 = vmax.xlane.f32.xlu2 %v1913_v57 }
 0x834   :  { %v1916_v43 = vsel %vm520_vm5, %v4684_v9, -inf  ;;  %v2617_v46 = vpop.permute.xlu1 %2616 }
 0x835   :  { %1917 = vmax.xlane.f32.xlu0 %v1916_v43  ;;  %3345 = vmatmul.msk.f32.gmra.mxu2 %vm480_vm15, %v2191_v35  ;;  %v2395_v45 = vpop.permute.xlu0 %2394 }
 0x836   :  { %3351 = vmatmul.msk.f32.gmra.mxu0 %vm480_vm15, %v1813_v50 }
 0x83c   :  { %v2397_v44 = vpop.permute.xlu2 %2396  ;;  %v2507_v47 = vpop.permute.xlu1 %2506 }
 0x83d   :  { %3354 = vmatpush.xpose.msk.msra.mxu2 %vm480_vm15, %v2397_v44 }
 0x841   :  { %3355 = vmatpush.xpose.msk.msra.mxu2 %vm480_vm15, %v2395_v45 }
 0x844   :  { %v2391_v26 = vpop.permute.xlu2 %2390 }
 0x845   :  { %3356 = vmatmul.msk.f32.vlgmr.msra.gmra.mxu2 %vm480_vm15, %v2391_v26 }
 0x84c   :  { %v2619_v13 = vpop.permute.xlu2 %2618 }
 0x84d   :  { %3366 = vmatpush.xpose.msk.msrb.mxu2 %vm480_vm15, %v2619_v13 }
 0x851   :  { %3367 = vmatpush.xpose.msk.msrb.mxu2 %vm480_vm15, %v2617_v46 }
 0x854   :  { %v2505_v19 = vpop.permute.xlu1 %2504  ;;  %v2509_v41 = vpop.permute.xlu2 %2508 }
 0x855   :  { %v2393_v54 = vpop.permute.xlu0 %2392  ;;  %3360 = vmatpush.xpose.msk.msrb.mxu0 %vm480_vm15, %v2509_v41 }
 0x856   :  { %3357 = vmatmul.msk.f32.gmra.mxu2 %vm480_vm15, %v2393_v54 }
 0x859   :  { %3361 = vmatpush.xpose.msk.msrb.mxu0 %vm480_vm15, %v2507_v47 }
 0x85c   :  { %v3439_v27 = vpop.permute.xlu1 %3438  ;;  %v2503_v55 = vpop.permute.xlu2 %2502 }
 0x85d   :  { %v3440_v22 = vunpack.i.l.bf16 %v3439_v27  ;;  %v2613_v56 = vpop.permute.xlu0 %2612  ;;  %3362 = vmatmul.msk.f32.vlgmr.msrb.gmra.mxu0 %vm480_vm15, %v2503_v55  ;;  %v3441_v5 = vunpack.i.h.bf16 %v3439_v27 }
 0x85e   :  { %3368 = vmatmul.msk.f32.vlgmr.msrb.gmra.mxu2 %vm480_vm15, %v2613_v56 }
 0x85f   :  { %2059 = vmatpush.msrb.mxu3 %v3440_v22 }
 0x861   :  { %2060 = vmatpush.msrb.mxu3 %v3441_v5 }
 0x864   :  { %v3444_v40 = vpop.permute.xlu2 %3443 }
 0x865   :  { %v2615_v38 = vpop.permute.xlu0 %2614  ;;  %v3445_v28 = vunpack.i.l.bf16 %v3444_v40  ;;  %3363 = vmatmul.msk.f32.gmra.mxu0 %vm480_vm15, %v2505_v19  ;;  %v3446_v61 = vunpack.i.h.bf16 %v3444_v40 }
 0x866   :  { %3369 = vmatmul.msk.f32.gmra.mxu2 %vm480_vm15, %v2615_v38 }
 0x867   :  { %2279 = vmatpush.msra.mxu3 %v3445_v28 }
 0x869   :  { %2280 = vmatpush.msra.mxu3 %v3446_v61 }
 0x89b   :  { %v2111_v25 = vpop.f32.mrf.mxu0 }
 0x89c   :  { %v2117_v20 = vmul.f32 0.35355338, %v2111_v25 }
 0x89e   :  { %v4707_v1 = vadd.f32 %v2117_v20, %v4197_v23 }
 0x8a0   :  { %v1999_v42 = vpop.f32.mrf.mxu2  ;;  %v2121_v58 = vsel %vm520_vm5, %v4707_v1, -inf }
 0x8a1   :  { %v2005_v4 = vmul.f32 0.35355338, %v1999_v42  ;;  %2122 = vmax.xlane.f32.xlu1 %v2121_v58 }
 0x8a3   :  { %v4712_v6 = vadd.f32 %v2005_v4, %v4197_v23  ;;  %v2114_v34 = vpop.f32.mrf.mxu0 }
 0x8a4   :  { %v2118_v12 = vmul.f32 0.35355338, %v2114_v34 }
 0x8a5   :  { %v2009_v14 = vsel %vm520_vm5, %v4712_v6, -inf }
 0x8a6   :  { %v1915_v17 = vpop.xlane.xlu2 %1914  ;;  %2010 = vmax.xlane.f32.xlu0 %v2009_v14  ;;  %v4718_v50 = vadd.f32 %v2118_v12, %v4217_v31 }
 0x8a7   :  { %v1919_v18 = vsub.f32 %v4678_v11, %v1915_v17 }
 0x8a8   :  { %v1918_v7 = vpop.xlane.xlu0 %1917  ;;  %v2002_v52 = vpop.f32.mrf.mxu2  ;;  %v2124_v29 = vsel %vm520_vm5, %v4718_v50, -inf }
 0x8a9   :  { %v1921_v24 = vmul.f32 1.442695, %v1919_v18  ;;  %v1920_v16 = vsub.f32 %v4684_v9, %v1918_v7  ;;  %v2006_v60 = vmul.f32 0.35355338, %v2002_v52  ;;  %2125 = vmax.xlane.f32.xlu2 %v2124_v29 }
 0x8ab   :  { %3578 = vpow2.f32 %v1921_v24  ;;  %v4724_v49 = vadd.f32 %v2006_v60, %v4217_v31  ;;  %v1923_v59 = vmul.f32 1.442695, %v1920_v16  ;;  %v2327_v30 = vpop.f32.mrf.mxu0 }
 0x8ac   :  { %v2333_v15 = vmul.f32 0.35355338, %v2327_v30 }
 0x8ad   :  { %v2012_v32 = vsel %vm520_vm5, %v4724_v49, -inf  ;;  %3580 = vpow2.f32 %v1923_v59 }
 0x8ae   :  { %2013 = vmax.xlane.f32.xlu1 %v2012_v32  ;;  %v4729_v53 = vadd.f32 %v2333_v15, %v4275_v21 }
 0x8b0   :  { %v2221_v2 = vpop.f32.mrf.mxu2  ;;  %v2337_v11 = vsel %vm520_vm5, %v4729_v53, -inf }
 0x8b1   :  { %v4731_v37 = vpop.eup %3578  ;;  %v2227_v33 = vmul.f32 0.35355338, %v2221_v2  ;;  %2338 = vmax.xlane.f32.xlu0 %v2337_v11 }
 0x8b2   :  { %v1925_v39 = vsel %vm520_vm5, %v4731_v37, 0.0 }
 0x8b3   :  { %1926 = vadd.xlane.f32.xlu2 %v1925_v39  ;;  %v2330_v57 = vpop.f32.mrf.mxu0  ;;  %v4737_v35 = vpop.eup %3580  ;;  %v4740_v43 = vadd.f32 %v2227_v33, %v4197_v23 }
 0x8b4   :  { %v2334_v9 = vmul.f32 0.35355338, %v2330_v57  ;;  %v1928_v26 = vsel %vm520_vm5, %v4737_v35, 0.0 }
 0x8b5   :  { %v2231_v13 = vsel %vm520_vm5, %v4740_v43, -inf }
 0x8b6   :  { %v4743_v44 = vadd.f32 %v2334_v9, %v4307_v48 }
 0x8b8   :  { %v2224_v45 = vpop.f32.mrf.mxu2  ;;  %v2340_v47 = vsel %vm520_vm5, %v4743_v44, -inf }
 0x8b9   :  { %v2228_v46 = vmul.f32 0.35355338, %v2224_v45  ;;  %1929 = vadd.xlane.f32.xlu0 %v1928_v26  ;;  %2341 = vmax.xlane.f32.xlu1 %v2340_v47 }
 0x8bb   :  { %2232 = vmax.xlane.f32.xlu2 %v2231_v13  ;;  %v4752_v23 = vadd.f32 %v2228_v46, %v4217_v31 }
 0x8bd   :  { %v2234_v19 = vsel %vm520_vm5, %v4752_v23, -inf }
 0x8c1   :  { %2235 = vmax.xlane.f32.xlu0 %v2234_v19 }
 0x8c8   :  { %v2423_v41 = vpop.f32.mrf.mxu2 }
 0x8c9   :  { %v2429_v56 = vmul.f32 0.35355338, %v2423_v41 }
 0x8cb   :  { %v4762_v61 = vadd.f32 %v2429_v56, %v4275_v21 }
 0x8cd   :  { %v2433_v58 = vsel %vm520_vm5, %v4762_v61, -inf }
 0x8d9   :  { %v2426_v54 = vpop.f32.mrf.mxu2 }
 0x8da   :  { %v2535_v27 = vpop.f32.mrf.mxu0  ;;  %v2430_v4 = vmul.f32 0.35355338, %v2426_v54 }
 0x8db   :  { %v2541_v55 = vmul.f32 0.35355338, %v2535_v27 }
 0x8dd   :  { %v4757_v22 = vadd.f32 %v2541_v55, %v4275_v21 }
 0x8df   :  { %v2545_v5 = vsel %vm520_vm5, %v4757_v22, -inf }
 0x8e0   :  { %2546 = vmax.xlane.f32.xlu1 %v2545_v5 }
 0x8e1   :  { %v2645_v40 = vpop.f32.mrf.mxu2 }
 0x8e2   :  { %v2651_v38 = vmul.f32 0.35355338, %v2645_v40  ;;  %v2538_v31 = vpop.f32.mrf.mxu0 }
 0x8e3   :  { %v2542_v28 = vmul.f32 0.35355338, %v2538_v31 }
 0x8e4   :  { %v4765_v25 = vadd.f32 %v2651_v38, %v4275_v21  ;;  %v4777_v21 = vadd.f32 %v2430_v4, %v4307_v48 }
 0x8e5   :  { %v4768_v20 = vadd.f32 %v2542_v28, %v4307_v48 }
 0x8e6   :  { %v2655_v42 = vsel %vm520_vm5, %v4765_v25, -inf  ;;  %v2436_v7 = vsel %vm520_vm5, %v4777_v21, -inf }
 0x8e7   :  { %2656 = vmax.xlane.f32.xlu0 %v2655_v42  ;;  %v2548_v34 = vsel %vm520_vm5, %v4768_v20, -inf  ;;  %v3452_v42 = vpack.i.bf16 %v4702_v3, %v4704_v0 }
 0x8e8   :  { %2434 = vmax.xlane.f32.xlu1 %v2433_v58  ;;  %2549 = vmax.xlane.f32.xlu2 %v2548_v34 }
 0x8e9   :  { %v2648_v12 = vpop.f32.mrf.mxu2 }
 0x8ea   :  { %v2652_v14 = vmul.f32 0.35355338, %v2648_v12 }
 0x8ec   :  { %v4780_v17 = vadd.f32 %v2652_v14, %v4307_v48 }
 0x8ee   :  { %v2658_v18 = vsel %vm520_vm5, %v4780_v17, -inf }
 0x8ef   :  { %2659 = vmax.xlane.f32.xlu0 %v2658_v18 }
 0x8f0   :  { %2437 = vmax.xlane.f32.xlu2 %v2436_v7 }
 0x901   :  { %3448 = vrot.lane.b32.xlu1 %v4633_v10, %s3801_s30 }
 0x914   :  { %v2123_v52 = vpop.xlane.xlu1 %2122 }
 0x915   :  { %v2127_v24 = vsub.f32 %v4707_v1, %v2123_v52 }
 0x917   :  { %v2129_v16 = vmul.f32 1.442695, %v2127_v24 }
 0x919   :  { %v2011_v60 = vpop.xlane.xlu0 %2010  ;;  %3582 = vpow2.f32 %v2129_v16 }
 0x91a   :  { %v2015_v48 = vsub.f32 %v4712_v6, %v2011_v60 }
 0x91c   :  { %v2017_v29 = vmul.f32 1.442695, %v2015_v48  ;;  %v2126_v59 = vpop.xlane.xlu2 %2125 }
 0x91d   :  { %v2128_v30 = vsub.f32 %v4718_v50, %v2126_v59 }
 0x91e   :  { %3584 = vpow2.f32 %v2017_v29 }
 0x91f   :  { %v4791_v15 = vpop.eup %3582  ;;  %v2131_v32 = vmul.f32 1.442695, %v2128_v30 }
 0x920   :  { %v2133_v10 = vsel %vm520_vm5, %v4791_v15, 0.0 }
 0x921   :  { %v2014_v2 = vpop.xlane.xlu1 %2013  ;;  %3586 = vpow2.f32 %v2131_v32  ;;  %2134 = vadd.xlane.f32.xlu0 %v2133_v10 }
 0x922   :  { %v2016_v1 = vsub.f32 %v4724_v49, %v2014_v2 }
 0x924   :  { %v4796_v11 = vpop.eup %3584  ;;  %v2019_v33 = vmul.f32 1.442695, %v2016_v1  ;;  %v2339_v6 = vpop.xlane.xlu0 %2338 }
 0x925   :  { %v2021_v39 = vsel %vm520_vm5, %v4796_v11, 0.0  ;;  %v2343_v9 = vsub.f32 %v4729_v53, %v2339_v6 }
 0x926   :  { %v1927_v57 = vpop.xlane.xlu2 %1926  ;;  %2022 = vadd.xlane.f32.xlu2 %v2021_v39 }
 0x927   :  { %3588 = vrcp.f32 %v1927_v57  ;;  %v4800_v50 = vpop.eup %3586  ;;  %v2345_v49 = vmul.f32 1.442695, %v2343_v9 }
 0x928   :  { %3590 = vpow2.f32 %v2019_v33  ;;  %v2136_v45 = vsel %vm520_vm5, %v4800_v50, 0.0 }
 0x929   :  { %2137 = vadd.xlane.f32.xlu0 %v2136_v45 }
 0x92c   :  { %v1930_v26 = vpop.xlane.xlu0 %1929 }
 0x92d   :  { %v3589_v46 = vpop.eup %3588  ;;  %3592 = vrcp.f32 %v1930_v26 }
 0x92e   :  { %v4805_v47 = vpop.eup %3590  ;;  %v1933_v13 = vmul.f32 %v3589_v46, %v4731_v37  ;;  %v2233_v19 = vpop.xlane.xlu2 %2232  ;;  %3594 = vpow2.f32 %v2345_v49 }
 0x92f   :  { %v2237_v41 = vsub.f32 %v4740_v43, %v2233_v19  ;;  %v2024_v53 = vsel %vm520_vm5, %v4805_v47, 0.0 }
 0x930   :  { %3328 = vmatmul.msk.f32.vlgmr.msrb.gmra.mxu1 %vm520_vm5, %v1933_v13 }
 0x931   :  { %v2239_v54 = vmul.f32 1.442695, %v2237_v41  ;;  %2025 = vadd.xlane.f32.xlu0 %v2024_v53 }
 0x933   :  { %3596 = vpow2.f32 %v2239_v54  ;;  %v3593_v27 = vpop.eup %3592 }
 0x934   :  { %v2236_v55 = vpop.xlane.xlu0 %2235  ;;  %v1934_v56 = vmul.f32 %v3593_v27, %v4737_v35  ;;  %v4813_v5 = vpop.eup %3594 }
 0x935   :  { %v2238_v37 = vsub.f32 %v4752_v23, %v2236_v55  ;;  %v2349_v38 = vsel %vm520_vm5, %v4813_v5, 0.0  ;;  %v2342_v23 = vpop.xlane.xlu1 %2341 }
 0x936   :  { %v2344_v10 = vsub.f32 %v4743_v44, %v2342_v23 }
 0x937   :  { %v2241_v40 = vmul.f32 1.442695, %v2238_v37 }
 0x938   :  { %3329 = vmatmul.msk.f32.gmra.mxu1 %vm520_vm5, %v1934_v56 }
 0x939   :  { %v4817_v43 = vpop.eup %3596  ;;  %3598 = vpow2.f32 %v2241_v40  ;;  %2350 = vadd.xlane.f32.xlu0 %v2349_v38 }
 0x93a   :  { %v2243_v31 = vsel %vm520_vm5, %v4817_v43, 0.0 }
 0x93b   :  { %2244 = vadd.xlane.f32.xlu2 %v2243_v31 }
 0x93f   :  { %v4823_v28 = vpop.eup %3598 }
 0x940   :  { %v2246_v35 = vsel %vm520_vm5, %v4823_v28, 0.0 }
 0x941   :  { %2247 = vadd.xlane.f32.xlu0 %v2246_v35 }
 0x953   :  { %v2547_v4 = vpop.xlane.xlu1 %2546  ;;  %3453 = vrot.lane.b32.xlu2 %v3452_v42, %s3802_s15 }
 0x954   :  { %v2551_v58 = vsub.f32 %v4757_v22, %v2547_v4 }
 0x956   :  { %v2553_v34 = vmul.f32 1.442695, %v2551_v58 }
 0x958   :  { %3600 = vpow2.f32 %v2553_v34 }
 0x95a   :  { %v2657_v12 = vpop.xlane.xlu0 %2656 }
 0x95b   :  { %v2435_v14 = vpop.xlane.xlu1 %2434  ;;  %v4831_v18 = vpop.xlane.xlu2 %2549  ;;  %v2661_v32 = vsub.f32 %v4765_v25, %v2657_v12 }
 0x95c   :  { %v2439_v7 = vsub.f32 %v4762_v61, %v2435_v14  ;;  %v2552_v27 = vsub.f32 %v4768_v20, %v4831_v18 }
 0x95d   :  { %v2663_v1 = vmul.f32 1.442695, %v2661_v32 }
 0x95e   :  { %v4834_v52 = vpop.eup %3600  ;;  %v2441_v24 = vmul.f32 1.442695, %v2439_v7 }
 0x95f   :  { %v2557_v16 = vsel %vm520_vm5, %v4834_v52, 0.0 }
 0x960   :  { %3602 = vpow2.f32 %v2441_v24  ;;  %2558 = vadd.xlane.f32.xlu0 %v2557_v16 }
 0x962   :  { %v2660_v60 = vpop.xlane.xlu0 %2659 }
 0x963   :  { %v2662_v48 = vsub.f32 %v4780_v17, %v2660_v60  ;;  %v2438_v22 = vpop.xlane.xlu2 %2437 }
 0x964   :  { %v2440_v29 = vsub.f32 %v4777_v21, %v2438_v22  ;;  %v2347_v21 = vmul.f32 1.442695, %v2344_v10 }
 0x965   :  { %v2665_v59 = vmul.f32 1.442695, %v2662_v48 }
 0x966   :  { %v4840_v30 = vpop.eup %3602  ;;  %v2443_v61 = vmul.f32 1.442695, %v2440_v29 }
 0x967   :  { %3604 = vpow2.f32 %v2665_v59  ;;  %v2445_v2 = vsel %vm520_vm5, %v4840_v30, 0.0 }
 0x968   :  { %3606 = vpow2.f32 %v2443_v61  ;;  %2446 = vadd.xlane.f32.xlu1 %v2445_v2 }
 0x969   :  { %3608 = vpow2.f32 %v2663_v1 }
 0x96a   :  { %3610 = vpow2.f32 %v2347_v21 }
 0x96d   :  { %v4846_v33 = vpop.eup %3604 }
 0x96e   :  { %v4848_v17 = vpop.eup %3606  ;;  %v2670_v6 = vsel %vm520_vm5, %v4846_v33, 0.0 }
 0x96f   :  { %v2448_v25 = vsel %vm520_vm5, %v4848_v17, 0.0  ;;  %v4854_v57 = vpop.eup %3608 }
 0x970   :  { %2671 = vadd.xlane.f32.xlu1 %v2670_v6  ;;  %2449 = vadd.xlane.f32.xlu0 %v2448_v25  ;;  %v2667_v45 = vsel %vm520_vm5, %v4854_v57, 0.0  ;;  %v4858_v49 = vpop.eup %3610 }
 0x971   :  { %v2352_v46 = vsel %vm520_vm5, %v4858_v49, 0.0 }
 0x973   :  { %v3449_v39 = vpop.permute.xlu1 %3448 }
 0x974   :  { %v3450_v44 = vunpack.i.l.bf16 %v3449_v39  ;;  %v3451_v9 = vunpack.i.h.bf16 %v3449_v39 }
 0x976   :  { %2169 = vmatpush.msra.mxu1 %v3450_v44 }
 0x978   :  { %2170 = vmatpush.msra.mxu1 %v3451_v9  ;;  %2668 = vadd.xlane.f32.xlu0 %v2667_v45 }
 0x97a   :  { %2379 = vmatpush.msrb.mxu1 %v4704_v0 }
 0x97c   :  { %2380 = vmatpush.msrb.mxu1 %v4702_v3  ;;  %2353 = vadd.xlane.f32.xlu2 %v2352_v46 }
 0x989   :  { %3463 = vrot.lane.b32.xlu1 %v3452_v42, %s3801_s30 }
 0x98c   :  { %3458 = vrot.lane.b32.xlu0 %v3452_v42, %s3803_s28 }
 0x994   :  { %v2135_v26 = vpop.xlane.xlu0 %2134 }
 0x995   :  { %3612 = vrcp.f32 %v2135_v26 }
 0x999   :  { %v2023_v13 = vpop.xlane.xlu2 %2022 }
 0x99a   :  { %3614 = vrcp.f32 %v2023_v13 }
 0x99b   :  { %v3613_v19 = vpop.eup %3612 }
 0x99c   :  { %v2141_v41 = vmul.f32 %v3613_v19, %v4791_v15  ;;  %v2138_v54 = vpop.xlane.xlu0 %2137  ;;  %v2555_v15 = vmul.f32 1.442695, %v2552_v27 }
 0x99d   :  { %3616 = vrcp.f32 %v2138_v54 }
 0x99e   :  { %3340 = vmatmul.msk.f32.vlgmr.msra.gmra.mxu1 %vm520_vm5, %v2141_v41 }
 0x9a0   :  { %v3615_v3 = vpop.eup %3614 }
 0x9a1   :  { %v2029_v0 = vmul.f32 %v3615_v3, %v4796_v11 }
 0x9a3   :  { %3334 = vmatmul.msk.f32.vlgmr.msrb.gmra.mxu3 %vm520_vm5, %v2029_v0  ;;  %v3617_v53 = vpop.eup %3616 }
 0x9a4   :  { %v2026_v55 = vpop.xlane.xlu0 %2025  ;;  %v2142_v56 = vmul.f32 %v3617_v53, %v4800_v50 }
 0x9a5   :  { %3618 = vrcp.f32 %v2026_v55 }
 0x9a6   :  { %3341 = vmatmul.msk.f32.gmra.mxu1 %vm520_vm5, %v2142_v56  ;;  %3620 = vpow2.f32 %v2555_v15 }
 0x9ab   :  { %v3619_v37 = vpop.eup %3618 }
 0x9ac   :  { %v2351_v40 = vpop.xlane.xlu0 %2350  ;;  %v2030_v31 = vmul.f32 %v3619_v37, %v4805_v47  ;;  %v4877_v20 = vpop.eup %3620 }
 0x9ad   :  { %v1958_v38 = vpop.f32.mrf.mxu1  ;;  %3622 = vrcp.f32 %v2351_v40  ;;  %v2560_v58 = vsel %vm520_vm5, %v4877_v20, 0.0 }
 0x9ae   :  { %1964 = vst.msk [vmem:[#allocation3] sm:$0xff] %vm480_vm15, %v1958_v38  ;;  %v2245_v11 = vpop.xlane.xlu2 %2244  ;;  %3335 = vmatmul.msk.f32.gmra.mxu3 %vm520_vm5, %v2030_v31  ;;  %v1678_v38 = vld [vmem:[#allocation8 + $0x38] sm:$0xff]  ;;  %v1677_v31 = vld [vmem:[#allocation8 + $0x30] sm:$0xff] }
 0x9af   :  { %3624 = vrcp.f32 %v2245_v11  ;;  %2750 = vmatpush.msra.mxu0 %v1678_v38  ;;  %v1676_v11 = vld [vmem:[#allocation8 + $0x28] sm:$0xff] }
 0x9b1   :  { %2751 = vmatpush.msra.mxu0 %v1677_v31 }
 0x9b3   :  { %v3623_v50 = vpop.eup %3622  ;;  %2752 = vmatpush.msra.mxu0 %v1676_v11 }
 0x9b4   :  { %v2357_v23 = vmul.f32 %v3623_v50, %v4813_v5  ;;  %v2248_v42 = vpop.xlane.xlu0 %2247 }
 0x9b5   :  { %v3625_v35 = vpop.eup %3624  ;;  %v1961_v4 = vpop.f32.mrf.mxu1  ;;  %3626 = vrcp.f32 %v2248_v42 }
 0x9b6   :  { %v2251_v47 = vmul.f32 %v3625_v35, %v4817_v43  ;;  %1965 = vst.msk [vmem:[#allocation3 + $0x8] sm:$0xff] %vm480_vm15, %v1961_v4  ;;  %2561 = vadd.xlane.f32.xlu0 %v2560_v58  ;;  %v3454_v34 = vpop.permute.xlu2 %3453  ;;  %3352 = vmatmul.msk.f32.vlgmr.msrb.gmra.mxu1 %vm520_vm5, %v2357_v23 }
 0x9b7   :  { %v3455_v12 = vunpack.i.l.bf16 %v3454_v34  ;;  %v3456_v14 = vunpack.i.h.bf16 %v3454_v34 }
 0x9b8   :  { %3346 = vmatmul.msk.f32.vlgmr.msra.gmra.mxu3 %vm520_vm5, %v2251_v47 }
 0x9b9   :  { %2483 = vmatpush.msrb.mxu3 %v3455_v12 }
 0x9bb   :  { %2484 = vmatpush.msrb.mxu3 %v3456_v14  ;;  %v3627_v5 = vpop.eup %3626 }
 0x9bc   :  { %v2252_v18 = vmul.f32 %v3627_v5, %v4823_v28 }
 0x9c0   :  { %3347 = vmatmul.msk.f32.gmra.mxu3 %vm520_vm5, %v2252_v18 }
 0x9d3   :  { %v2559_v7 = vpop.xlane.xlu0 %2558 }
 0x9db   :  { %v2447_v43 = vpop.xlane.xlu1 %2446 }
 0x9dc   :  { %3628 = vrcp.f32 %v2447_v43 }
 0x9e2   :  { %v3629_v24 = vpop.eup %3628 }
 0x9e3   :  { %v2453_v16 = vmul.f32 %v3629_v24, %v4840_v30  ;;  %v2450_v60 = vpop.xlane.xlu0 %2449  ;;  %v2672_v28 = vpop.xlane.xlu1 %2671 }
 0x9e4   :  { %3630 = vrcp.f32 %v2450_v60 }
 0x9e5   :  { %3358 = vmatmul.msk.f32.vlgmr.msrb.gmra.mxu3 %vm520_vm5, %v2453_v16 }
 0x9ea   :  { %v3631_v48 = vpop.eup %3630 }
 0x9eb   :  { %v2454_v22 = vmul.f32 %v3631_v48, %v4848_v17  ;;  %v2669_v32 = vpop.xlane.xlu0 %2668 }
 0x9ed   :  { %3359 = vmatmul.msk.f32.gmra.mxu3 %vm520_vm5, %v2454_v22 }
 0x9ef   :  { %v2354_v29 = vpop.xlane.xlu2 %2353 }
 0x9f0   :  { %3632 = vrcp.f32 %v2354_v29 }
 0x9f1   :  { %3634 = vrcp.f32 %v2559_v7 }
 0x9f2   :  { %3636 = vrcp.f32 %v2669_v32 }
 0x9f3   :  { %3638 = vrcp.f32 %v2672_v28 }
 0x9f6   :  { %v3633_v59 = vpop.eup %3632 }
 0x9f7   :  { %v2358_v61 = vmul.f32 %v3633_v59, %v4858_v49  ;;  %v3635_v2 = vpop.eup %3634 }
 0x9f8   :  { %v3637_v17 = vpop.eup %3636  ;;  %v2565_v6 = vmul.f32 %v3635_v2, %v4834_v52 }
 0x9f9   :  { %3353 = vmatmul.msk.f32.gmra.mxu1 %vm520_vm5, %v2358_v61  ;;  %v2675_v44 = vmul.f32 %v3637_v17, %v4854_v57  ;;  %v3639_v9 = vpop.eup %3638  ;;  %v1690_v17 = vld [vmem:[#allocation11 + $0x38] sm:$0xff] }
 0x9fa   :  { %v2676_v45 = vmul.f32 %v3639_v9, %v4846_v33  ;;  %2899 = vmatpush.msra.mxu2 %v1690_v17  ;;  %v3308_v17 = vld [vmem:[%s5044_s11 + $0x60] sm:$0xff] }
 0x9fb   :  { %v3464_v30 = vpop.permute.xlu1 %3463 }
 0x9fc   :  { %v3465_v10 = vunpack.i.l.bf16 %v3464_v30  ;;  %v3466_v1 = vunpack.i.h.bf16 %v3464_v30 }
 0x9fe   :  { %2593 = vmatpush.msra.mxu1 %v3465_v10  ;;  %v3459_v21 = vpop.permute.xlu0 %3458 }
 0x9ff   :  { %v3460_v25 = vunpack.i.l.bf16 %v3459_v21  ;;  %v3461_v39 = vunpack.i.h.bf16 %v3459_v21  ;;  %v1685_v21 = vld [vmem:[#allocation9 + $0x38] sm:$0xff] }
 0xa00   :  { %2594 = vmatpush.msra.mxu1 %v3466_v1 }
 0xa01   :  { %3364 = vmatmul.msk.f32.vlgmr.msra.gmra.mxu1 %vm520_vm5, %v2565_v6  ;;  %2703 = vmatpush.msra.mxu3 %v3460_v25  ;;  %v1689_v6 = vld [vmem:[#allocation11 + $0x30] sm:$0xff]  ;;  %v1683_v25 = vld [vmem:[#allocation9 + $0x28] sm:$0xff] }
 0xa02   :  { %2870 = vmatpush.msrb.mxu1 %v1685_v21  ;;  %2900 = vmatpush.msra.mxu2 %v1689_v6  ;;  %v3309_v21 = vld [vmem:[%s5044_s11 + $0x68] sm:$0xff]  ;;  %v3306_v6 = vld [vmem:[%s5044_s11 + $0x50] sm:$0xff] }
 0xa03   :  { %2704 = vmatpush.msra.mxu3 %v3461_v39  ;;  %v1688_v39 = vld [vmem:[#allocation11 + $0x28] sm:$0xff] }
 0xa04   :  { %3370 = vmatmul.msk.f32.vlgmr.msra.gmra.mxu3 %vm520_vm5, %v2675_v44  ;;  %2901 = vmatpush.msra.mxu2 %v1688_v39  ;;  %v1687_v44 = vld [vmem:[#allocation11 + $0x20] sm:$0xff] }
 0xa06   :  { %2902 = vmatpush.msra.mxu2 %v1687_v44 }
 0xa0c   :  { %3371 = vmatmul.msk.f32.gmra.mxu3 %vm520_vm5, %v2676_v45 }
 0xa1b   :  { %v2172_v49 = vpop.f32.mrf.mxu1 }
 0xa1c   :  { %2180 = vrot.lane.b32.xlu1 %v2172_v49, %s3806_s1 }
 0xa23   :  { %v2175_v52 = vpop.f32.mrf.mxu1 }
 0xa24   :  { %2182 = vrot.lane.b32.xlu1 %v2175_v52, %s3806_s1 }
 0xa26   :  { %v2062_v46 = vpop.f32.mrf.mxu3 }
 0xa27   :  { %2070 = vrot.lane.b32.xlu2 %v2062_v46, %s3796_s17 }
 0xa29   :  { %v2562_v26 = vpop.xlane.xlu0 %2561 }
 0xa2a   :  { %3640 = vrcp.f32 %v2562_v26 }
 0xa30   :  { %v3641_v57 = vpop.eup %3640 }
 0xa31   :  { %v2566_v13 = vmul.f32 %v3641_v57, %v4877_v20  ;;  %v2065_v19 = vpop.f32.mrf.mxu3  ;;  %v1675_v20 = vld [vmem:[#allocation8 + $0x20] sm:$0xff] }
 0xa32   :  { %2072 = vrot.lane.b32.xlu2 %v2065_v19, %s3796_s17  ;;  %2753 = vmatpush.msra.mxu0 %v1675_v20 }
 0xa33   :  { %3365 = vmatmul.msk.f32.gmra.mxu1 %vm520_vm5, %v2566_v13  ;;  %v2382_v33 = vpop.f32.mrf.mxu1 }
 0xa34   :  { %2388 = vst.msk [vmem:[#allocation3 + $0x10] sm:$0xff] %vm480_vm15, %v2382_v33 }
 0xa3b   :  { %v2282_v41 = vpop.f32.mrf.mxu3 }
 0xa3c   :  { %2290 = vrot.lane.b32.xlu1 %v2282_v41, %s3807_s26 }
 0xa43   :  { %v2285_v54 = vpop.f32.mrf.mxu3 }
 0xa44   :  { %2292 = vrot.lane.b32.xlu2 %v2285_v54, %s3807_s26 }
 0xa68   :  { %v2486_v3 = vpop.f32.mrf.mxu3 }
 0xa69   :  { %2494 = vrot.lane.b32.xlu1 %v2486_v3, %s3796_s17 }
 0xa70   :  { %v2489_v0 = vpop.f32.mrf.mxu3 }
 0xa71   :  { %2496 = vrot.lane.b32.xlu1 %v2489_v0, %s3796_s17 }
 0xa76   :  { %v2385_v53 = vpop.f32.mrf.mxu1 }
 0xa77   :  { %2389 = vst.msk [vmem:[#allocation3 + $0x18] sm:$0xff] %vm480_vm15, %v2385_v53  ;;  %v3470_v53 = vld [vmem:[%s5041_s8 + $0x1] ss:$0 sm:$0xff] }
 0xa7e   :  { %v2596_v27 = vpop.f32.mrf.mxu1 }
 0xa7f   :  { %2604 = vrot.lane.b32.xlu0 %v2596_v27, %s3806_s1 }
 0xa81   :  { %v2071_v55 = vpop.permute.xlu2 %2070 }
 0xa82   :  { %2076 = vst.msk [vmem:[#allocation3] sm:$0xff] %vm684_vm12, %v2071_v55 }
 0xa87   :  { %v2706_v56 = vpop.f32.mrf.mxu3 }
 0xa88   :  { %2714 = vrot.lane.b32.xlu2 %v2706_v56, %s3807_s26 }
 0xa8c   :  { %v2073_v15 = vpop.permute.xlu2 %2072 }
 0xa8d   :  { %2077 = vst.msk [vmem:[#allocation3 + $0x8] sm:$0xff] %vm684_vm12, %v2073_v15 }
 0xa8e   :  { %v2181_v37 = vpop.permute.xlu1 %2180 }
 0xa8f   :  { %v2709_v40 = vpop.f32.mrf.mxu3  ;;  %2186 = vst.msk [vmem:[#allocation3] sm:$0xff] %vm795_vm13, %v2181_v37 }
 0xa90   :  { %2716 = vrot.lane.b32.xlu1 %v2709_v40, %s3807_s26 }
 0xa96   :  { %v2183_v50 = vpop.permute.xlu1 %2182 }
 0xa97   :  { %2187 = vst.msk [vmem:[#allocation3 + $0x8] sm:$0xff] %vm795_vm13, %v2183_v50 }
 0xa9e   :  { %v2293_v35 = vpop.permute.xlu2 %2292 }
 0xa9f   :  { %2297 = vst.msk [vmem:[#allocation3 + $0x8] sm:$0xff] %vm906_vm14, %v2293_v35 }
 0xaa6   :  { %v2723_v58 = vld [vmem:[#allocation3 + $0x8] sm:$0xff] }
 0xaae   :  { %v2291_v23 = vpop.permute.xlu1 %2290 }
 0xaaf   :  { %2296 = vst.msk [vmem:[#allocation3] sm:$0xff] %vm906_vm14, %v2291_v23 }
 0xab0   :  { %v2599_v42 = vpop.f32.mrf.mxu1 }
 0xab1   :  { %2606 = vrot.lane.b32.xlu2 %v2599_v42, %s3806_s1 }
 0xab6   :  { %v2722_v4 = vld [vmem:[#allocation3] sm:$0xff] }
 0xab7   :  { %3372 = vmatmul.msk.f32.vlgmr.msra.gmra.mxu0 %vm302_vm1, %v2722_v4 }
 0xabf   :  { %3373 = vmatmul.msk.f32.gmra.mxu0 %vm302_vm1, %v2723_v58 }
 0xadb   :  { %v2495_v47 = vpop.permute.xlu1 %2494 }
 0xadc   :  { %2500 = vst.msk [vmem:[#allocation3 + $0x10] sm:$0xff] %vm684_vm12, %v2495_v47 }
 0xae2   :  { %v2715_v14 = vpop.permute.xlu2 %2714 }
 0xae3   :  { %v2497_v34 = vpop.permute.xlu1 %2496 }
 0xae4   :  { %2501 = vst.msk [vmem:[#allocation3 + $0x18] sm:$0xff] %vm684_vm12, %v2497_v34 }
 0xaf1   :  { %v2605_v12 = vpop.permute.xlu0 %2604 }
 0xaf2   :  { %2610 = vst.msk [vmem:[#allocation3 + $0x10] sm:$0xff] %vm795_vm13, %v2605_v12 }
 0xaf3   :  { %2720 = vst.msk [vmem:[#allocation3 + $0x10] sm:$0xff] %vm906_vm14, %v2715_v14 }
 0xafa   :  { %v2724_v5 = vld [vmem:[#allocation3 + $0x10] sm:$0xff] }
 0xafb   :  { %3374 = vmatmul.msk.f32.gmra.mxu0 %vm302_vm1, %v2724_v5 }
 0xb02   :  { %v2717_v7 = vpop.permute.xlu1 %2716 }
 0xb0b   :  { %v2607_v18 = vpop.permute.xlu2 %2606 }
 0xb0c   :  { %2611 = vst.msk [vmem:[#allocation3 + $0x18] sm:$0xff] %vm795_vm13, %v2607_v18 }
 0xb0d   :  { %2721 = vst.msk [vmem:[#allocation3 + $0x18] sm:$0xff] %vm906_vm14, %v2717_v7 }
 0xb14   :  { %v2725_v43 = vld [vmem:[#allocation3 + $0x18] sm:$0xff] }
 0xb15   :  { %3375 = vmatmul.msk.f32.gmra.mxu0 %vm302_vm1, %v2725_v43 }
 0xb34   :  { %v2755_v24 = vpop.f32.mrf.mxu0 }
 0xb35   :  { %v4933_v16 = vadd.f32 %v2755_v24, %v4548_v51 }
 0xb37   :  { %v2771_v60 = vmul.f32 %v4933_v16, %v4933_v16 }
 0xb39   :  { %v2775_v48 = vsel %vm302_vm1, %v2771_v60, 0.0 }
 0xb3a   :  { %2776 = vadd.xlane.f32.xlu2 %v2775_v48 }
 0xb3c   :  { %v2758_v22 = vpop.f32.mrf.mxu0 }
 0xb3d   :  { %v4939_v29 = vadd.f32 %v2758_v22, %v4554_v63 }
 0xb3f   :  { %v2772_v28 = vmul.f32 %v4939_v29, %v4939_v29 }
 0xb41   :  { %v2778_v59 = vsel %vm302_vm1, %v2772_v28, 0.0 }
 0xb42   :  { %2779 = vadd.xlane.f32.xlu0 %v2778_v59 }
 0xb78   :  { %v2761_v32 = vpop.f32.mrf.mxu0 }
 0xb79   :  { %v4945_v51 = vadd.f32 %v2761_v32, %v4560_v36  ;;  %v1684_v36 = vld [vmem:[#allocation9 + $0x30] sm:$0xff] }
 0xb7a   :  { %2871 = vmatpush.msrb.mxu1 %v1684_v36  ;;  %v3307_v36 = vld [vmem:[%s5044_s11 + $0x58] sm:$0xff] }
 0xb7b   :  { %v2773_v61 = vmul.f32 %v4945_v51, %v4945_v51 }
 0xb7c   :  { %2872 = vmatpush.msrb.mxu1 %v1683_v25  ;;  %v3305_v25 = vld [vmem:[%s5044_s11 + $0x48] sm:$0xff] }
 0xb7d   :  { %v2781_v30 = vsel %vm302_vm1, %v2773_v61, 0.0 }
 0xb7e   :  { %2782 = vadd.xlane.f32.xlu1 %v2781_v30 }
 0xb92   :  { %v2764_v2 = vpop.f32.mrf.mxu0 }
 0xb93   :  { %v4951_v63 = vadd.f32 %v2764_v2, %v4566_v8  ;;  %v1682_v8 = vld [vmem:[#allocation9 + $0x20] sm:$0xff] }
 0xb94   :  { %2873 = vmatpush.msrb.mxu1 %v1682_v8  ;;  %v3304_v8 = vld [vmem:[%s5044_s11 + $0x40] sm:$0xff] }
 0xb95   :  { %v2774_v10 = vmul.f32 %v4951_v63, %v4951_v63 }
 0xb97   :  { %v2784_v1 = vsel %vm302_vm1, %v2774_v10, 0.0  ;;  %v3311_v10 = vld [vmem:[%s5044_s11 + $0x78] sm:$0xff] }
 0xb98   :  { %2785 = vadd.xlane.f32.xlu2 %v2784_v1  ;;  %3020 = vmatpush.msrb.mxu3 %v3311_v10  ;;  %v3310_v1 = vld [vmem:[%s5044_s11 + $0x70] sm:$0xff] }
 0xb9a   :  { %3021 = vmatpush.msrb.mxu3 %v3310_v1 }
 0xb9c   :  { %3022 = vmatpush.msrb.mxu3 %v3309_v21 }
 0xb9e   :  { %3023 = vmatpush.msrb.mxu3 %v3308_v17 }
 0xba0   :  { %3024 = vmatpush.msrb.mxu3 %v3307_v36 }
 0xba2   :  { %3025 = vmatpush.msrb.mxu3 %v3306_v6 }
 0xba4   :  { %3026 = vmatpush.msrb.mxu3 %v3305_v25 }
 0xba6   :  { %3027 = vmatpush.msrb.mxu3 %v3304_v8 }
 0xbad   :  { %v2777_v9 = vpop.xlane.xlu2 %2776 }
 0xbae   :  { %v2787_v45 = vmul.f32 %v2777_v9, %v4096_v62 }
 0xbb0   :  { %v2791_v49 = vadd.f32 1e-06, %v2787_v45 }
 0xbb2   :  { %3642 = vrsqrt.f32 %v2791_v49  ;;  %vm2801_vm5 = vweird.f32 %v2791_v49 }
 0xbb5   :  { %v2780_v52 = vpop.xlane.xlu0 %2779 }
 0xbb6   :  { %v2788_v46 = vmul.f32 %v2780_v52, %v4096_v62 }
 0xbb8   :  { %v3643_v26 = vpop.eup %3642  ;;  %v2792_v57 = vadd.f32 1e-06, %v2788_v46 }
 0xbb9   :  { %v2796_v13 = vmul.f32 %v3643_v26, %v2791_v49  ;;  %vm2802_vm15 = vweird.f32 %v3643_v26 }
 0xbba   :  { %3644 = vrsqrt.f32 %v2792_v57  ;;  %vm2803_vm12 = vmor %vm2801_vm5, %vm2802_vm15  ;;  %vm2811_vm14 = vweird.f32 %v2792_v57 }
 0xbbb   :  { %v2797_v19 = vmul.f32 %v3643_v26, %v2796_v13 }
 0xbbd   :  { %v2798_v33 = vmul.f32 0.5, %v2797_v19 }
 0xbbf   :  { %v2799_v41 = vsub.f32 1.5, %v2798_v33 }
 0xbc0   :  { %v3645_v54 = vpop.eup %3644 }
 0xbc1   :  { %v2800_v3 = vmul.f32 %v3643_v26, %v2799_v41  ;;  %v2806_v0 = vmul.f32 %v3645_v54, %v2792_v57  ;;  %vm2812_vm13 = vweird.f32 %v3645_v54 }
 0xbc2   :  { %vm2813_vm4 = vmor %vm2811_vm14, %vm2812_vm13 }
 0xbc3   :  { %v2804_v27 = vsel %vm2803_vm12, %v3643_v26, %v2800_v3  ;;  %v2807_v55 = vmul.f32 %v3645_v54, %v2806_v0 }
 0xbc4   :  { %v2835_v56 = vmul.f32 %v2804_v27, %v4933_v16 }
 0xbc5   :  { %v2808_v15 = vmul.f32 0.5, %v2807_v55 }
 0xbc6   :  { %v2842_v37 = vmul.f32 %v3470_v53, %v2835_v56 }
 0xbc7   :  { %v2809_v40 = vsub.f32 1.5, %v2808_v15 }
 0xbc8   :  { %3376 = vmatmul.msk.f32.vlgmr.msrb.gmra.mxu1 %vm302_vm1, %v2842_v37  ;;  %3380 = vmatmul.msk.f32.vlgmr.msra.gmra.mxu2 %vm302_vm1, %v2842_v37 }
 0xbc9   :  { %v2810_v38 = vmul.f32 %v3645_v54, %v2809_v40 }
 0xbcb   :  { %v2814_v31 = vsel %vm2813_vm4, %v3645_v54, %v2810_v38 }
 0xbcc   :  { %v2836_v11 = vmul.f32 %v2814_v31, %v4939_v29 }
 0xbce   :  { %v2843_v20 = vmul.f32 %v3470_v53, %v2836_v11 }
 0xbd0   :  { %3377 = vmatmul.msk.f32.gmra.mxu1 %vm302_vm1, %v2843_v20  ;;  %3381 = vmatmul.msk.f32.gmra.mxu2 %vm302_vm1, %v2843_v20 }
 0xbf1   :  { %v2783_v50 = vpop.xlane.xlu1 %2782 }
 0xbf2   :  { %v2789_v35 = vmul.f32 %v2783_v50, %v4096_v62 }
 0xbf4   :  { %v2793_v23 = vadd.f32 1e-06, %v2789_v35 }
 0xbf6   :  { %3646 = vrsqrt.f32 %v2793_v23  ;;  %vm2821_vm7 = vweird.f32 %v2793_v23 }
 0xbfc   :  { %v3647_v42 = vpop.eup %3646 }
 0xbfd   :  { %v2816_v4 = vmul.f32 %v3647_v42, %v2793_v23  ;;  %vm2822_vm6 = vweird.f32 %v3647_v42 }
 0xbfe   :  { %vm2823_vm9 = vmor %vm2821_vm7, %vm2822_vm6 }
 0xbff   :  { %v2817_v58 = vmul.f32 %v3647_v42, %v2816_v4 }
 0xc01   :  { %v2818_v47 = vmul.f32 0.5, %v2817_v58 }
 0xc03   :  { %v2819_v34 = vsub.f32 1.5, %v2818_v47 }
 0xc05   :  { %v2820_v12 = vmul.f32 %v3647_v42, %v2819_v34 }
 0xc07   :  { %v2824_v14 = vsel %vm2823_vm9, %v3647_v42, %v2820_v12 }
 0xc08   :  { %v2837_v5 = vmul.f32 %v2824_v14, %v4945_v51 }
 0xc0a   :  { %v2844_v18 = vmul.f32 %v3470_v53, %v2837_v5 }
 0xc0b   :  { %v2786_v7 = vpop.xlane.xlu2 %2785 }
 0xc0c   :  { %v2790_v43 = vmul.f32 %v2786_v7, %v4096_v62  ;;  %3378 = vmatmul.msk.f32.gmra.mxu1 %vm302_vm1, %v2844_v18  ;;  %3382 = vmatmul.msk.f32.gmra.mxu2 %vm302_vm1, %v2844_v18 }
 0xc0e   :  { %v2794_v24 = vadd.f32 1e-06, %v2790_v43 }
 0xc10   :  { %3648 = vrsqrt.f32 %v2794_v24  ;;  %vm2831_vm11 = vweird.f32 %v2794_v24 }
 0xc16   :  { %v3649_v60 = vpop.eup %3648 }
 0xc17   :  { %v2826_v48 = vmul.f32 %v3649_v60, %v2794_v24  ;;  %vm2832_vm10 = vweird.f32 %v3649_v60 }
 0xc18   :  { %vm2833_vm0 = vmor %vm2831_vm11, %vm2832_vm10 }
 0xc19   :  { %v2827_v22 = vmul.f32 %v3649_v60, %v2826_v48 }
 0xc1b   :  { %v2828_v28 = vmul.f32 0.5, %v2827_v22 }
 0xc1d   :  { %v2829_v59 = vsub.f32 1.5, %v2828_v28 }
 0xc1f   :  { %v2830_v32 = vmul.f32 %v3649_v60, %v2829_v59 }
 0xc21   :  { %v2834_v61 = vsel %vm2833_vm0, %v3649_v60, %v2830_v32 }
 0xc22   :  { %v2838_v30 = vmul.f32 %v2834_v61, %v4951_v63 }
 0xc24   :  { %v2845_v2 = vmul.f32 %v3470_v53, %v2838_v30 }
 0xc26   :  { %3379 = vmatmul.msk.f32.gmra.mxu1 %vm302_vm1, %v2845_v2  ;;  %3383 = vmatmul.msk.f32.gmra.mxu2 %vm302_vm1, %v2845_v2 }
 0xc45   :  { %v2875_v39 = vpop.f32.mrf.mxu1 }
 0xc46   :  { %v3384_v44 = vmul.f32 -1.442695, %v2875_v39 }
 0xc48   :  { %3650 = vpow2.f32 %v3384_v44 }
 0xc4b   :  { %v2904_v15 = vpop.f32.mrf.mxu2 }
 0xc4d   :  { %v2878_v9 = vpop.f32.mrf.mxu1 }
 0xc4e   :  { %v3651_v45 = vpop.eup %3650  ;;  %v3385_v49 = vmul.f32 -1.442695, %v2878_v9 }
 0xc4f   :  { %v2928_v52 = vadd.f32 1.0, %v3651_v45 }
 0xc50   :  { %3652 = vpow2.f32 %v3385_v49 }
 0xc51   :  { %3654 = vrcp.f32 %v2928_v52  ;;  %v2943_v33 = vand.u32 2147483648, %v2928_v52  ;;  %v2941_v54 = vand.u32 2147483647, %v2928_v52  ;;  %vm2937_vm3 = vweird.f32 %v2928_v52 }
 0xc53   :  { %v2944_v53 = vor.u32 1.1754944e-38, %v2943_v33  ;;  %vm2942_vm5 = vcmp.eq.f32.partialorder %v2941_v54, 8.507059e+37  ;;  %v2907_v58 = vpop.f32.mrf.mxu2 }
 0xc56   :  { %v3653_v46 = vpop.eup %3652 }
 0xc57   :  { %v3655_v26 = vpop.eup %3654  ;;  %v2929_v57 = vadd.f32 1.0, %v3653_v46 }
 0xc58   :  { %v2933_v13 = vmul.f32 %v3655_v26, %v2928_v52  ;;  %vm2938_vm2 = vweird.f32 %v3655_v26 }
 0xc59   :  { %3656 = vrcp.f32 %v2929_v57  ;;  %vm2939_vm15 = vmor %vm2937_vm3, %vm2938_vm2  ;;  %v2958_v38 = vand.u32 2147483648, %v2929_v57  ;;  %v2956_v20 = vand.u32 2147483647, %v2929_v57  ;;  %vm2952_vm13 = vweird.f32 %v2929_v57 }
 0xc5a   :  { %v2934_v19 = vsub.f32 1.0, %v2933_v13 }
 0xc5b   :  { %v2959_v35 = vor.u32 1.1754944e-38, %v2958_v38  ;;  %vm2957_vm4 = vcmp.eq.f32.partialorder %v2956_v20, 8.507059e+37 }
 0xc5c   :  { %v2935_v41 = vmul.f32 %v3655_v26, %v2934_v19 }
 0xc5e   :  { %v2936_v3 = vadd.f32 %v3655_v26, %v2935_v41 }
 0xc5f   :  { %v3657_v0 = vpop.eup %3656 }
 0xc60   :  { %v2940_v27 = vsel %vm2939_vm15, %v3655_v26, %v2936_v3  ;;  %v2948_v55 = vmul.f32 %v3657_v0, %v2929_v57  ;;  %vm2953_vm12 = vweird.f32 %v3657_v0 }
 0xc61   :  { %v2945_v56 = vsel %vm2942_vm5, %v2944_v53, %v2940_v27  ;;  %vm2954_vm14 = vmor %vm2952_vm13, %vm2953_vm12 }
 0xc62   :  { %v2992_v37 = vmul.f32 %v2945_v56, %v2875_v39  ;;  %v2949_v40 = vsub.f32 1.0, %v2948_v55 }
 0xc64   :  { %v2996_v31 = vmul.f32 %v2992_v37, %v2904_v15  ;;  %v2950_v11 = vmul.f32 %v3657_v0, %v2949_v40 }
 0xc66   :  { %v2951_v50 = vadd.f32 %v3657_v0, %v2950_v11  ;;  %3388 = vmatmul.msk.f32.vlgmr.msrb.gmra.mxu3 %vm1611_vm8, %v2996_v31 }
 0xc68   :  { %v2955_v23 = vsel %vm2954_vm14, %v3657_v0, %v2951_v50 }
 0xc69   :  { %v2960_v42 = vsel %vm2957_vm4, %v2959_v35, %v2955_v23 }
 0xc6a   :  { %v2993_v4 = vmul.f32 %v2960_v42, %v2878_v9 }
 0xc6c   :  { %v2997_v47 = vmul.f32 %v2993_v4, %v2907_v58 }
 0xc6e   :  { %3389 = vmatmul.msk.f32.gmra.mxu3 %vm1611_vm8, %v2997_v47 }
 0xc89   :  { %v2881_v34 = vpop.f32.mrf.mxu1 }
 0xc8a   :  { %v3386_v12 = vmul.f32 -1.442695, %v2881_v34 }
 0xc8c   :  { %3658 = vpow2.f32 %v3386_v12  ;;  %v3471_v12 = vld [vmem:[%s5045_s12] ss:$0 sm:$0xff]  ;;  %s3808_s12 = smov [#allocation12]  }
 0xc8d   :  { %s3129_s14 = sshll.u32 %s3808_s12, 4  ;;  %s3130_s14 = int_to_ptr.vmem [resolvable:$true] %s3129_s14 }
 0xc8f   :  { %v2910_v10 = vpop.f32.mrf.mxu2 }
 0xc92   :  { %v3659_v14 = vpop.eup %3658 }
 0xc93   :  { %v2930_v5 = vadd.f32 1.0, %v3659_v14 }
 0xc95   :  { %3660 = vrcp.f32 %v2930_v5  ;;  %v2973_v24 = vand.u32 2147483648, %v2930_v5  ;;  %v2971_v48 = vand.u32 2147483647, %v2930_v5  ;;  %vm2967_vm7 = vweird.f32 %v2930_v5 }
 0xc97   :  { %v2974_v28 = vor.u32 1.1754944e-38, %v2973_v24  ;;  %vm2972_vm10 = vcmp.eq.f32.partialorder %v2971_v48, 8.507059e+37 }
 0xc9b   :  { %v3661_v18 = vpop.eup %3660 }
 0xc9c   :  { %v2963_v7 = vmul.f32 %v3661_v18, %v2930_v5  ;;  %vm2968_vm6 = vweird.f32 %v3661_v18 }
 0xc9d   :  { %vm2969_vm9 = vmor %vm2967_vm7, %vm2968_vm6 }
 0xc9e   :  { %v2964_v43 = vsub.f32 1.0, %v2963_v7 }
 0xca0   :  { %v2965_v60 = vmul.f32 %v3661_v18, %v2964_v43 }
 0xca2   :  { %v2966_v22 = vadd.f32 %v3661_v18, %v2965_v60 }
 0xca3   :  { %v2884_v59 = vpop.f32.mrf.mxu1 }
 0xca4   :  { %v2970_v32 = vsel %vm2969_vm9, %v3661_v18, %v2966_v22  ;;  %v3387_v61 = vmul.f32 -1.442695, %v2884_v59 }
 0xca5   :  { %v2975_v30 = vsel %vm2972_vm10, %v2974_v28, %v2970_v32 }
 0xca6   :  { %v2994_v2 = vmul.f32 %v2975_v30, %v2881_v34  ;;  %3662 = vpow2.f32 %v3387_v61 }
 0xca8   :  { %v2998_v1 = vmul.f32 %v2994_v2, %v2910_v10 }
 0xca9   :  { %v2913_v26 = vpop.f32.mrf.mxu2 }
 0xcaa   :  { %3390 = vmatmul.msk.f32.gmra.mxu3 %vm1611_vm8, %v2998_v1 }
 0xcac   :  { %v3663_v21 = vpop.eup %3662 }
 0xcad   :  { %v2931_v17 = vadd.f32 1.0, %v3663_v21 }
 0xcaf   :  { %3664 = vrcp.f32 %v2931_v17  ;;  %v2988_v39 = vand.u32 2147483648, %v2931_v17  ;;  %v2986_v44 = vand.u32 2147483647, %v2931_v17  ;;  %vm2982_vm0 = vweird.f32 %v2931_v17 }
 0xcb1   :  { %v2989_v45 = vor.u32 1.1754944e-38, %v2988_v39  ;;  %vm2987_vm3 = vcmp.eq.f32.partialorder %v2986_v44, 8.507059e+37 }
 0xcb5   :  { %v3665_v36 = vpop.eup %3664 }
 0xcb6   :  { %v2978_v6 = vmul.f32 %v3665_v36, %v2931_v17  ;;  %vm2983_vm11 = vweird.f32 %v3665_v36 }
 0xcb7   :  { %vm2984_vm2 = vmor %vm2982_vm0, %vm2983_vm11 }
 0xcb8   :  { %v2979_v25 = vsub.f32 1.0, %v2978_v6 }
 0xcba   :  { %v2980_v8 = vmul.f32 %v3665_v36, %v2979_v25 }
 0xcbc   :  { %v2981_v9 = vadd.f32 %v3665_v36, %v2980_v8 }
 0xcbe   :  { %v2985_v49 = vsel %vm2984_vm2, %v3665_v36, %v2981_v9 }
 0xcbf   :  { %v2990_v52 = vsel %vm2987_vm3, %v2989_v45, %v2985_v49 }
 0xcc0   :  { %v2995_v46 = vmul.f32 %v2990_v52, %v2884_v59 }
 0xcc2   :  { %v2999_v57 = vmul.f32 %v2995_v46, %v2913_v26 }
 0xcc4   :  { %3391 = vmatmul.msk.f32.gmra.mxu3 %vm1611_vm8, %v2999_v57 }
 0xce9   :  { %v3029_v13 = vpop.f32.mrf.mxu3 }
 0xcea   :  { %v3041_v19 = vadd.f32 %v3029_v13, %v4933_v16 }
 0xcec   :  { %v3046_v33 = vmul.f32 %v3041_v19, %v3041_v19 }
 0xcee   :  { %v3050_v41 = vsel %vm302_vm1, %v3046_v33, 0.0 }
 0xcef   :  { %3051 = vadd.xlane.f32.xlu0 %v3050_v41 }
 0xcf1   :  { %v3032_v54 = vpop.f32.mrf.mxu3 }
 0xcf2   :  { %v3042_v3 = vadd.f32 %v3032_v54, %v4939_v29 }
 0xcf4   :  { %v3047_v0 = vmul.f32 %v3042_v3, %v3042_v3 }
 0xcf6   :  { %v3053_v53 = vsel %vm302_vm1, %v3047_v0, 0.0 }
 0xcf7   :  { %3054 = vadd.xlane.f32.xlu1 %v3053_v53 }
 0xd2d   :  { %v3035_v27 = vpop.f32.mrf.mxu3 }
 0xd2e   :  { %v3043_v55 = vadd.f32 %v3035_v27, %v4945_v51 }
 0xd30   :  { %v3048_v56 = vmul.f32 %v3043_v55, %v3043_v55 }
 0xd32   :  { %v3056_v15 = vsel %vm302_vm1, %v3048_v56, 0.0 }
 0xd33   :  { %3057 = vadd.xlane.f32.xlu2 %v3056_v15 }
 0xd47   :  { %v3038_v37 = vpop.f32.mrf.mxu3 }
 0xd48   :  { %v5010_v16 = vadd.f32 %v3038_v37, %v4951_v63 }
 0xd4a   :  { %v3049_v40 = vmul.f32 %v5010_v16, %v5010_v16 }
 0xd4c   :  { %v3059_v29 = vsel %vm302_vm1, %v3049_v40, 0.0 }
 0xd4d   :  { %3060 = vadd.xlane.f32.xlu0 %v3059_v29 }
 0xd62   :  { %v3052_v38 = vpop.xlane.xlu0 %3051 }
 0xd63   :  { %v3062_v31 = vmul.f32 %v3052_v38, %v4096_v62 }
 0xd65   :  { %v3066_v11 = vadd.f32 1e-06, %v3062_v31 }
 0xd67   :  { %3666 = vrsqrt.f32 %v3066_v11  ;;  %vm3076_vm15 = vweird.f32 %v3066_v11 }
 0xd6a   :  { %v3055_v51 = vpop.xlane.xlu1 %3054 }
 0xd6b   :  { %v3063_v20 = vmul.f32 %v3055_v51, %v4096_v62 }
 0xd6d   :  { %v3667_v50 = vpop.eup %3666  ;;  %v3067_v35 = vadd.f32 1e-06, %v3063_v20 }
 0xd6e   :  { %v3071_v23 = vmul.f32 %v3667_v50, %v3066_v11  ;;  %vm3077_vm8 = vweird.f32 %v3667_v50 }
 0xd6f   :  { %3668 = vrsqrt.f32 %v3067_v35  ;;  %vm3078_vm5 = vmor %vm3076_vm15, %vm3077_vm8  ;;  %vm3086_vm13 = vweird.f32 %v3067_v35 }
 0xd70   :  { %v3072_v63 = vmul.f32 %v3667_v50, %v3071_v23 }
 0xd72   :  { %v3073_v42 = vmul.f32 0.5, %v3072_v63 }
 0xd74   :  { %v3074_v4 = vsub.f32 1.5, %v3073_v42 }
 0xd75   :  { %v3669_v58 = vpop.eup %3668 }
 0xd76   :  { %v3075_v47 = vmul.f32 %v3667_v50, %v3074_v4  ;;  %v3081_v34 = vmul.f32 %v3669_v58, %v3067_v35  ;;  %vm3087_vm12 = vweird.f32 %v3669_v58 }
 0xd77   :  { %vm3088_vm14 = vmor %vm3086_vm13, %vm3087_vm12 }
 0xd78   :  { %v3079_v14 = vsel %vm3078_vm5, %v3667_v50, %v3075_v47  ;;  %v3082_v5 = vmul.f32 %v3669_v58, %v3081_v34 }
 0xd79   :  { %v3110_v18 = vmul.f32 %v3079_v14, %v3041_v19 }
 0xd7a   :  { %v3083_v7 = vmul.f32 0.5, %v3082_v5 }
 0xd7b   :  { %v3117_v43 = vmul.f32 %v3471_v12, %v3110_v18 }
 0xd7c   :  { %v3084_v24 = vsub.f32 1.5, %v3083_v7 }
 0xd7d   :  { %3121 = vst.msk [vmem:[#allocation12] sm:$0xff] %vm302_vm1, %v3117_v43 }
 0xd7e   :  { %v3085_v60 = vmul.f32 %v3669_v58, %v3084_v24 }
 0xd80   :  { %v3089_v48 = vsel %vm3088_vm14, %v3669_v58, %v3085_v60 }
 0xd81   :  { %v3111_v22 = vmul.f32 %v3089_v48, %v3042_v3 }
 0xd83   :  { %v3118_v28 = vmul.f32 %v3471_v12, %v3111_v22 }
 0xd85   :  { %3122 = vst.msk [vmem:[#allocation12 + $0x8] sm:$0xff] %vm302_vm1, %v3118_v28 }
 0xda6   :  { %v3058_v59 = vpop.xlane.xlu2 %3057 }
 0xda7   :  { %v3064_v32 = vmul.f32 %v3058_v59, %v4096_v62 }
 0xda9   :  { %v3068_v61 = vadd.f32 1e-06, %v3064_v32 }
 0xdab   :  { %3670 = vrsqrt.f32 %v3068_v61  ;;  %vm3096_vm6 = vweird.f32 %v3068_v61 }
 0xdb1   :  { %v3671_v30 = vpop.eup %3670 }
 0xdb2   :  { %v3091_v2 = vmul.f32 %v3671_v30, %v3068_v61  ;;  %vm3097_vm4 = vweird.f32 %v3671_v30 }
 0xdb3   :  { %vm3098_vm7 = vmor %vm3096_vm6, %vm3097_vm4 }
 0xdb4   :  { %v3092_v10 = vmul.f32 %v3671_v30, %v3091_v2 }
 0xdb6   :  { %v3093_v1 = vmul.f32 0.5, %v3092_v10 }
 0xdb8   :  { %v3094_v21 = vsub.f32 1.5, %v3093_v1 }
 0xdba   :  { %v3095_v17 = vmul.f32 %v3671_v30, %v3094_v21 }
 0xdbc   :  { %v3099_v36 = vsel %vm3098_vm7, %v3671_v30, %v3095_v17 }
 0xdbd   :  { %v3112_v6 = vmul.f32 %v3099_v36, %v3043_v55 }
 0xdbf   :  { %v3119_v25 = vmul.f32 %v3471_v12, %v3112_v6 }
 0xdc0   :  { %v3061_v39 = vpop.xlane.xlu0 %3060 }
 0xdc1   :  { %v3065_v8 = vmul.f32 %v3061_v39, %v4096_v62  ;;  %3123 = vst.msk [vmem:[#allocation12 + $0x10] sm:$0xff] %vm302_vm1, %v3119_v25 }
 0xdc3   :  { %v3069_v44 = vadd.f32 1e-06, %v3065_v8 }
 0xdc5   :  { %3672 = vrsqrt.f32 %v3069_v44  ;;  %vm3106_vm10 = vweird.f32 %v3069_v44 }
 0xdcb   :  { %v3673_v9 = vpop.eup %3672 }
 0xdcc   :  { %v3101_v45 = vmul.f32 %v3673_v9, %v3069_v44  ;;  %vm3107_vm9 = vweird.f32 %v3673_v9 }
 0xdcd   :  { %vm3108_vm11 = vmor %vm3106_vm10, %vm3107_vm9 }
 0xdce   :  { %v3102_v49 = vmul.f32 %v3673_v9, %v3101_v45 }
 0xdd0   :  { %v3103_v52 = vmul.f32 0.5, %v3102_v49 }
 0xdd2   :  { %v3104_v46 = vsub.f32 1.5, %v3103_v52 }
 0xdd4   :  { %v3105_v26 = vmul.f32 %v3673_v9, %v3104_v46 }
 0xdd6   :  { %v3109_v57 = vsel %vm3108_vm11, %v3673_v9, %v3105_v26 }
 0xdd7   :  { %v3113_v62 = vmul.f32 %v3109_v57, %v5010_v16 }
 0xdd9   :  { %v3120_v13 = vmul.f32 %v3471_v12, %v3113_v62 }
 0xddb   :  { %3124 = vst.msk [vmem:[#allocation12 + $0x18] sm:$0xff] %vm302_vm1, %v3120_v13 }
 0xddc   :  { %3137 = dma.vmem_to_hbm [thread:$0]  %s3130_s14, 512, %s3132_s23, [#allocation6], %s3795_s16, %s3795_s16, %s3796_s17  }
 0xddd   :  { %3792 = dma.done.wait [#allocation6], 512  }
 0xdde   :  { %3793 = vsyncadd [#allocation6], 4294966784 }
 0xddf   :  { %3142 = vsyncpa [#allocation5], 1 }
 0xde0   :  { %3143 = vsyncpa [#allocation10], 1 }
 0xde1   :  { %3144 = vsyncpa [#allocation6], 1 }
 0xde2   :  { %3145 = vsyncpa [#allocation7], 1 }

</bundles_post_ra>
